<compile_context>
chip_gen: v7x
topology: tpu7x:2x2x1
jax: 0.10.0
libtpu: 0.0.40
codegen_flags: <defaults>
</compile_context>

<pallas_src>
import functools

import jax
import jax.numpy as jnp
from jax.experimental import pallas as pl
from jax.experimental.pallas import tpu as pltpu

EPS = 1e-5


def _round_up(x, m):
    return ((x + m - 1) // m) * m


def _row_mask(tm, n_rows):
    row = jax.lax.broadcasted_iota(jnp.int32, (tm, 1), 0) + pl.program_id(0) * tm
    return row < n_rows


# ----------------------------- kernels --------------------------------------


def _stats1_kernel(z_ref, w1_ref, h1_ref, sq_ref, *, n_rows):
    """h1 = z @ w1 (pre-BN bias dropped): emit bf16 h1 + per-tile sum/sumsq."""
    h1 = jnp.dot(z_ref[...].astype(jnp.bfloat16), w1_ref[...],
                 preferred_element_type=jnp.float32)
    h1b = h1.astype(jnp.bfloat16)
    h1_ref[...] = h1b
    # Compute statistics from the bf16-rounded h1 so BN1 is exactly consistent
    # with what passes 2/3 will read back from HBM.
    h1s = h1b.astype(jnp.float32)
    if n_rows is not None:  # ragged last tile: drop garbage rows from stats
        h1s = jnp.where(_row_mask(h1s.shape[0], n_rows), h1s, 0.0)
    s = jnp.sum(h1s, axis=0, keepdims=True)
    q = jnp.sum(h1s * h1s, axis=0, keepdims=True)
    sq_ref[...] = jnp.concatenate([s, q], axis=0)[None]


def _stats2_kernel(h1_ref, sc1_ref, sh1_ref, w2_ref, sq_ref, *, n_rows):
    """h2 = relu(BN1(h1)) @ w2: emit per-tile sum / sum-of-squares of h2."""
    a1 = jnp.maximum(
        h1_ref[...].astype(jnp.float32) * sc1_ref[...] + sh1_ref[...], 0.0)
    if n_rows is not None:
        a1 = jnp.where(_row_mask(a1.shape[0], n_rows), a1, 0.0)
    h2 = jnp.dot(a1.astype(jnp.bfloat16), w2_ref[...],
                 preferred_element_type=jnp.float32)
    s = jnp.sum(h2, axis=0, keepdims=True)
    q = jnp.sum(h2 * h2, axis=0, keepdims=True)
    sq_ref[...] = jnp.concatenate([s, q], axis=0)[None]


def _final_kernel(h1_ref, sc1_ref, sh1_ref, w2s_ref, sh2_ref, w3_ref, b3_ref,
                  out_ref):
    """out = tanh(relu(BN2(relu(BN1(h1)) @ w2)) @ w3 + b3); BN2 scale folded."""
    a1 = jnp.maximum(
        h1_ref[...].astype(jnp.float32) * sc1_ref[...] + sh1_ref[...], 0.0)
    h2 = jnp.dot(a1.astype(jnp.bfloat16), w2s_ref[...],
                 preferred_element_type=jnp.float32)
    a2 = jnp.maximum(h2 + sh2_ref[...], 0.0)
    o = jnp.dot(a2.astype(jnp.bfloat16), w3_ref[...],
                preferred_element_type=jnp.float32) + b3_ref[...]
    out_ref[...] = jnp.tanh(o)


# ----------------------------- wrapper ---------------------------------------


def generator_forward(z, params, *, block_rows=2048):
    """z: (N, input_size) f32. params: dict of weights (see init_params)."""
    n, in_dim = z.shape
    h1_dim = params["w1"].shape[1]          # 128
    h2_dim = params["w2"].shape[1]          # 256
    out_dim = params["w3"].shape[1]

    f32, bf16 = jnp.float32, jnp.bfloat16
    op = _round_up(max(out_dim, 128), 128)  # lane-dense output width

    # Big batch tile (amortize per-grid-step overhead) but capped so the
    # "parallel" batch grid has >= 2 tiles (keeps both v7x TensorCores busy).
    # Multiple of 16 covers the bf16 sublane-packing requirement.
    tm = max(16, min(block_rows, _round_up(-(-n // 2), 16)))
    n_tiles = -(-n // tm)
    ragged = (n % tm) != 0
    n_rows = n if ragged else None

    z = z.astype(f32)
    w1 = params["w1"].astype(bf16)                                   # (in,128)
    w2 = params["w2"].astype(bf16)                                   # (128,256)
    w3p = jnp.zeros((h2_dim, op), bf16).at[:, :out_dim].set(
        params["w3"].astype(bf16))
    b3p = jnp.zeros((1, op), f32).at[:, :out_dim].set(params["b3"].astype(f32))

    def resident(shape):
        # Full-array block, constant index_map -> stays VMEM resident.
        return pl.BlockSpec(shape, lambda i, _n=len(shape): (0,) * _n)

    def row_spec(width):
        return pl.BlockSpec((tm, width), lambda i: (i, 0))

    def sq_spec(c):
        return pl.BlockSpec((1, 2, c), lambda i: (i, 0, 0))

    # Default scoped VMEM (16 MiB on v5e) is plenty at default sizes; only ask
    # for more if a caller picks very large tiles / output widths.
    step_bytes = 2 * (tm * max(in_dim, h1_dim) * 4 + tm * op * 4) + (1 << 20)
    vmem_cap = None if step_bytes < (12 << 20) else min(2 * step_bytes, 48 << 20)
    cparams = pltpu.CompilerParams(dimension_semantics=("parallel",),
                                   vmem_limit_bytes=vmem_cap)

    # ---- pass 1: h1 = z @ w1 (bf16) + per-tile batch stats of h1 ------------
    h1, sq1 = pl.pallas_call(
        functools.partial(_stats1_kernel, n_rows=n_rows),
        out_shape=(jax.ShapeDtypeStruct((n, h1_dim), bf16),
                   jax.ShapeDtypeStruct((n_tiles, 2, h1_dim), f32)),
        grid=(n_tiles,),
        in_specs=[row_spec(in_dim), resident((in_dim, h1_dim))],
        out_specs=(row_spec(h1_dim), sq_spec(h1_dim)),
        compiler_params=cparams,
        cost_estimate=pl.CostEstimate(
            flops=2 * n * in_dim * h1_dim,
            transcendentals=0,
            bytes_accessed=4 * n * in_dim + 2 * n * h1_dim
                           + 2 * in_dim * h1_dim + 8 * n_tiles * h1_dim),
    )(z, w1)
    tot1 = jnp.sum(sq1, axis=0)                                       # (2,128)
    mean1 = tot1[0:1] / n
    var1 = jnp.maximum(tot1[1:2] / n - mean1 * mean1, 0.0)            # biased
    scale1 = params["g1"] * jax.lax.rsqrt(var1 + EPS)
    shift1 = params["bt1"] - mean1 * scale1

    # ---- pass 2: per-tile batch stats of h2 = relu(BN1(h1)) @ w2 ------------
    sq2 = pl.pallas_call(
        functools.partial(_stats2_kernel, n_rows=n_rows),
        out_shape=jax.ShapeDtypeStruct((n_tiles, 2, h2_dim), f32),
        grid=(n_tiles,),
        in_specs=[row_spec(h1_dim), resident((1, h1_dim)),
                  resident((1, h1_dim)), resident((h1_dim, h2_dim))],
        out_specs=sq_spec(h2_dim),
        compiler_params=cparams,
        cost_estimate=pl.CostEstimate(
            flops=2 * n * h1_dim * h2_dim,
            transcendentals=0,
            bytes_accessed=2 * n * h1_dim + 2 * h1_dim * h2_dim
                           + 8 * n_tiles * h2_dim),
    )(h1, scale1, shift1, w2)
    tot2 = jnp.sum(sq2, axis=0)
    mean2 = tot2[0:1] / n
    var2 = jnp.maximum(tot2[1:2] / n - mean2 * mean2, 0.0)
    scale2 = params["g2"] * jax.lax.rsqrt(var2 + EPS)
    shift2 = params["bt2"] - mean2 * scale2
    # Fold BN2's scale into w2's columns so pass 3 only adds shift2 pre-ReLU.
    w2s = (params["w2"].astype(f32) * scale2).astype(bf16)

    # ---- pass 3: full forward ------------------------------------------------
    out_p = pl.pallas_call(
        _final_kernel,
        out_shape=jax.ShapeDtypeStruct((n, op), f32),
        grid=(n_tiles,),
        in_specs=[row_spec(h1_dim), resident((1, h1_dim)),
                  resident((1, h1_dim)), resident((h1_dim, h2_dim)),
                  resident((1, h2_dim)), resident((h2_dim, op)),
                  resident((1, op))],
        out_specs=row_spec(op),
        compiler_params=cparams,
        cost_estimate=pl.CostEstimate(
            flops=2 * n * (h1_dim * h2_dim + h2_dim * op),
            transcendentals=n * op,
            bytes_accessed=2 * n * h1_dim + 4 * n * op
                           + 2 * h1_dim * h2_dim + 2 * h2_dim * op),
    )(h1, scale1, shift1, w2s, shift2, w3p, b3p)

    return out_p[:, :out_dim] if op != out_dim else out_p


def init_params(key, input_size, output_size):
    """Deterministic synthetic parameter init (PyTorch-style uniform fan-in)."""
    ks = jax.random.split(key, 6)

    def linear(kw, kb, fan_in, fan_out):
        bound = 1.0 / jnp.sqrt(fan_in)
        w = jax.random.uniform(kw, (fan_in, fan_out), jnp.float32, -bound, bound)
        b = jax.random.uniform(kb, (1, fan_out), jnp.float32, -bound, bound)
        return w, b

    w1, b1 = linear(ks[0], ks[1], input_size, 128)
    w2, b2 = linear(ks[2], ks[3], 128, 256)
    w3, b3 = linear(ks[4], ks[5], 256, output_size)
    # b1/b2 exist in the PyTorch module but cancel exactly under training-mode
    # BatchNorm, so the kernels never consume them (reference-only below).
    return {
        "w1": w1, "b1": b1,
        "g1": jnp.ones((1, 128), jnp.float32), "bt1": jnp.zeros((1, 128), jnp.float32),
        "w2": w2, "b2": b2,
        "g2": jnp.ones((1, 256), jnp.float32), "bt2": jnp.zeros((1, 256), jnp.float32),
        "w3": w3, "b3": b3,
    }


if __name__ == "__main__":
    key = jax.random.PRNGKey(0)
    k_z, k_p = jax.random.split(key)

    batch = 600         # small stand-in for num_patients * num_timepoints
    z_dim = 100         # input_size (z_dim in the reference script)
    output_size = 32    # small synthetic output width

    z = jax.random.normal(k_z, (batch, z_dim), dtype=jnp.float32)
    params = init_params(k_p, z_dim, output_size)

    # block_rows=256 forces a 3-tile batch grid (ragged last tile) so the
    # tiled/pipelined + row-masked path is exercised at a small size.
    fwd = jax.jit(functools.partial(generator_forward, block_rows=256))
    out = jax.block_until_ready(fwd(z, params))

    # Pure-JAX f32 reference of the PyTorch module (training-mode BatchNorm1d).
    def reference(zz, p):
        def bn(h, g, b):
            m = jnp.mean(h, axis=0, keepdims=True)
            v = jnp.mean((h - m) ** 2, axis=0, keepdims=True)
            return (h - m) * jax.lax.rsqrt(v + EPS) * g + b

        h = jnp.maximum(bn(zz @ p["w1"] + p["b1"], p["g1"], p["bt1"]), 0.0)
        h = jnp.maximum(bn(h @ p["w2"] + p["b2"], p["g2"], p["bt2"]), 0.0)
        return jnp.tanh(h @ p["w3"] + p["b3"])

    ref = reference(z, params)

    assert out.shape == (batch, output_size)
    assert bool(jnp.all(jnp.isfinite(out)))
    assert bool(jnp.all(jnp.abs(out) <= 1.0))  # tanh output range
    max_err = float(jnp.max(jnp.abs(out - ref)))
    assert max_err < 5e-2, f"mismatch vs reference: {max_err}"
    print("KERNEL_OK")
</pallas_src>

<mosaic_0001>
module attributes {stable_mosaic.version = 11 : i64} {
  func.func @_stats1_kernel(%arg0: i32, %arg1: memref<256x100xf32, #tpu.memory_space<vmem>>, %arg2: memref<100x128xbf16, #tpu.memory_space<vmem>>, %arg3: memref<256x128xbf16, #tpu.memory_space<vmem>>, %arg4: memref<1x2x128xf32, #tpu.memory_space<vmem>>) attributes {dimension_semantics = [#tpu.dimension_semantics<parallel>], iteration_bounds = array<i64: 3>, scalar_prefetch = 0 : i64, scratch_operands = 0 : i64, tpu.core_type = #tpu.core_type<tc>, window_params = [{transform_indices = @transform_0, window_bounds = array<i64: 256, 100>}, {pipeline_mode = #tpu.pipeline_mode<synchronous>, transform_indices = @transform_1, window_bounds = array<i64: 100, 128>}, {transform_indices = @transform_2, window_bounds = array<i64: 256, 128>}, {transform_indices = @transform_3, window_bounds = array<i64: 1, 2, 128>}]} {
    %c0 = arith.constant 0 : index
    %c0_0 = arith.constant 0 : index
    %0 = vector.load %arg1[%c0, %c0_0] : memref<256x100xf32, #tpu.memory_space<vmem>>, vector<256x100xf32>
    %1 = arith.truncf %0 : vector<256x100xf32> to vector<256x100xbf16>
    %c0_1 = arith.constant 0 : index
    %c0_2 = arith.constant 0 : index
    %2 = vector.load %arg2[%c0_1, %c0_2] : memref<100x128xbf16, #tpu.memory_space<vmem>>, vector<100x128xbf16>
    %cst = arith.constant dense<0.000000e+00> : vector<256x128xf32>
    %3 = tpu.matmul %1, %2, %cst {dimension_numbers = #tpu.dot_dimension_numbers<[1], [0], [0], [1], [0, 0, 1, 1], [], []>} : vector<256x100xbf16>, vector<100x128xbf16>, vector<256x128xf32> -> vector<256x128xf32>
    %4 = arith.truncf %3 : vector<256x128xf32> to vector<256x128xbf16>
    %c0_3 = arith.constant 0 : index
    %c0_4 = arith.constant 0 : index
    %5 = vector.load %arg3[%c0_3, %c0_4] : memref<256x128xbf16, #tpu.memory_space<vmem>>, vector<256x128xbf16>
    tpu.vector_store %arg3[%c0_3, %c0_4], %4 {strides = array<i32>} : memref<256x128xbf16, #tpu.memory_space<vmem>>, vector<256x128xbf16>,
    %6 = arith.extf %4 : vector<256x128xbf16> to vector<256x128xf32>
    %7 = tpu.iota {dimensions = array<i32: 0>} : vector<256x1xi32>
    %c256_i32 = arith.constant 256 : i32
    %8 = arith.muli %arg0, %c256_i32 : i32
    %9 = vector.broadcast %8 : i32 to vector<256x1xi32>
    %10 = arith.addi %7, %9 : vector<256x1xi32>
    %c600_i32 = arith.constant 600 : i32
    %11 = vector.broadcast %c600_i32 : i32 to vector<256x1xi32>
    %12 = arith.cmpi slt, %10, %11 : vector<256x1xi32>
    %cst_5 = arith.constant 0.000000e+00 : f32
    %13 = vector.shape_cast %12 : vector<256x1xi1> to vector<256x1xi1>
    %14 = vector.broadcast %13 : vector<256x1xi1> to vector<256x128xi1>
    %15 = vector.broadcast %cst_5 : f32 to vector<256x128xf32>
    %16 = arith.select %14, %6, %15 : vector<256x128xi1>, vector<256x128xf32>
    %cst_6 = arith.constant dense<0.000000e+00> : vector<128xf32>
    %17 = vector.multi_reduction <add>, %16, %cst_6 [0] : vector<256x128xf32> to vector<128xf32>
    %18 = vector.shape_cast %17 : vector<128xf32> to vector<1x128xf32>
    %19 = arith.mulf %16, %16 : vector<256x128xf32>
    %cst_7 = arith.constant dense<0.000000e+00> : vector<128xf32>
    %20 = vector.multi_reduction <add>, %19, %cst_7 [0] : vector<256x128xf32> to vector<128xf32>
    %21 = vector.shape_cast %20 : vector<128xf32> to vector<1x128xf32>
    %22 = tpu.concatenate %18, %21 in 0 : vector<1x128xf32>, vector<1x128xf32> -> vector<2x128xf32>
    %23 = vector.shape_cast %22 : vector<2x128xf32> to vector<1x2x128xf32>
    %c0_8 = arith.constant 0 : index
    %c0_9 = arith.constant 0 : index
    %c0_10 = arith.constant 0 : index
    %24 = vector.load %arg4[%c0_8, %c0_9, %c0_10] : memref<1x2x128xf32, #tpu.memory_space<vmem>>, vector<1x2x128xf32>
    tpu.vector_store %arg4[%c0_8, %c0_9, %c0_10], %23 {strides = array<i32>} : memref<1x2x128xf32, #tpu.memory_space<vmem>>, vector<1x2x128xf32>,
    return
  }
  func.func @transform_0(%arg0: i32) -> (i32, i32) {
    %c0_i32 = arith.constant 0 : i32
    %c0_i32_0 = arith.constant 0 : i32
    return %arg0, %c0_i32 : i32, i32
  }
  func.func @transform_1(%arg0: i32) -> (i32, i32) {
    %c0_i32 = arith.constant 0 : i32
    %c0_i32_0 = arith.constant 0 : i32
    %c0_i32_1 = arith.constant 0 : i32
    return %c0_i32, %c0_i32_0 : i32, i32
  }
  func.func @transform_2(%arg0: i32) -> (i32, i32) {
    %c0_i32 = arith.constant 0 : i32
    %c0_i32_0 = arith.constant 0 : i32
    return %arg0, %c0_i32 : i32, i32
  }
  func.func @transform_3(%arg0: i32) -> (i32, i32, i32) {
    %c0_i32 = arith.constant 0 : i32
    %c0_i32_0 = arith.constant 0 : i32
    %c0_i32_1 = arith.constant 0 : i32
    return %arg0, %c0_i32, %c0_i32_0 : i32, i32, i32
  }
}

module attributes {stable_mosaic.version = 11 : i64} {
  func.func @_stats2_kernel(%arg0: i32, %arg1: memref<256x128xbf16, #tpu.memory_space<vmem>>, %arg2: memref<1x128xf32, #tpu.memory_space<vmem>>, %arg3: memref<1x128xf32, #tpu.memory_space<vmem>>, %arg4: memref<128x256xbf16, #tpu.memory_space<vmem>>, %arg5: memref<1x2x256xf32, #tpu.memory_space<vmem>>) attributes {dimension_semantics = [#tpu.dimension_semantics<parallel>], iteration_bounds = array<i64: 3>, scalar_prefetch = 0 : i64, scratch_operands = 0 : i64, tpu.core_type = #tpu.core_type<tc>, window_params = [{transform_indices = @transform_0, window_bounds = array<i64: 256, 128>}, {pipeline_mode = #tpu.pipeline_mode<synchronous>, transform_indices = @transform_1, window_bounds = array<i64: 1, 128>}, {pipeline_mode = #tpu.pipeline_mode<synchronous>, transform_indices = @transform_2, window_bounds = array<i64: 1, 128>}, {pipeline_mode = #tpu.pipeline_mode<synchronous>, transform_indices = @transform_3, window_bounds = array<i64: 128, 256>}, {transform_indices = @transform_4, window_bounds = array<i64: 1, 2, 256>}]} {
    %c0 = arith.constant 0 : index
    %c0_0 = arith.constant 0 : index
    %0 = vector.load %arg1[%c0, %c0_0] : memref<256x128xbf16, #tpu.memory_space<vmem>>, vector<256x128xbf16>
    %1 = arith.extf %0 : vector<256x128xbf16> to vector<256x128xf32>
    %c0_1 = arith.constant 0 : index
    %c0_2 = arith.constant 0 : index
    %2 = vector.load %arg2[%c0_1, %c0_2] : memref<1x128xf32, #tpu.memory_space<vmem>>, vector<1x128xf32>
    %3 = vector.broadcast %2 : vector<1x128xf32> to vector<256x128xf32>
    %4 = arith.mulf %1, %3 : vector<256x128xf32>
    %c0_3 = arith.constant 0 : index
    %c0_4 = arith.constant 0 : index
    %5 = vector.load %arg3[%c0_3, %c0_4] : memref<1x128xf32, #tpu.memory_space<vmem>>, vector<1x128xf32>
    %6 = vector.broadcast %5 : vector<1x128xf32> to vector<256x128xf32>
    %7 = arith.addf %4, %6 : vector<256x128xf32>
    %cst = arith.constant 0.000000e+00 : f32
    %8 = vector.broadcast %cst : f32 to vector<256x128xf32>
    %9 = arith.maximumf %7, %8 : vector<256x128xf32>
    %10 = tpu.iota {dimensions = array<i32: 0>} : vector<256x1xi32>
    %c256_i32 = arith.constant 256 : i32
    %11 = arith.muli %arg0, %c256_i32 : i32
    %12 = vector.broadcast %11 : i32 to vector<256x1xi32>
    %13 = arith.addi %10, %12 : vector<256x1xi32>
    %c600_i32 = arith.constant 600 : i32
    %14 = vector.broadcast %c600_i32 : i32 to vector<256x1xi32>
    %15 = arith.cmpi slt, %13, %14 : vector<256x1xi32>
    %cst_5 = arith.constant 0.000000e+00 : f32
    %16 = vector.shape_cast %15 : vector<256x1xi1> to vector<256x1xi1>
    %17 = vector.broadcast %16 : vector<256x1xi1> to vector<256x128xi1>
    %18 = vector.broadcast %cst_5 : f32 to vector<256x128xf32>
    %19 = arith.select %17, %9, %18 : vector<256x128xi1>, vector<256x128xf32>
    %20 = arith.truncf %19 : vector<256x128xf32> to vector<256x128xbf16>
    %c0_6 = arith.constant 0 : index
    %c0_7 = arith.constant 0 : index
    %21 = vector.load %arg4[%c0_6, %c0_7] : memref<128x256xbf16, #tpu.memory_space<vmem>>, vector<128x256xbf16>
    %cst_8 = arith.constant dense<0.000000e+00> : vector<256x256xf32>
    %22 = tpu.matmul %20, %21, %cst_8 {dimension_numbers = #tpu.dot_dimension_numbers<[1], [0], [0], [1], [0, 0, 1, 1], [], []>} : vector<256x128xbf16>, vector<128x256xbf16>, vector<256x256xf32> -> vector<256x256xf32>
    %cst_9 = arith.constant dense<0.000000e+00> : vector<256xf32>
    %23 = vector.multi_reduction <add>, %22, %cst_9 [0] : vector<256x256xf32> to vector<256xf32>
    %24 = vector.shape_cast %23 : vector<256xf32> to vector<1x256xf32>
    %25 = arith.mulf %22, %22 : vector<256x256xf32>
    %cst_10 = arith.constant dense<0.000000e+00> : vector<256xf32>
    %26 = vector.multi_reduction <add>, %25, %cst_10 [0] : vector<256x256xf32> to vector<256xf32>
    %27 = vector.shape_cast %26 : vector<256xf32> to vector<1x256xf32>
    %28 = tpu.concatenate %24, %27 in 0 : vector<1x256xf32>, vector<1x256xf32> -> vector<2x256xf32>
    %29 = vector.shape_cast %28 : vector<2x256xf32> to vector<1x2x256xf32>
    %c0_11 = arith.constant 0 : index
    %c0_12 = arith.constant 0 : index
    %c0_13 = arith.constant 0 : index
    %30 = vector.load %arg5[%c0_11, %c0_12, %c0_13] : memref<1x2x256xf32, #tpu.memory_space<vmem>>, vector<1x2x256xf32>
    tpu.vector_store %arg5[%c0_11, %c0_12, %c0_13], %29 {strides = array<i32>} : memref<1x2x256xf32, #tpu.memory_space<vmem>>, vector<1x2x256xf32>,
    return
  }
  func.func @transform_0(%arg0: i32) -> (i32, i32) {
    %c0_i32 = arith.constant 0 : i32
    %c0_i32_0 = arith.constant 0 : i32
    return %arg0, %c0_i32 : i32, i32
  }
  func.func @transform_1(%arg0: i32) -> (i32, i32) {
    %c0_i32 = arith.constant 0 : i32
    %c0_i32_0 = arith.constant 0 : i32
    %c0_i32_1 = arith.constant 0 : i32
    return %c0_i32, %c0_i32_0 : i32, i32
  }
  func.func @transform_2(%arg0: i32) -> (i32, i32) {
    %c0_i32 = arith.constant 0 : i32
    %c0_i32_0 = arith.constant 0 : i32
    %c0_i32_1 = arith.constant 0 : i32
    return %c0_i32, %c0_i32_0 : i32, i32
  }
  func.func @transform_3(%arg0: i32) -> (i32, i32) {
    %c0_i32 = arith.constant 0 : i32
    %c0_i32_0 = arith.constant 0 : i32
    %c0_i32_1 = arith.constant 0 : i32
    return %c0_i32, %c0_i32_0 : i32, i32
  }
  func.func @transform_4(%arg0: i32) -> (i32, i32, i32) {
    %c0_i32 = arith.constant 0 : i32
    %c0_i32_0 = arith.constant 0 : i32
    %c0_i32_1 = arith.constant 0 : i32
    return %arg0, %c0_i32, %c0_i32_0 : i32, i32, i32
  }
}

module attributes {stable_mosaic.version = 11 : i64} {
  func.func @_final_kernel(%arg0: i32, %arg1: memref<256x128xbf16, #tpu.memory_space<vmem>>, %arg2: memref<1x128xf32, #tpu.memory_space<vmem>>, %arg3: memref<1x128xf32, #tpu.memory_space<vmem>>, %arg4: memref<128x256xbf16, #tpu.memory_space<vmem>>, %arg5: memref<1x256xf32, #tpu.memory_space<vmem>>, %arg6: memref<256x128xbf16, #tpu.memory_space<vmem>>, %arg7: memref<1x128xf32, #tpu.memory_space<vmem>>, %arg8: memref<256x128xf32, #tpu.memory_space<vmem>>) attributes {dimension_semantics = [#tpu.dimension_semantics<parallel>], iteration_bounds = array<i64: 3>, scalar_prefetch = 0 : i64, scratch_operands = 0 : i64, tpu.core_type = #tpu.core_type<tc>, window_params = [{transform_indices = @transform_0, window_bounds = array<i64: 256, 128>}, {pipeline_mode = #tpu.pipeline_mode<synchronous>, transform_indices = @transform_1, window_bounds = array<i64: 1, 128>}, {pipeline_mode = #tpu.pipeline_mode<synchronous>, transform_indices = @transform_2, window_bounds = array<i64: 1, 128>}, {pipeline_mode = #tpu.pipeline_mode<synchronous>, transform_indices = @transform_3, window_bounds = array<i64: 128, 256>}, {pipeline_mode = #tpu.pipeline_mode<synchronous>, transform_indices = @transform_4, window_bounds = array<i64: 1, 256>}, {pipeline_mode = #tpu.pipeline_mode<synchronous>, transform_indices = @transform_5, window_bounds = array<i64: 256, 128>}, {pipeline_mode = #tpu.pipeline_mode<synchronous>, transform_indices = @transform_6, window_bounds = array<i64: 1, 128>}, {transform_indices = @transform_7, window_bounds = array<i64: 256, 128>}]} {
    %c0 = arith.constant 0 : index
    %c0_0 = arith.constant 0 : index
    %0 = vector.load %arg1[%c0, %c0_0] : memref<256x128xbf16, #tpu.memory_space<vmem>>, vector<256x128xbf16>
    %1 = arith.extf %0 : vector<256x128xbf16> to vector<256x128xf32>
    %c0_1 = arith.constant 0 : index
    %c0_2 = arith.constant 0 : index
    %2 = vector.load %arg2[%c0_1, %c0_2] : memref<1x128xf32, #tpu.memory_space<vmem>>, vector<1x128xf32>
    %3 = vector.broadcast %2 : vector<1x128xf32> to vector<256x128xf32>
    %4 = arith.mulf %1, %3 : vector<256x128xf32>
    %c0_3 = arith.constant 0 : index
    %c0_4 = arith.constant 0 : index
    %5 = vector.load %arg3[%c0_3, %c0_4] : memref<1x128xf32, #tpu.memory_space<vmem>>, vector<1x128xf32>
    %6 = vector.broadcast %5 : vector<1x128xf32> to vector<256x128xf32>
    %7 = arith.addf %4, %6 : vector<256x128xf32>
    %cst = arith.constant 0.000000e+00 : f32
    %8 = vector.broadcast %cst : f32 to vector<256x128xf32>
    %9 = arith.maximumf %7, %8 : vector<256x128xf32>
    %10 = arith.truncf %9 : vector<256x128xf32> to vector<256x128xbf16>
    %c0_5 = arith.constant 0 : index
    %c0_6 = arith.constant 0 : index
    %11 = vector.load %arg4[%c0_5, %c0_6] : memref<128x256xbf16, #tpu.memory_space<vmem>>, vector<128x256xbf16>
    %cst_7 = arith.constant dense<0.000000e+00> : vector<256x256xf32>
    %12 = tpu.matmul %10, %11, %cst_7 {dimension_numbers = #tpu.dot_dimension_numbers<[1], [0], [0], [1], [0, 0, 1, 1], [], []>} : vector<256x128xbf16>, vector<128x256xbf16>, vector<256x256xf32> -> vector<256x256xf32>
    %c0_8 = arith.constant 0 : index
    %c0_9 = arith.constant 0 : index
    %13 = vector.load %arg5[%c0_8, %c0_9] : memref<1x256xf32, #tpu.memory_space<vmem>>, vector<1x256xf32>
    %14 = vector.broadcast %13 : vector<1x256xf32> to vector<256x256xf32>
    %15 = arith.addf %12, %14 : vector<256x256xf32>
    %cst_10 = arith.constant 0.000000e+00 : f32
    %16 = vector.broadcast %cst_10 : f32 to vector<256x256xf32>
    %17 = arith.maximumf %15, %16 : vector<256x256xf32>
    %18 = arith.truncf %17 : vector<256x256xf32> to vector<256x256xbf16>
    %c0_11 = arith.constant 0 : index
    %c0_12 = arith.constant 0 : index
    %19 = vector.load %arg6[%c0_11, %c0_12] : memref<256x128xbf16, #tpu.memory_space<vmem>>, vector<256x128xbf16>
    %cst_13 = arith.constant dense<0.000000e+00> : vector<256x128xf32>
    %20 = tpu.matmul %18, %19, %cst_13 {dimension_numbers = #tpu.dot_dimension_numbers<[1], [0], [0], [1], [0, 0, 1, 1], [], []>} : vector<256x256xbf16>, vector<256x128xbf16>, vector<256x128xf32> -> vector<256x128xf32>
    %c0_14 = arith.constant 0 : index
    %c0_15 = arith.constant 0 : index
    %21 = vector.load %arg7[%c0_14, %c0_15] : memref<1x128xf32, #tpu.memory_space<vmem>>, vector<1x128xf32>
    %22 = vector.broadcast %21 : vector<1x128xf32> to vector<256x128xf32>
    %23 = arith.addf %20, %22 : vector<256x128xf32>
    %24 = math.tanh %23 : vector<256x128xf32>
    %c0_16 = arith.constant 0 : index
    %c0_17 = arith.constant 0 : index
    %25 = vector.load %arg8[%c0_16, %c0_17] : memref<256x128xf32, #tpu.memory_space<vmem>>, vector<256x128xf32>
    tpu.vector_store %arg8[%c0_16, %c0_17], %24 {strides = array<i32>} : memref<256x128xf32, #tpu.memory_space<vmem>>, vector<256x128xf32>,
    return
  }
  func.func @transform_0(%arg0: i32) -> (i32, i32) {
    %c0_i32 = arith.constant 0 : i32
    %c0_i32_0 = arith.constant 0 : i32
    return %arg0, %c0_i32 : i32, i32
  }
  func.func @transform_1(%arg0: i32) -> (i32, i32) {
    %c0_i32 = arith.constant 0 : i32
    %c0_i32_0 = arith.constant 0 : i32
    %c0_i32_1 = arith.constant 0 : i32
    return %c0_i32, %c0_i32_0 : i32, i32
  }
  func.func @transform_2(%arg0: i32) -> (i32, i32) {
    %c0_i32 = arith.constant 0 : i32
    %c0_i32_0 = arith.constant 0 : i32
    %c0_i32_1 = arith.constant 0 : i32
    return %c0_i32, %c0_i32_0 : i32, i32
  }
  func.func @transform_3(%arg0: i32) -> (i32, i32) {
    %c0_i32 = arith.constant 0 : i32
    %c0_i32_0 = arith.constant 0 : i32
    %c0_i32_1 = arith.constant 0 : i32
    return %c0_i32, %c0_i32_0 : i32, i32
  }
  func.func @transform_4(%arg0: i32) -> (i32, i32) {
    %c0_i32 = arith.constant 0 : i32
    %c0_i32_0 = arith.constant 0 : i32
    %c0_i32_1 = arith.constant 0 : i32
    return %c0_i32, %c0_i32_0 : i32, i32
  }
  func.func @transform_5(%arg0: i32) -> (i32, i32) {
    %c0_i32 = arith.constant 0 : i32
    %c0_i32_0 = arith.constant 0 : i32
    %c0_i32_1 = arith.constant 0 : i32
    return %c0_i32, %c0_i32_0 : i32, i32
  }
  func.func @transform_6(%arg0: i32) -> (i32, i32) {
    %c0_i32 = arith.constant 0 : i32
    %c0_i32_0 = arith.constant 0 : i32
    %c0_i32_1 = arith.constant 0 : i32
    return %c0_i32, %c0_i32_0 : i32, i32
  }
  func.func @transform_7(%arg0: i32) -> (i32, i32) {
    %c0_i32 = arith.constant 0 : i32
    %c0_i32_0 = arith.constant 0 : i32
    return %arg0, %c0_i32 : i32, i32
  }
}

</mosaic_0001>

<bundles_post_ra>
// kernel: generator_forward.3
= control target key start
LH: loop header
LB: loop body
LE: loop exit
PB: predicated region body
PF: predicated region fallthrough
CT: control target
= control target key end

     0   :  { %s1882_s12 = smov 0   ;;  %s1884_s13 = smov 0   ;;  %s2300_s0 = inlined_call_operand.vmem [shape: f32[600,100], index: 0, kind: input, shape index: {}]   ;;  %s2301_s1 = inlined_call_operand.vmem [shape: bf16[100,128], index: 1, kind: input, shape index: {}]   ;;  %s2302_s2 = inlined_call_operand.vmem [shape: bf16[600,128], index: 2, kind: output, shape index: {0}]   ;;  %s2303_s3 = inlined_call_operand.vmem [shape: f32[3,2,128], index: 3, kind: output, shape index: {1}]  }
   0x1   :  { %s1886_s14 = smov 0  }
   0x2 LB: > { %s1895_s15 = sadd.s32 4294967295, %s1828_s14   ;;  %s1897_s16 = sadd.s32 1, %s1828_s14   ;;  %s1828_s14 = sphi %s1886_s14, %s2310_s14   ;;  %s1824_s13 = sphi %s1884_s13, %s2309_s13   ;;  %s1820_s12 = sphi %s1882_s12, %s2308_s12  }
   0x3   : > { %s65_s17 = ssub.s32 %s1828_s14, %s1897_s16  ;;  %s68_s18 = sadd.s32 1, %s1824_s13 }
   0x4   : > { %p66_p0 = scmp.eq.s32.totalorder %s65_s17, 0  ;;  %p78_p1 = scmp.ne.s32.totalorder %s1824_s13, %s1820_s12 }
   0x5   : > { %p79_p2 = scmp.eq.s32.totalorder %s1895_s15, 2  ;;  %p1386_p3 = scmp.ge.s32.totalorder %s1828_s14, 1 }
   0x6   : > { %s1905_s19 = scalar_select %p66_p0, %s1824_s13, %s68_s18  }
   0x7   : > { %p1907_p4 = por %p79_p2, %p78_p1  ;;  %p149_p5 = scmp.lt.s32.totalorder %s1828_s14, 4 }
   0x9   : > { %p150_p6 = pnand %p1386_p3, %p149_p5 }
   0xa   : > { %v1767_v0 = vld [vmem:[%s2301_s1] sm:$0xff] (!%p150_p6)   ;;  %v1768_v1 = vld [vmem:[%s2301_s1 + $0x8] sm:$0xff] (!%p150_p6)   ;;  %s1918_s25 = sshll.u32 (!%p150_p6), %s1895_s15, 5  ;;  %v1769_v2 = vld [vmem:[%s2301_s1 + $0x10] sm:$0xff] (!%p150_p6)   ;;  %vm304_vm0 = vcmask (!%p150_p6), 818176   ;;  %vm353_vm1 = vcmask (!%p150_p6), 1041408   ;;  %v710_v56 = vlaneseq (!%p150_p6) }
   0xb   : > { %153 = sbr.rel (%p150_p6) target bundleno = 409 (0x199), region = 28  ;;  %1617 = vmatprep.subr.bf16.mxu0 (!%p150_p6), %v1767_v0  ;;  %p185_p7 = scmp.lt.s32.totalorder (!%p150_p6), %s1918_s25, 74  ;;  %1663 = vmatprep.subr.bf16.mxu1 (!%p150_p6), %v1767_v0  ;;  %v1770_v3 = vld [vmem:[%s2301_s1 + $0x18] sm:$0xff] (!%p150_p6)   ;;  %v1771_v7 = vld [vmem:[%s2301_s1 + $0x20] sm:$0xff] (!%p150_p6)   ;;  %v1772_v11 = vld [vmem:[%s2301_s1 + $0x28] sm:$0xff] (!%p150_p6)  }
   0xc   : > { %1618 = vmatpush3.bf16.msra.mxu0 (!%p150_p6), %v1767_v0  ;;  %1670 = vmatpush3.bf16.msra.mxu1 (!%p150_p6), %v1767_v0  ;;  %v1773_v12 = vld [vmem:[%s2301_s1 + $0x30] ss:$0 sps:$4 sm:$0x33] (!%p150_p6)   ;;  %v1990_v57 = vshrl.u32 (!%p150_p6), %v710_v56, 7  ;;  %s1446_s18 = sshll.u32 (!%p150_p6), %s1895_s15, 8  ;;  %s171_s21 = sand.u32 (!%p150_p6), 1, %s1820_s12  }
   0xd   : > { %1619 = vmatprep.subr.bf16.mxu0 (!%p150_p6), %v1768_v1  ;;  %1664 = vmatprep.subr.bf16.mxu1 (!%p150_p6), %v1768_v1  ;;  %v355_v16 = vsel (!%p150_p6), %vm353_vm1, %v1773_v12, 0  ;;  %v1995_v59 = vstv (!%p150_p6), %s1446_s18  ;;  %s1387_s22 = sshll.u32 (!%p150_p6), %s171_s21, 7  ;;  %p199_p8 = scmp.lt.s32.totalorder (!%p150_p6), %s1895_s15, 2 }
   0xe   : > { %v713_v58 = vadd.s32 (!%p150_p6), 16, %v1990_v57  ;;  %v712_v60 = vadd.s32 (!%p150_p6), 8, %v1990_v57  ;;  %v714_v61 = vadd.s32 (!%p150_p6), 24, %v1990_v57  ;;  %v717_v62 = vadd.s32 (!%p150_p6), 48, %v1990_v57  ;;  %s2013_s12 = scalar_lea.vmem (!%p150_p6), [#allocation2], %s1387_s22  }
  0x10   : > { %1620 = vmatpush3.bf16.msra.mxu0 (!%p150_p6), %v1768_v1  ;;  %1671 = vmatpush3.bf16.msra.mxu1 (!%p150_p6), %v1768_v1  ;;  %v747_v0 = vadd.s32 (!%p150_p6), %v1995_v59, %v713_v58  ;;  %v745_v1 = vadd.s32 (!%p150_p6), %v1995_v59, %v1990_v57 }
  0x11   : > { %1621 = vmatprep.subr.bf16.mxu0 (!%p150_p6), %v1769_v2  ;;  %1665 = vmatprep.subr.bf16.mxu1 (!%p150_p6), %v1769_v2 }
  0x12   : > { %s186_s28 = scalar_select %p185_p7, %s1918_s25, 74  ;;  %vm779_vm2 = vcmp.lt.s32.totalorder %v747_v0, 600  ;;  %vm777_vm3 = vcmp.lt.s32.totalorder %v745_v1, 600 }
  0x13   : > { %s200_s23 = scalar_select %p199_p8, %s1895_s15, 2 }
  0x14   : > { %s1389_s29 = sshll.u32 %s186_s28, 3  ;;  %1622 = vmatpush3.bf16.msra.mxu0 %v1769_v2  ;;  %1672 = vmatpush3.bf16.msra.mxu1 %v1769_v2  ;;  %s1496_s30 = sshll.u32 (%p1907_p4), %s1895_s15, 7 }
  0x15   : > { %s1928_s5 = scalar_lea.vmem %s2300_s0, %s1389_s29  ;;  %1623 = vmatprep.subr.bf16.mxu0 %v1770_v3  ;;  %1666 = vmatprep.subr.bf16.mxu1 %v1770_v3  ;;  %s1390_s24 = sshll.u32 %s200_s23, 1 }
  0x16   : > { %v204_v4 = vld [vmem:[%s1928_s5] sm:$0xff]  ;;  %v205_v5 = vld [vmem:[%s1928_s5 + $0x8] sm:$0xff]  ;;  %v206_v13 = vld [vmem:[%s1928_s5 + $0x10] sm:$0xff]  ;;  %s202_s28 = scalar_lea.vmem %s2303_s3, %s1390_s24  ;;  %s1026_s29 = ssub.s32 (%p1907_p4), 75, %s1918_s25 }
  0x17   : > { %v236_v6 = vpack.c.bf16 %v205_v5, %v204_v4  ;;  %v220_v8 = vld [vmem:[%s1928_s5 + $0x80] sm:$0xff]  ;;  %v221_v9 = vld [vmem:[%s1928_s5 + $0x88] sm:$0xff]  ;;  %v207_v14 = vld [vmem:[%s1928_s5 + $0x18] sm:$0xff]  ;;  %v715_v4 = vadd.s32 32, %v1990_v57  ;;  %p1027_p9 = scmp.lt.s32.totalorder (%p1907_p4), %s1026_s29, 32  ;;  %s2172_s6 = scalar_lea.vmem (%p1907_p4), %s2302_s2, %s1496_s30  }
  0x18   : > { %v244_v10 = vpack.c.bf16 %v221_v9, %v220_v8  ;;  %1624 = vmatpush3.bf16.msra.mxu0 %v1770_v3  ;;  %1673 = vmatpush3.bf16.msra.mxu1 %v1770_v3  ;;  %v208_v15 = vld [vmem:[%s1928_s5 + $0x20] sm:$0xff]  ;;  %v209_v17 = vld [vmem:[%s1928_s5 + $0x28] sm:$0xff]  ;;  %v222_v18 = vld [vmem:[%s1928_s5 + $0x90] sm:$0xff]  ;;  %v237_v22 = vpack.c.bf16 %v207_v14, %v206_v13  ;;  %v746_v3 = vadd.s32 %v1995_v59, %v712_v60  ;;  %v716_v13 = vadd.s32 40, %v1990_v57 }
  0x19   : > { %1631 = vmatprep.mubr.msk.bf16.mxu0 %vm304_vm0, %v236_v6  ;;  %1625 = vmatprep.subr.bf16.mxu0 %v1771_v7  ;;  %v223_v19 = vld [vmem:[%s1928_s5 + $0x98] sm:$0xff]  ;;  %v224_v20 = vld [vmem:[%s1928_s5 + $0xa0] sm:$0xff]  ;;  %v225_v21 = vld [vmem:[%s1928_s5 + $0xa8] sm:$0xff]  ;;  %v238_v23 = vpack.c.bf16 %v209_v17, %v208_v15 }
  0x1a   : > { %1667 = vmatprep.subr.bf16.mxu1 %v1771_v7  ;;  %1647 = vmatprep.mubr.msk.bf16.mxu1 %vm304_vm0, %v244_v10  ;;  %v245_v24 = vpack.c.bf16 %v223_v19, %v222_v18  ;;  %v246_v25 = vpack.c.bf16 %v225_v21, %v224_v20  ;;  %v210_v26 = vld [vmem:[%s1928_s5 + $0x30] sm:$0xff]  ;;  %v211_v27 = vld [vmem:[%s1928_s5 + $0x38] sm:$0xff]  ;;  %v212_v28 = vld [vmem:[%s1928_s5 + $0x40] sm:$0xff]  ;;  %vm778_vm4 = vcmp.lt.s32.totalorder %v746_v3, 600  ;;  %v749_v19 = vadd.s32 %v1995_v59, %v715_v4 }
  0x1b   : > { %v213_v29 = vld [vmem:[%s1928_s5 + $0x48] sm:$0xff]  ;;  %v226_v30 = vld [vmem:[%s1928_s5 + $0xb0] sm:$0xff]  ;;  %v227_v31 = vld [vmem:[%s1928_s5 + $0xb8] sm:$0xff]  ;;  %v239_v34 = vpack.c.bf16 %v211_v27, %v210_v26  ;;  %v750_v26 = vadd.s32 %v1995_v59, %v716_v13 }
  0x1c   : > { %1626 = vmatpush3.bf16.msra.mxu0 %v1771_v7  ;;  %1674 = vmatpush3.bf16.msra.mxu1 %v1771_v7  ;;  %v228_v32 = vld [vmem:[%s1928_s5 + $0xc0] sm:$0xff]  ;;  %v229_v33 = vld [vmem:[%s1928_s5 + $0xc8] sm:$0xff]  ;;  %v240_v35 = vpack.c.bf16 %v213_v29, %v212_v28  ;;  %v247_v36 = vpack.c.bf16 %v227_v31, %v226_v30  ;;  %v214_v38 = vld [vmem:[%s1928_s5 + $0x50] sm:$0xff]  ;;  %v748_v7 = vadd.s32 %v1995_v59, %v714_v61  ;;  %v722_v31 = vadd.s32 88, %v1990_v57 }
  0x1d   : > { %1627 = vmatprep.subr.bf16.mxu0 %v1772_v11  ;;  %1668 = vmatprep.subr.bf16.mxu1 %v1772_v11  ;;  %v248_v37 = vpack.c.bf16 %v229_v33, %v228_v32  ;;  %v215_v39 = vld [vmem:[%s1928_s5 + $0x58] sm:$0xff]  ;;  %v216_v40 = vld [vmem:[%s1928_s5 + $0x60] sm:$0xff]  ;;  %v217_v41 = vld [vmem:[%s1928_s5 + $0x68] sm:$0xff]  ;;  %vm781_vm7 = vcmp.lt.s32.totalorder %v749_v19, 600  ;;  %vm782_vm8 = vcmp.lt.s32.totalorder %v750_v26, 600 }
  0x1e   : > { %v230_v42 = vld [vmem:[%s1928_s5 + $0xd0] sm:$0xff]  ;;  %v231_v43 = vld [vmem:[%s1928_s5 + $0xd8] sm:$0xff]  ;;  %v232_v44 = vld [vmem:[%s1928_s5 + $0xe0] sm:$0xff]  ;;  %v241_v46 = vpack.c.bf16 %v215_v39, %v214_v38  ;;  %v242_v47 = vpack.c.bf16 %v217_v41, %v216_v40  ;;  %vm780_vm5 = vcmp.lt.s32.totalorder %v748_v7, 600  ;;  %v720_v41 = vadd.s32 72, %v1990_v57 }
  0x1f   : > { %v233_v45 = vld [vmem:[%s1928_s5 + $0xe8] sm:$0xff]  ;;  %v249_v48 = vpack.c.bf16 %v231_v43, %v230_v42  ;;  %v218_v50 = vld [vmem:[%s1928_s5 + $0x70] sm:$0xff]  ;;  %v219_v51 = vld [vmem:[%s1928_s5 + $0x78] sm:$0xff] }
  0x20   : > { %1628 = vmatpush3.bf16.msra.mxu0 %v1772_v11  ;;  %1675 = vmatpush3.bf16.msra.mxu1 %v1772_v11  ;;  %v250_v49 = vpack.c.bf16 %v233_v45, %v232_v44  ;;  %v234_v52 = vld [vmem:[%s1928_s5 + $0xf0] sm:$0xff]  ;;  %v235_v53 = vld [vmem:[%s1928_s5 + $0xf8] sm:$0xff]  ;;  %v243_v54 = vpack.c.bf16 %v219_v51, %v218_v50  ;;  %v718_v11 = vadd.s32 56, %v1990_v57  ;;  %v2041_v50 = vadd.s32 %v1995_v59, %v722_v31 }
  0x21   : > { %1677 = vmatprep.subr.msk.bf16.mxu0 %vm353_vm1, %v1773_v12  ;;  %1678 = vmatprep.subr.msk.bf16.mxu1 %vm353_vm1, %v1773_v12  ;;  %v251_v55 = vpack.c.bf16 %v235_v53, %v234_v52  ;;  %v2008_v12 = vadd.s32 %v1995_v59, %v717_v62  ;;  %v754_v62 = vadd.s32 %v1995_v59, %v720_v41 }
  0x22   : > { %vm788_vm11 = vcmp.lt.s32.totalorder %v2041_v50, 600  ;;  %v730_v50 = vadd.s32 152, %v1990_v57 }
  0x23   : > { %vm783_vm6 = vcmp.lt.s32.totalorder %v2008_v12, 600  ;;  %vm786_vm13 = vcmp.lt.s32.totalorder %v754_v62, 600 }
  0x24   : > { %1630 = vmatpush3.bf16.msra.mxu0 %v355_v16  ;;  %1676 = vmatpush3.bf16.msra.mxu1 %v355_v16 }
  0x27   : > { %1632 = vmatmul.mubr.msk.bf16.vlgmr.msra.gmra.mrb[0].mxu0 %vm304_vm0, %v237_v22  ;;  %1648 = vmatmul.mubr.msk.bf16.vlgmr.msra.gmra.mrb[0].mxu1 %vm304_vm0, %v245_v24  ;;  %v721_v24 = vadd.s32 80, %v1990_v57 }
  0x28   : > { %1635 = vmatprep.mubr.msk.bf16.mxu0 %vm304_vm0, %v238_v23  ;;  %1651 = vmatprep.mubr.msk.bf16.mxu1 %vm304_vm0, %v246_v25  ;;  %v2024_v25 = vadd.s32 %v1995_v59, %v718_v11 }
  0x29   : > { %v2037_v40 = vadd.s32 %v1995_v59, %v721_v24 }
  0x2a   : > { %vm784_vm9 = vcmp.lt.s32.totalorder %v2024_v25, 600 }
  0x2b   : > { %vm787_vm10 = vcmp.lt.s32.totalorder %v2037_v40, 600 }
  0x2f   : > { %1636 = vmatmul.mubr.msk.bf16.gmra.mrb[4].mxu0 %vm304_vm0, %v239_v34  ;;  %1652 = vmatmul.mubr.msk.bf16.gmra.mrb[4].mxu1 %vm304_vm0, %v247_v36  ;;  %v719_v36 = vadd.s32 64, %v1990_v57 }
  0x30   : > { %1639 = vmatprep.mubr.msk.bf16.mxu0 %vm304_vm0, %v240_v35  ;;  %1655 = vmatprep.mubr.msk.bf16.mxu1 %vm304_vm0, %v248_v37 }
  0x31   : > { %v753_v56 = vadd.s32 %v1995_v59, %v719_v36 }
  0x33   : > { %vm785_vm12 = vcmp.lt.s32.totalorder %v753_v56, 600  ;;  %v729_v56 = vadd.s32 144, %v1990_v57 }
  0x37   : > { %1640 = vmatmul.mubr.msk.bf16.gmra.mrb[8].mxu0 %vm304_vm0, %v241_v46  ;;  %1656 = vmatmul.mubr.msk.bf16.gmra.mrb[8].mxu1 %vm304_vm0, %v249_v48 }
  0x38   : > { %1643 = vmatprep.mubr.msk.bf16.mxu0 %vm304_vm0, %v242_v47  ;;  %1659 = vmatprep.mubr.msk.bf16.mxu1 %vm304_vm0, %v250_v49 }
  0x3f   : > { %1644 = vmatmul.mubr.msk.bf16.gmra.mrb[12].mxu0 %vm304_vm0, %v243_v54  ;;  %1660 = vmatmul.mubr.msk.bf16.gmra.mrb[12].mxu1 %vm304_vm0, %v251_v55 }
  0xfa   : > { %v1633_v63 = vpop.f32.mrb[0].mxu0  ;;  %v1649_v5 = vpop.f32.mrb[0].mxu1 }
  0xfb   : > { %v391_v2 = vpop.f32.mrb[1].mxu0  ;;  %v455_v8 = vpop.f32.mrb[1].mxu1 }
  0xfc   : > { %v1634_v6 = vpop.f32.mrb[2].mxu0  ;;  %v1650_v14 = vpop.f32.mrb[2].mxu1 }
  0xfd   : > { %v519_v9 = vpack.c.bf16 %v1634_v6, %v1633_v63  ;;  %v394_v10 = vpop.f32.mrb[3].mxu0  ;;  %v2011_v16 = vpack.c.bf16 %v1650_v14, %v1649_v5  ;;  %v458_v17 = vpop.f32.mrb[3].mxu1  ;;  %v725_v5 = vadd.s32 112, %v1990_v57  ;;  %v723_v14 = vadd.s32 96, %v1990_v57 }
  0xfe   : > { %v518_v15 = vpack.c.bf16 %v394_v10, %v391_v2  ;;  %v2017_v20 = vpack.c.bf16 %v458_v17, %v455_v8 }
  0xff   : > { %1579 = vst [vmem:[%s2013_s12 + $0x8] sm:$0xff] %v519_v9   ;;  %v680_v18 = vunpack.c.l.bf16 %v519_v9  ;;  %v681_v21 = vunpack.c.h.bf16 %v519_v9  ;;  %1587 = vst [vmem:[%s2013_s12 + $0x48] sm:$0xff] %v2011_v16   ;;  %v726_v9 = vadd.s32 120, %v1990_v57  ;;  %v757_v36 = vadd.s32 %v1995_v59, %v723_v14 }
 0x100   : > { %1503 = vst [vmem:[%s2013_s12] sm:$0xff] %v518_v15   ;;  %v678_v22 = vunpack.c.l.bf16 %v518_v15  ;;  %v679_v23 = vunpack.c.h.bf16 %v518_v15  ;;  %1586 = vst [vmem:[%s2013_s12 + $0x40] sm:$0xff] %v2017_v20   ;;  %v724_v15 = vadd.s32 104, %v1990_v57 }
 0x101   : > { %v875_v27 = vsel %vm779_vm2, %v680_v18, 0.0  ;;  %v876_v38 = vsel %vm780_vm5, %v681_v21, 0.0  ;;  %vm789_vm0 = vcmp.lt.s32.totalorder %v757_v36, 600 }
 0x102   : > { %v873_v28 = vsel %vm777_vm3, %v678_v22, 0.0  ;;  %v874_v29 = vsel %vm778_vm4, %v679_v23, 0.0  ;;  %v1637_v30 = vpop.f32.mrb[4].mxu0  ;;  %v1653_v37 = vpop.f32.mrb[4].mxu1  ;;  %v944_v43 = vmul.f32 %v875_v27, %v875_v27  ;;  %v945_v53 = vmul.f32 %v876_v38, %v876_v38 }
 0x103   : > { %v905_v32 = vadd.f32 %v874_v29, %v873_v28  ;;  %v942_v33 = vmul.f32 %v873_v28, %v873_v28  ;;  %v943_v34 = vmul.f32 %v874_v29, %v874_v29  ;;  %v407_v35 = vpop.f32.mrb[5].mxu0  ;;  %v471_v42 = vpop.f32.mrb[5].mxu1  ;;  %v758_v41 = vadd.s32 %v1995_v59, %v724_v15 }
 0x104   : > { %v1638_v39 = vpop.f32.mrb[6].mxu0  ;;  %v1654_v48 = vpop.f32.mrb[6].mxu1 }
 0x105   : > { %v906_v44 = vadd.f32 %v905_v32, %v875_v27  ;;  %v974_v45 = vadd.f32 %v943_v34, %v942_v33  ;;  %v521_v46 = vpack.c.bf16 %v1638_v39, %v1637_v30  ;;  %v410_v47 = vpop.f32.mrb[7].mxu0  ;;  %v2043_v51 = vpack.c.bf16 %v1654_v48, %v1653_v37  ;;  %v474_v52 = vpop.f32.mrb[7].mxu1 }
 0x106   : > { %v520_v49 = vpack.c.bf16 %v410_v47, %v407_v35  ;;  %v2053_v0 = vpack.c.bf16 %v474_v52, %v471_v42  ;;  %v2069_v27 = vadd.s32 %v1995_v59, %v725_v5  ;;  %v2075_v33 = vadd.s32 %v1995_v59, %v726_v9 }
 0x107   : > { %v975_v54 = vadd.f32 %v974_v45, %v944_v43  ;;  %1581 = vst [vmem:[%s2013_s12 + $0x18] sm:$0xff] %v521_v46   ;;  %v907_v55 = vadd.f32 %v906_v44, %v876_v38  ;;  %v684_v58 = vunpack.c.l.bf16 %v521_v46  ;;  %1589 = vst [vmem:[%s2013_s12 + $0x58] sm:$0xff] %v2043_v51   ;;  %v685_v1 = vunpack.c.h.bf16 %v521_v46 }
 0x108   : > { %1580 = vst [vmem:[%s2013_s12 + $0x10] sm:$0xff] %v520_v49   ;;  %v682_v60 = vunpack.c.l.bf16 %v520_v49  ;;  %v683_v61 = vunpack.c.h.bf16 %v520_v49  ;;  %1588 = vst [vmem:[%s2013_s12 + $0x50] sm:$0xff] %v2053_v0   ;;  %vm791_vm14 = vcmp.lt.s32.totalorder %v2069_v27, 600  ;;  %vm792_vm15 = vcmp.lt.s32.totalorder %v2075_v33, 600 }
 0x109   : > { %v976_v63 = vadd.f32 %v975_v54, %v945_v53  ;;  %v879_v11 = vsel %vm783_vm6, %v684_v58, 0.0  ;;  %v880_v12 = vsel %vm784_vm9, %v685_v1, 0.0  ;;  %v727_v52 = vadd.s32 128, %v1990_v57 }
 0x10a   : > { %v877_v2 = vsel %vm781_vm7, %v682_v60, 0.0  ;;  %v878_v3 = vsel %vm782_vm8, %v683_v61, 0.0  ;;  %v1641_v4 = vpop.f32.mrb[8].mxu0  ;;  %v1657_v10 = vpop.f32.mrb[8].mxu1  ;;  %v948_v30 = vmul.f32 %v879_v11, %v879_v11  ;;  %v949_v37 = vmul.f32 %v880_v12, %v880_v12 }
 0x10b   : > { %v908_v6 = vadd.f32 %v907_v55, %v877_v2  ;;  %v946_v7 = vmul.f32 %v877_v2, %v877_v2  ;;  %v423_v8 = vpop.f32.mrb[9].mxu0  ;;  %v487_v17 = vpop.f32.mrb[9].mxu1  ;;  %v947_v19 = vmul.f32 %v878_v3, %v878_v3  ;;  %vm790_vm1 = vcmp.lt.s32.totalorder %v758_v41, 600 }
 0x10c   : > { %v1642_v13 = vpop.f32.mrb[10].mxu0  ;;  %v1658_v24 = vpop.f32.mrb[10].mxu1  ;;  %v728_v5 = vadd.s32 136, %v1990_v57  ;;  %v695_v41 = vunpack.c.h.bf16 %v2017_v20 }
 0x10d   : > { %v909_v18 = vadd.f32 %v908_v6, %v878_v3  ;;  %v977_v21 = vadd.f32 %v976_v63, %v946_v7  ;;  %v523_v22 = vpack.c.bf16 %v1642_v13, %v1641_v4  ;;  %v426_v23 = vpop.f32.mrb[11].mxu0  ;;  %v2071_v28 = vpack.c.bf16 %v1658_v24, %v1657_v10  ;;  %v490_v29 = vpop.f32.mrb[11].mxu1 }
 0x10e   : > { %v522_v26 = vpack.c.bf16 %v426_v23, %v423_v8  ;;  %v2090_v58 = vpack.c.bf16 %v490_v29, %v487_v17  ;;  %v761_v10 = vadd.s32 %v1995_v59, %v727_v52  ;;  %v762_v24 = vadd.s32 %v1995_v59, %v728_v5 }
 0x10f   : > { %v910_v31 = vadd.f32 %v909_v18, %v879_v11  ;;  %v978_v32 = vadd.f32 %v977_v21, %v947_v19  ;;  %1583 = vst [vmem:[%s2013_s12 + $0x28] sm:$0xff] %v523_v22   ;;  %v688_v34 = vunpack.c.l.bf16 %v523_v22  ;;  %1591 = vst [vmem:[%s2013_s12 + $0x68] sm:$0xff] %v2071_v28   ;;  %v689_v42 = vunpack.c.h.bf16 %v523_v22 }
 0x110   : > { %1582 = vst [vmem:[%s2013_s12 + $0x20] sm:$0xff] %v522_v26   ;;  %v686_v35 = vunpack.c.l.bf16 %v522_v26  ;;  %v687_v25 = vunpack.c.h.bf16 %v522_v26  ;;  %1590 = vst [vmem:[%s2013_s12 + $0x60] sm:$0xff] %v2090_v58   ;;  %v763_v19 = vadd.s32 %v1995_v59, %v729_v56  ;;  %vm793_vm2 = vcmp.lt.s32.totalorder %v761_v10, 600 }
 0x111   : > { %v979_v38 = vadd.f32 %v978_v32, %v948_v30  ;;  %v911_v39 = vadd.f32 %v910_v31, %v880_v12  ;;  %v883_v54 = vsel %vm787_vm10, %v688_v34, 0.0  ;;  %v884_v40 = vsel %vm788_vm11, %v689_v42, 0.0 }
 0x112   : > { %v881_v43 = vsel %vm785_vm12, %v686_v35, 0.0  ;;  %v882_v44 = vsel %vm786_vm13, %v687_v25, 0.0  ;;  %v1645_v45 = vpop.f32.mrb[12].mxu0  ;;  %v1661_v53 = vpop.f32.mrb[12].mxu1  ;;  %v952_v7 = vmul.f32 %v883_v54, %v883_v54  ;;  %v953_v15 = vmul.f32 %v884_v40, %v884_v40 }
 0x113   : > { %v912_v46 = vadd.f32 %v911_v39, %v881_v43  ;;  %v950_v47 = vmul.f32 %v881_v43, %v881_v43  ;;  %v980_v48 = vadd.f32 %v979_v38, %v949_v37  ;;  %v439_v49 = vpop.f32.mrb[13].mxu0  ;;  %v503_v60 = vpop.f32.mrb[13].mxu1  ;;  %v951_v62 = vmul.f32 %v882_v44, %v882_v44 }
 0x114   : > { %v1646_v55 = vpop.f32.mrb[14].mxu0  ;;  %v1662_v3 = vpop.f32.mrb[14].mxu1  ;;  %v694_v31 = vunpack.c.l.bf16 %v2017_v20  ;;  %v731_v37 = vadd.s32 160, %v1990_v57  ;;  %v764_v39 = vadd.s32 %v1995_v59, %v730_v50  ;;  %vm794_vm3 = vcmp.lt.s32.totalorder %v762_v24, 600 }
 0x115   : > { %v913_v61 = vadd.f32 %v912_v46, %v882_v44  ;;  %v981_v63 = vadd.f32 %v980_v48, %v950_v47  ;;  %v525_v1 = vpack.c.bf16 %v1646_v55, %v1645_v45  ;;  %v442_v2 = vpop.f32.mrb[15].mxu0  ;;  %v506_v6 = vpop.f32.mrb[15].mxu1  ;;  %v2108_v32 = vpack.c.bf16 %v1662_v3, %v1661_v53 }
 0x116   : > { %v524_v4 = vpack.c.bf16 %v442_v2, %v439_v49  ;;  %v2110_v34 = vpack.c.bf16 %v506_v6, %v503_v60  ;;  %v732_v44 = vadd.s32 168, %v1990_v57  ;;  %v696_v45 = vunpack.c.l.bf16 %v2011_v16 }
 0x117   : > { %v914_v8 = vadd.f32 %v913_v61, %v883_v54  ;;  %v982_v9 = vadd.f32 %v981_v63, %v951_v62  ;;  %1585 = vst [vmem:[%s2013_s12 + $0x38] sm:$0xff] %v525_v1   ;;  %v692_v11 = vunpack.c.l.bf16 %v525_v1  ;;  %v693_v21 = vunpack.c.h.bf16 %v525_v1  ;;  %1593 = vst [vmem:[%s2013_s12 + $0x78] sm:$0xff] %v2108_v32  }
 0x118   : > { %1584 = vst [vmem:[%s2013_s12 + $0x30] sm:$0xff] %v524_v4   ;;  %v690_v13 = vunpack.c.l.bf16 %v524_v4  ;;  %v691_v14 = vunpack.c.h.bf16 %v524_v4  ;;  %1592 = vst [vmem:[%s2013_s12 + $0x70] sm:$0xff] %v2110_v34   ;;  %vm795_vm4 = vcmp.lt.s32.totalorder %v763_v19, 600  ;;  %v889_v33 = vsel %vm793_vm2, %v694_v31, 0.0 }
 0x119   : > { %v983_v17 = vadd.f32 %v982_v9, %v952_v7  ;;  %v915_v18 = vadd.f32 %v914_v8, %v884_v40  ;;  %v887_v30 = vsel %vm791_vm14, %v692_v11, 0.0  ;;  %v888_v38 = vsel %vm792_vm15, %v693_v21, 0.0 }
 0x11a   : > { %v885_v22 = vsel %vm789_vm0, %v690_v13, 0.0  ;;  %v886_v23 = vsel %vm790_vm1, %v691_v14, 0.0  ;;  %v956_v27 = vmul.f32 %v887_v30, %v887_v30  ;;  %v733_v46 = vadd.s32 176, %v1990_v57 }
 0x11b   : > { %v916_v12 = vadd.f32 %v915_v18, %v885_v22  ;;  %v954_v26 = vmul.f32 %v885_v22, %v885_v22  ;;  %v984_v29 = vadd.f32 %v983_v17, %v953_v15  ;;  %v955_v25 = vmul.f32 %v886_v23, %v886_v23 }
 0x11c   : > { %v957_v47 = vmul.f32 %v888_v38, %v888_v38  ;;  %v765_v49 = vadd.s32 %v1995_v59, %v731_v37  ;;  %v697_v52 = vunpack.c.h.bf16 %v2011_v16  ;;  %vm796_vm5 = vcmp.lt.s32.totalorder %v764_v39, 600 }
 0x11d   : > { %v917_v35 = vadd.f32 %v916_v12, %v886_v23  ;;  %v985_v36 = vadd.f32 %v984_v29, %v954_v26  ;;  %v890_v53 = vsel %vm794_vm3, %v695_v41, 0.0  ;;  %v734_v54 = vadd.s32 184, %v1990_v57 }
 0x11e   : > { %v958_v56 = vmul.f32 %v889_v33, %v889_v33  ;;  %v766_v61 = vadd.s32 %v1995_v59, %v732_v44  ;;  %v891_v62 = vsel %vm795_vm4, %v696_v45, 0.0  ;;  %v767_v63 = vadd.s32 %v1995_v59, %v733_v46 }
 0x11f   : > { %v918_v42 = vadd.f32 %v917_v35, %v887_v30  ;;  %v986_v43 = vadd.f32 %v985_v36, %v955_v25  ;;  %v698_v1 = vunpack.c.l.bf16 %v2053_v0  ;;  %v735_v2 = vadd.s32 192, %v1990_v57 }
 0x120   : > { %v959_v40 = vmul.f32 %v890_v53, %v890_v53  ;;  %vm797_vm6 = vcmp.lt.s32.totalorder %v765_v49, 600  ;;  %v892_v4 = vsel %vm796_vm5, %v697_v52, 0.0  ;;  %v768_v5 = vadd.s32 %v1995_v59, %v734_v54 }
 0x121   : > { %v987_v48 = vadd.f32 %v986_v43, %v956_v27  ;;  %v919_v20 = vadd.f32 %v918_v42, %v888_v38  ;;  %v699_v6 = vunpack.c.h.bf16 %v2053_v0  ;;  %v736_v7 = vadd.s32 200, %v1990_v57 }
 0x122   : > { %v960_v8 = vmul.f32 %v891_v62, %v891_v62  ;;  %vm798_vm7 = vcmp.lt.s32.totalorder %v766_v61, 600  ;;  %v700_v11 = vunpack.c.l.bf16 %v2043_v51  ;;  %v893_v13 = vsel %vm797_vm6, %v698_v1, 0.0 }
 0x123   : > { %v920_v55 = vadd.f32 %v919_v20, %v889_v33  ;;  %v988_v60 = vadd.f32 %v987_v48, %v957_v47  ;;  %v737_v14 = vadd.s32 208, %v1990_v57  ;;  %v769_v50 = vadd.s32 %v1995_v59, %v735_v2 }
 0x124   : > { %v961_v15 = vmul.f32 %v892_v4, %v892_v4  ;;  %vm799_vm8 = vcmp.lt.s32.totalorder %v767_v63, 600  ;;  %v701_v19 = vunpack.c.h.bf16 %v2043_v51  ;;  %v894_v0 = vsel %vm798_vm7, %v699_v6, 0.0 }
 0x125   : > { %v921_v3 = vadd.f32 %v920_v55, %v890_v53  ;;  %v989_v16 = vadd.f32 %v988_v60, %v958_v56  ;;  %v738_v21 = vadd.s32 216, %v1990_v57  ;;  %v770_v22 = vadd.s32 %v1995_v59, %v736_v7 }
 0x126   : > { %vm800_vm9 = vcmp.lt.s32.totalorder %v768_v5, 600  ;;  %v962_v24 = vmul.f32 %v893_v13, %v893_v13  ;;  %v895_v26 = vsel %vm799_vm8, %v700_v11, 0.0  ;;  %v771_v29 = vadd.s32 %v1995_v59, %v737_v14 }
 0x127   : > { %v922_v9 = vadd.f32 %v921_v3, %v891_v62  ;;  %v990_v10 = vadd.f32 %v989_v16, %v959_v40  ;;  %v702_v30 = vunpack.c.l.bf16 %v2090_v58  ;;  %vm801_vm10 = vcmp.lt.s32.totalorder %v769_v50, 600 }
 0x128   : > { %v963_v35 = vmul.f32 %v894_v0, %v894_v0  ;;  %v739_v51 = vadd.s32 224, %v1990_v57  ;;  %v896_v36 = vsel %vm800_vm9, %v701_v19, 0.0  ;;  %v772_v37 = vadd.s32 %v1995_v59, %v738_v21 }
 0x129   : > { %v991_v17 = vadd.f32 %v990_v10, %v960_v8  ;;  %v923_v18 = vadd.f32 %v922_v9, %v892_v4  ;;  %v703_v38 = vunpack.c.h.bf16 %v2090_v58  ;;  %vm802_vm11 = vcmp.lt.s32.totalorder %v770_v22, 600 }
 0x12a   : > { %v964_v39 = vmul.f32 %v895_v26, %v895_v26  ;;  %v740_v42 = vadd.s32 232, %v1990_v57  ;;  %v704_v43 = vunpack.c.l.bf16 %v2071_v28  ;;  %vm803_vm12 = vcmp.lt.s32.totalorder %v771_v29, 600 }
 0x12b   : > { %v924_v23 = vadd.f32 %v923_v18, %v893_v13  ;;  %v992_v12 = vadd.f32 %v991_v17, %v961_v15  ;;  %v897_v44 = vsel %vm801_vm10, %v702_v30, 0.0  ;;  %v741_v45 = vadd.s32 240, %v1990_v57 }
 0x12c   : > { %v965_v33 = vmul.f32 %v896_v36, %v896_v36  ;;  %v773_v48 = vadd.s32 %v1995_v59, %v739_v51  ;;  %v705_v20 = vunpack.c.h.bf16 %v2071_v28  ;;  %vm804_vm13 = vcmp.lt.s32.totalorder %v772_v37, 600 }
 0x12d   : > { %v925_v31 = vadd.f32 %v924_v23, %v894_v0  ;;  %v993_v25 = vadd.f32 %v992_v12, %v962_v24  ;;  %v898_v58 = vsel %vm802_vm11, %v703_v38, 0.0  ;;  %v742_v49 = vadd.s32 248, %v1990_v57 }
 0x12e   : > { %v966_v53 = vmul.f32 %v897_v44, %v897_v44  ;;  %v774_v55 = vadd.s32 %v1995_v59, %v740_v42  ;;  %v899_v56 = vsel %vm803_vm12, %v704_v43, 0.0  ;;  %v775_v60 = vadd.s32 %v1995_v59, %v741_v45 }
 0x12f   : > { %v926_v41 = vadd.f32 %v925_v31, %v895_v26  ;;  %v994_v27 = vadd.f32 %v993_v25, %v963_v35  ;;  %v706_v61 = vunpack.c.l.bf16 %v2110_v34  ;;  %v967_v63 = vmul.f32 %v898_v58, %v898_v58 }
 0x130   : > { %vm805_vm14 = vcmp.lt.s32.totalorder %v773_v48, 600  ;;  %v900_v2 = vsel %vm804_vm13, %v705_v20, 0.0  ;;  %v776_v28 = vadd.s32 %v1995_v59, %v742_v49  ;;  %v707_v3 = vunpack.c.h.bf16 %v2110_v34 }
 0x131   : > { %v995_v46 = vadd.f32 %v994_v27, %v964_v39  ;;  %v927_v47 = vadd.f32 %v926_v41, %v896_v36  ;;  %v968_v57 = vmul.f32 %v899_v56, %v899_v56  ;;  %vm806_vm15 = vcmp.lt.s32.totalorder %v774_v55, 600 }
 0x132   : > { %v708_v4 = vunpack.c.l.bf16 %v2108_v32  ;;  %v901_v5 = vsel %vm805_vm14, %v706_v61, 0.0  ;;  %v969_v6 = vmul.f32 %v900_v2, %v900_v2  ;;  %vm807_vm0 = vcmp.lt.s32.totalorder %v775_v60, 600 }
 0x133   : > { %v928_v52 = vadd.f32 %v927_v47, %v897_v44  ;;  %v996_v54 = vadd.f32 %v995_v46, %v965_v33  ;;  %v709_v9 = vunpack.c.h.bf16 %v2108_v32  ;;  %v902_v10 = vsel %vm806_vm15, %v707_v3, 0.0 }
 0x134   : > { %vm808_vm1 = vcmp.lt.s32.totalorder %v776_v28, 600  ;;  %v970_v59 = vmul.f32 %v901_v5, %v901_v5  ;;  %v903_v34 = vsel %vm807_vm0, %v708_v4, 0.0  ;;  %v971_v50 = vmul.f32 %v902_v10, %v902_v10 }
 0x135   : > { %v929_v62 = vadd.f32 %v928_v52, %v898_v58  ;;  %v997_v1 = vadd.f32 %v996_v54, %v966_v53  ;;  %v904_v17 = vsel %vm808_vm1, %v709_v9, 0.0  ;;  %v972_v18 = vmul.f32 %v903_v34, %v903_v34 }
 0x136   : > { %v973_v21 = vmul.f32 %v904_v17, %v904_v17  ;;  %vm1011_vm2 = vcmask 1040384  }
 0x137   : > { %v930_v40 = vadd.f32 %v929_v62, %v899_v56  ;;  %v998_v16 = vadd.f32 %v997_v1, %v967_v63 }
 0x139   : > { %v999_v7 = vadd.f32 %v998_v16, %v968_v57  ;;  %v931_v8 = vadd.f32 %v930_v40, %v900_v2 }
 0x13b   : > { %v932_v11 = vadd.f32 %v931_v8, %v901_v5  ;;  %v1000_v13 = vadd.f32 %v999_v7, %v969_v6 }
 0x13d   : > { %v933_v14 = vadd.f32 %v932_v11, %v902_v10  ;;  %v1001_v15 = vadd.f32 %v1000_v13, %v970_v59 }
 0x13f   : > { %v934_v19 = vadd.f32 %v933_v14, %v903_v34  ;;  %v1002_v0 = vadd.f32 %v1001_v15, %v971_v50 }
 0x141   : > { %v935_v22 = vadd.f32 %v934_v19, %v904_v17  ;;  %v1003_v23 = vadd.f32 %v1002_v0, %v972_v18 }
 0x143   : > { %v936_v24 = vrot.slane %v935_v22, 4  ;;  %v1004_v32 = vadd.f32 %v1003_v23, %v973_v21 }
 0x145   : > { %v937_v12 = vadd.f32 %v936_v24, %v935_v22  ;;  %v1005_v26 = vrot.slane %v1004_v32, 4 }
 0x147   : > { %v938_v29 = vrot.slane %v937_v12, 2  ;;  %v1006_v30 = vadd.f32 %v1005_v26, %v1004_v32 }
 0x149   : > { %v939_v31 = vadd.f32 %v938_v29, %v937_v12  ;;  %v1007_v35 = vrot.slane %v1006_v30, 2 }
 0x14b   : > { %v940_v25 = vrot.slane %v939_v31, 1  ;;  %v1008_v51 = vadd.f32 %v1007_v35, %v1006_v30 }
 0x14c   : > { %1024 = sbr.rel (!%p1907_p4) target bundleno = 409 (0x199), region = 32 }
 0x14d   : > { %v1009_v36 = vrot.slane %v1008_v51, 1  ;;  %v941_v37 = vadd.f32 %v940_v25, %v939_v31 }
 0x14f   : > { %v1010_v38 = vadd.f32 %v1009_v36, %v1008_v51 }
 0x151   : > { %v1012_v39 = vsel %vm1011_vm2, %v941_v37, %v1010_v38 }
 0x152   : > { %1013 = vst [vmem:[%s202_s28] sm:$0x3] %v1012_v39 }
 0x153   : > { %s2312_s29 = smov (!%p1027_p9, %s1026_s29), 32 }
 0x154   : > { %s1449_s7 = sshll.u32 %s2312_s29, 6 }
 0x155   : > { %p1452_p10 = scmp.eq.s32.totalorder %s1449_s7, 0 }
 0x156   : > { %s2178_s8 = sshrl.u32 (!%p1452_p10), %s2312_s29, 5 }
 0x157   : > { %1035 = sbr.rel (%p1452_p10) target bundleno = 409 (0x199), region = 36  ;;  %p1453_p11 = scmp.le.s32.totalorder (!%p1452_p10), %s2178_s8, 0 }
 0x15e   : > { %1330 = sbr.rel (%p1453_p11) target bundleno = 388 (0x184), region = 120  ;;  %s2305_s15 = smov (!%p1453_p11), %s2172_s6 }
 0x15f   : > { %s2306_s20 = smov (!%p1453_p11), %s2013_s12  ;;  %s2187_s25 = smov (!%p1453_p11), 0  }
 0x160   : > { %s2189_s9 = smov (!%p1453_p11), 0  }
 0x165 LB: >> { %v1051_v41 = vld [vmem:[%s1836_s20] sm:$0xf]  ;;  %v1053_v27 = vld [vmem:[%s1836_s20 + $0x4] sm:$0xf]  ;;  %v1055_v42 = vld [vmem:[%s1836_s20 + $0x8] sm:$0xf]  ;;  %s1844_s9 = sphi %s2189_s9, %s1045_s9   ;;  %s1840_s25 = sphi %s2187_s25, %s2307_s25   ;;  %s1836_s20 = sphi %s2306_s20, %s1120_s20   ;;  %s1832_s15 = sphi %s2305_s15, %s1121_s15  }
 0x166   : >> { %1052 = vst [vmem:[%s1832_s15] sm:$0xf] %v1051_v41  ;;  %1054 = vst [vmem:[%s1832_s15 + $0x4] sm:$0xf] %v1053_v27  ;;  %v1057_v43 = vld [vmem:[%s1836_s20 + $0xc] sm:$0xf]  ;;  %s1115_s10 = sadd.s32 1, %s1840_s25 }
 0x167   : >> { %1056 = vst [vmem:[%s1832_s15 + $0x8] sm:$0xf] %v1055_v42  ;;  %v1059_v44 = vld [vmem:[%s1836_s20 + $0x10] sm:$0xf]  ;;  %v1061_v45 = vld [vmem:[%s1836_s20 + $0x14] sm:$0xf]  ;;  %p1116_p12 = scmp.ge.s32.totalorder %s1115_s10, %s2178_s8 }
 0x168   : >> { %1058 = vst [vmem:[%s1832_s15 + $0xc] sm:$0xf] %v1057_v43  ;;  %1060 = vst [vmem:[%s1832_s15 + $0x10] sm:$0xf] %v1059_v44  ;;  %v1063_v33 = vld [vmem:[%s1836_s20 + $0x18] sm:$0xf] }
 0x169   : >> { %1062 = vst [vmem:[%s1832_s15 + $0x14] sm:$0xf] %v1061_v45  ;;  %v1065_v46 = vld [vmem:[%s1836_s20 + $0x1c] sm:$0xf]  ;;  %v1067_v47 = vld [vmem:[%s1836_s20 + $0x20] sm:$0xf] }
 0x16a   : >> { %1064 = vst [vmem:[%s1832_s15 + $0x18] sm:$0xf] %v1063_v33  ;;  %1066 = vst [vmem:[%s1832_s15 + $0x1c] sm:$0xf] %v1065_v46  ;;  %v1069_v48 = vld [vmem:[%s1836_s20 + $0x24] sm:$0xf] }
 0x16b   : >> { %1068 = vst [vmem:[%s1832_s15 + $0x20] sm:$0xf] %v1067_v47  ;;  %v1071_v20 = vld [vmem:[%s1836_s20 + $0x28] sm:$0xf]  ;;  %v1073_v58 = vld [vmem:[%s1836_s20 + $0x2c] sm:$0xf] }
 0x16c   : >> { %1070 = vst [vmem:[%s1832_s15 + $0x24] sm:$0xf] %v1069_v48  ;;  %1072 = vst [vmem:[%s1832_s15 + $0x28] sm:$0xf] %v1071_v20  ;;  %v1075_v49 = vld [vmem:[%s1836_s20 + $0x30] sm:$0xf] }
 0x16d   : >> { %1074 = vst [vmem:[%s1832_s15 + $0x2c] sm:$0xf] %v1073_v58  ;;  %v1077_v52 = vld [vmem:[%s1836_s20 + $0x34] sm:$0xf]  ;;  %v1079_v53 = vld [vmem:[%s1836_s20 + $0x38] sm:$0xf] }
 0x16e   : >> { %1076 = vst [vmem:[%s1832_s15 + $0x30] sm:$0xf] %v1075_v49  ;;  %1078 = vst [vmem:[%s1832_s15 + $0x34] sm:$0xf] %v1077_v52  ;;  %v1081_v54 = vld [vmem:[%s1836_s20 + $0x3c] sm:$0xf] }
 0x16f   : >> { %1080 = vst [vmem:[%s1832_s15 + $0x38] sm:$0xf] %v1079_v53  ;;  %v1083_v55 = vld [vmem:[%s1836_s20 + $0x40] sm:$0xf]  ;;  %v1085_v56 = vld [vmem:[%s1836_s20 + $0x44] sm:$0xf] }
 0x170   : >> { %1082 = vst [vmem:[%s1832_s15 + $0x3c] sm:$0xf] %v1081_v54  ;;  %1084 = vst [vmem:[%s1832_s15 + $0x40] sm:$0xf] %v1083_v55  ;;  %v1087_v60 = vld [vmem:[%s1836_s20 + $0x48] sm:$0xf] }
 0x171   : >> { %1086 = vst [vmem:[%s1832_s15 + $0x44] sm:$0xf] %v1085_v56  ;;  %v1089_v61 = vld [vmem:[%s1836_s20 + $0x4c] sm:$0xf]  ;;  %v1091_v62 = vld [vmem:[%s1836_s20 + $0x50] sm:$0xf] }
 0x172   : >> { %1088 = vst [vmem:[%s1832_s15 + $0x48] sm:$0xf] %v1087_v60  ;;  %1090 = vst [vmem:[%s1832_s15 + $0x4c] sm:$0xf] %v1089_v61  ;;  %v1093_v63 = vld [vmem:[%s1836_s20 + $0x54] sm:$0xf] }
 0x173   : >> { %1092 = vst [vmem:[%s1832_s15 + $0x50] sm:$0xf] %v1091_v62  ;;  %v1095_v1 = vld [vmem:[%s1836_s20 + $0x58] sm:$0xf]  ;;  %v1097_v2 = vld [vmem:[%s1836_s20 + $0x5c] sm:$0xf] }
 0x174   : >> { %1094 = vst [vmem:[%s1832_s15 + $0x54] sm:$0xf] %v1093_v63  ;;  %1096 = vst [vmem:[%s1832_s15 + $0x58] sm:$0xf] %v1095_v1  ;;  %v1099_v28 = vld [vmem:[%s1836_s20 + $0x60] sm:$0xf] }
 0x175   : >> { %1098 = vst [vmem:[%s1832_s15 + $0x5c] sm:$0xf] %v1097_v2  ;;  %v1101_v3 = vld [vmem:[%s1836_s20 + $0x64] sm:$0xf]  ;;  %v1103_v57 = vld [vmem:[%s1836_s20 + $0x68] sm:$0xf] }
 0x176   : >> { %1100 = vst [vmem:[%s1832_s15 + $0x60] sm:$0xf] %v1099_v28  ;;  %1102 = vst [vmem:[%s1832_s15 + $0x64] sm:$0xf] %v1101_v3  ;;  %v1105_v40 = vld [vmem:[%s1836_s20 + $0x6c] sm:$0xf] }
 0x177   : >> { %1104 = vst [vmem:[%s1832_s15 + $0x68] sm:$0xf] %v1103_v57  ;;  %v1107_v16 = vld [vmem:[%s1836_s20 + $0x70] sm:$0xf]  ;;  %v1109_v4 = vld [vmem:[%s1836_s20 + $0x74] sm:$0xf] }
 0x178   : >> { %1106 = vst [vmem:[%s1832_s15 + $0x6c] sm:$0xf] %v1105_v40  ;;  %1108 = vst [vmem:[%s1832_s15 + $0x70] sm:$0xf] %v1107_v16  ;;  %v1111_v5 = vld [vmem:[%s1836_s20 + $0x78] sm:$0xf] }
 0x179   : >> { %1110 = vst [vmem:[%s1832_s15 + $0x74] sm:$0xf] %v1109_v4  ;;  %v1113_v6 = vld [vmem:[%s1836_s20 + $0x7c] sm:$0xf]  ;;  %1112 = vst [vmem:[%s1832_s15 + $0x78] sm:$0xf] %v1111_v5 }
 0x17a   : >> { %1114 = vst [vmem:[%s1832_s15 + $0x7c] sm:$0xf] %v1113_v6  ;;  %s2314_s10 = smov (%p1116_p12, %s1115_s10), 0  ;;  %s1045_s9 = sadd.s32 1, %s1844_s9  }
 0x17b   : >> { %s1454_s11 = sshll.u32 %s2314_s10, 7  ;;  %p1044_p13 = scmp.ge.s32.totalorder %s1045_s9, %s2178_s8 }
 0x17c   : >> { %s1120_s20 = scalar_lea.vmem %s2013_s12, %s1454_s11 [#allocation2]   ;;  %s1121_s15 = scalar_lea.vmem %s2172_s6, %s1454_s11  }
 0x17d   : >> { %s2307_s25 = smov %s2314_s10  ;;  %1047 = sbr.rel (!%p1044_p13) target bundleno = 357 (0x165), region = 126 }
 0x184 PF: > { %s2282_s14 = sand.u32 31, %s2312_s29   ;;  %s1497_s17 = sshll.u32 %s2178_s8, 7 }
 0x185   : > { %s1126_s18 = scalar_lea.vmem %s2013_s12, %s1497_s17 [#allocation2]   ;;  %s1128_s21 = scalar_lea.vmem %s2172_s6, %s1497_s17  }
 0x186   : > { %p1459_p0 = scmp.le.s32.totalorder %s2282_s14, 0 }
 0x187   : > { %s1846_s22 = smov (!%p1459_p0), %s1128_s21   ;;  %s1850_s23 = smov (!%p1459_p0), %s1126_s18  }
 0x188   : > { %1344 = sbr.rel (%p1459_p0) target bundleno = 409 (0x199), region = 131  ;;  %s1854_s24 = smov (!%p1459_p0), 0  }
 0x189   : > { %s1858_s26 = smov (!%p1459_p0), 0  }
 0x18f LB: >> { %v1138_v7 = vld [vmem:[%s1852_s23] sm:$0xf]  ;;  %s1140_s27 = sadd.s32 1, %s1856_s24  ;;  %s1132_s26 = sadd.s32 1, %s1860_s26   ;;  %s1860_s26 = sphi %s1858_s26, %s1132_s26   ;;  %s1856_s24 = sphi %s1854_s24, %s1855_s24   ;;  %s1852_s23 = sphi %s1850_s23, %s1145_s23   ;;  %s1848_s22 = sphi %s1846_s22, %s1146_s22  }
 0x190   : >> { %1139 = vst [vmem:[%s1848_s22] sm:$0xf] %v1138_v7  ;;  %p1141_p1 = scmp.ge.s32.totalorder %s1140_s27, %s2282_s14  ;;  %p1131_p2 = scmp.ge.s32.totalorder %s1132_s26, %s2282_s14 }
 0x192   : >> { %s2316_s27 = smov (%p1141_p1, %s1140_s27), 0  ;;  %1134 = sbr.rel (!%p1131_p2) target bundleno = 399 (0x18f), region = 137 }
 0x193   : >> { %s1460_s12 = sshll.u32 %s2316_s27, 2  ;;  %s1855_s24 = smov %s2316_s27  }
 0x194   : >> { %s1145_s23 = scalar_lea.vmem %s1126_s18, %s1460_s12 [#allocation2]   ;;  %s1146_s22 = scalar_lea.vmem %s1128_s21, %s1460_s12  }
 0x199 PF: > { %p11_p3 = scmp.ge.s32.totalorder %s1897_s16, 5   ;;  %s2308_s12 = smov %s1824_s13 }
 0x19a   : > { %s2309_s13 = smov %s1905_s19  ;;  %s2310_s14 = smov %s1897_s16 }
 0x19b   :  { %13 = sbr.rel (!%p11_p3) target bundleno = 2 (0x2), region = 148 }

// kernel: generator_forward.4
= control target key start
LH: loop header
LB: loop body
LE: loop exit
PB: predicated region body
PF: predicated region fallthrough
CT: control target
= control target key end

     0   :  { %s1419_s15 = smov 0   ;;  %s1861_s0 = inlined_call_operand.vmem [shape: bf16[600,128], index: 0, kind: input, shape index: {}]   ;;  %s1862_s1 = inlined_call_operand.vmem [shape: f32[1,128], index: 1, kind: input, shape index: {}]   ;;  %s1863_s2 = inlined_call_operand.vmem [shape: f32[1,128], index: 2, kind: input, shape index: {}]   ;;  %s1864_s3 = inlined_call_operand.vmem [shape: bf16[128,256], index: 3, kind: input, shape index: {}]   ;;  %s1865_s4 = inlined_call_operand.vmem [shape: f32[3,2,256], index: 4, kind: output, shape index: {}]  }
   0x1 LB: > { %s1425_s16 = sadd.s32 4294967295, %s1391_s15   ;;  %p1181_p0 = scmp.ge.s32.totalorder %s1391_s15, 1  ;;  %s1391_s15 = sphi %s1419_s15, %s14_s15  }
   0x2   : > { %p171_p1 = scmp.lt.s32.totalorder %s1391_s15, 4 }
   0x4   : > { %p172_p2 = pnand %p1181_p0, %p171_p1 }
   0x5   : > { %v1361_v0 = vld [vmem:[%s1864_s3 + $0x4] ss:$8 sps:$4 sm:$0xff] (!%p172_p2)   ;;  %s1182_s19 = sshll.u32 (!%p172_p2), %s1425_s16, 5  ;;  %v1363_v1 = vld [vmem:[%s1864_s3] ss:$8 sps:$4 sm:$0xff] (!%p172_p2)   ;;  %v1393_v2 = vmov (!%p172_p2), 0   ;;  %v395_v10 = vlaneseq (!%p172_p2) }
   0x6   : > { %175 = sbr.rel (%p172_p2) target bundleno = 362 (0x16a), region = 36  ;;  %734 = vmatprep.mubr.bf16.mxu0 (!%p172_p2), %v1393_v2  ;;  %p206_p3 = scmp.lt.s32.totalorder (!%p172_p2), %s1182_s19, 74  ;;  %814 = vmatprep.mubr.bf16.mxu1 (!%p172_p2), %v1393_v2  ;;  %v1364_v3 = vld [vmem:[%s1864_s3 + $0x14] ss:$8 sps:$4 sm:$0xff] (!%p172_p2)   ;;  %v1366_v4 = vld [vmem:[%s1864_s3 + $0x10] ss:$8 sps:$4 sm:$0xff] (!%p172_p2)  }
   0x7   : > { %702 = vmatprep.subr.bf16.mxu0 (!%p172_p2), %v1361_v0  ;;  %1336 = vmatprep.subr.bf16.mxu1 (!%p172_p2), %v1361_v0  ;;  %v1367_v5 = vld [vmem:[%s1864_s3 + $0x24] ss:$8 sps:$4 sm:$0xff] (!%p172_p2)   ;;  %v1369_v6 = vld [vmem:[%s1864_s3 + $0x20] ss:$8 sps:$4 sm:$0xff] (!%p172_p2)   ;;  %v1370_v7 = vld [vmem:[%s1864_s3 + $0x34] ss:$8 sps:$4 sm:$0xff] (!%p172_p2)  }
   0x8   : > { %703 = vmatpush1.bf16.msra.mxu0 (!%p172_p2), %v1363_v1  ;;  %1344 = vmatpush1.bf16.msra.mxu1 (!%p172_p2), %v1363_v1  ;;  %v1372_v8 = vld [vmem:[%s1864_s3 + $0x30] ss:$8 sps:$4 sm:$0xff] (!%p172_p2)   ;;  %v1373_v11 = vld [vmem:[%s1864_s3 + $0x44] ss:$8 sps:$4 sm:$0xff] (!%p172_p2)   ;;  %s1188_s14 = sshll.u32 (!%p172_p2), %s1425_s16, 8  ;;  %v1474_v16 = vshrl.u32 (!%p172_p2), %v395_v10, 7 }
   0x9   : > { %704 = vmatprep.subr.bf16.mxu0 (!%p172_p2), %v1364_v3  ;;  %1337 = vmatprep.subr.bf16.mxu1 (!%p172_p2), %v1364_v3  ;;  %v1375_v14 = vld [vmem:[%s1864_s3 + $0x40] ss:$8 sps:$4 sm:$0xff] (!%p172_p2)   ;;  %v1376_v17 = vld [vmem:[%s1864_s3 + $0x54] ss:$8 sps:$4 sm:$0xff] (!%p172_p2)   ;;  %v1479_v18 = vstv (!%p172_p2), %s1188_s14  ;;  %v1378_v23 = vld [vmem:[%s1864_s3 + $0x50] ss:$8 sps:$4 sm:$0xff] (!%p172_p2)  }
   0xa   : > { %v1472_v15 = vld [vmem:[%s1862_s1] ss:$0 sm:$0xff] (!%p172_p2)  ;;  %v397_v25 = vadd.s32 (!%p172_p2), 8, %v1474_v16  ;;  %v398_v26 = vadd.s32 (!%p172_p2), 16, %v1474_v16  ;;  %v1379_v27 = vld [vmem:[%s1864_s3 + $0x64] ss:$8 sps:$4 sm:$0xff] (!%p172_p2)   ;;  %v430_v28 = vadd.s32 (!%p172_p2), %v1479_v18, %v1474_v16 }
   0xb   : > { %v1491_v24 = vld [vmem:[%s1863_s2] ss:$0 sm:$0xff] (!%p172_p2)  ;;  %v399_v30 = vadd.s32 (!%p172_p2), 24, %v1474_v16  ;;  %v412_v33 = vadd.s32 (!%p172_p2), 128, %v1474_v16  ;;  %v413_v34 = vadd.s32 (!%p172_p2), 136, %v1474_v16  ;;  %v400_v57 = vadd.s32 (!%p172_p2), 32, %v1474_v16 }
   0xc   : > { %705 = vmatpush1.bf16.msra.mxu0 (!%p172_p2), %v1366_v4  ;;  %1345 = vmatpush1.bf16.msra.mxu1 (!%p172_p2), %v1366_v4  ;;  %v1381_v38 = vld [vmem:[%s1864_s3 + $0x60] ss:$8 sps:$4 sm:$0xff] (!%p172_p2)   ;;  %v431_v39 = vadd.s32 (!%p172_p2), %v1479_v18, %v397_v25  ;;  %v1510_v40 = vadd.s32 (!%p172_p2), %v1479_v18, %v398_v26  ;;  %v1382_v43 = vld [vmem:[%s1864_s3 + $0x74] ss:$8 sps:$4 sm:$0xff] (!%p172_p2)   ;;  %vm462_vm0 = vcmp.lt.s32.totalorder (!%p172_p2), %v430_v28, 600  ;;  %v414_v1 = vadd.s32 (!%p172_p2), 144, %v1474_v16 }
   0xd   : > { %s1867_s19 = smov (!%p206_p3, %s1182_s19), 74  ;;  %706 = vmatprep.subr.bf16.mxu0 %v1367_v5  ;;  %1338 = vmatprep.subr.bf16.mxu1 %v1367_v5  ;;  %v1519_v45 = vadd.s32 %v1479_v18, %v399_v30  ;;  %v446_v50 = vadd.s32 %v1479_v18, %v412_v33  ;;  %v447_v51 = vadd.s32 %v1479_v18, %v413_v34  ;;  %v1384_v56 = vld [vmem:[%s1864_s3 + $0x70] ss:$8 sps:$4 sm:$0xff]   ;;  %v416_v33 = vadd.s32 160, %v1474_v16  ;;  %p215_p4 = scmp.lt.s32.totalorder %s1425_s16, 2 }
   0xe   : > { %s1183_s28 = sshll.u32 %s1867_s19, 2  ;;  %vm463_vm1 = vcmp.lt.s32.totalorder %v431_v39, 600  ;;  %vm464_vm5 = vcmp.lt.s32.totalorder %v1510_v40, 600  ;;  %v417_v34 = vadd.s32 168, %v1474_v16  ;;  %v403_v40 = vadd.s32 56, %v1474_v16 }
   0xf   : > { %s1456_s9 = scalar_lea.vmem %s1861_s0, %s1183_s28  ;;  %vm478_vm2 = vcmp.lt.s32.totalorder %v446_v50, 600  ;;  %vm479_vm3 = vcmp.lt.s32.totalorder %v447_v51, 600  ;;  %vm1205_vm4 = vmpackc.low %vm463_vm1, %vm462_vm0  ;;  %vm465_vm7 = vcmp.lt.s32.totalorder %v1519_v45, 600  ;;  %v450_v45 = vadd.s32 %v1479_v18, %v416_v33  ;;  %s1869_s16 = smov (!%p215_p4, %s1425_s16), 2 }
  0x10   : > { %707 = vmatpush1.bf16.msra.mxu0 %v1369_v6  ;;  %v1258_v9 = vld [vmem:[%s1456_s9] sm:$0xff]   ;;  %1346 = vmatpush1.bf16.msra.mxu1 %v1369_v6  ;;  %v1321_v19 = vld [vmem:[%s1456_s9 + $0x8] sm:$0xff]   ;;  %v1322_v48 = vld [vmem:[%s1456_s9 + $0x10] sm:$0xff]   ;;  %v415_v6 = vadd.s32 152, %v1474_v16 }
  0x11   : > { %708 = vmatprep.subr.bf16.mxu0 %v1370_v7  ;;  %1339 = vmatprep.subr.bf16.mxu1 %v1370_v7  ;;  %v1259_v12 = vunpack.c.l.bf16 %v1258_v9  ;;  %v1260_v13 = vunpack.c.h.bf16 %v1258_v9  ;;  %v1328_v22 = vld [vmem:[%s1456_s9 + $0x40] sm:$0xff]   ;;  %v1263_v29 = vunpack.c.l.bf16 %v1321_v19  ;;  %v1264_v31 = vunpack.c.h.bf16 %v1321_v19  ;;  %v1329_v42 = vld [vmem:[%s1456_s9 + $0x48] sm:$0xff]   ;;  %v1330_v10 = vld [vmem:[%s1456_s9 + $0x50] sm:$0xff]  }
  0x12   : > { %v1291_v32 = vunpack.c.l.bf16 %v1328_v22  ;;  %v1292_v37 = vunpack.c.h.bf16 %v1328_v22  ;;  %v1295_v55 = vunpack.c.l.bf16 %v1329_v42  ;;  %v1296_v59 = vunpack.c.h.bf16 %v1329_v42  ;;  %vm1229_vm6 = vmpackc.low %vm479_vm3, %vm478_vm2 }
  0x13   : > { %v292_v20 = vmul.f32 %v1259_v12, %v1472_v15  ;;  %v293_v21 = vmul.f32 %v1260_v13, %v1472_v15  ;;  %v294_v44 = vmul.f32 %v1263_v29, %v1472_v15  ;;  %v295_v47 = vmul.f32 %v1264_v31, %v1472_v15  ;;  %v1323_v12 = vld [vmem:[%s1456_s9 + $0x18] sm:$0xff]   ;;  %vm1208_vm10 = vmpackc.low %vm465_vm7, %vm464_vm5 }
  0x14   : > { %709 = vmatpush1.bf16.msra.mxu0 %v1372_v8  ;;  %1347 = vmatpush1.bf16.msra.mxu1 %v1372_v8  ;;  %v308_v41 = vmul.f32 %v1291_v32, %v1472_v15  ;;  %v309_v46 = vmul.f32 %v1292_v37, %v1472_v15  ;;  %v1267_v60 = vunpack.c.l.bf16 %v1322_v48  ;;  %v1268_v61 = vunpack.c.h.bf16 %v1322_v48 }
  0x15   : > { %710 = vmatprep.subr.bf16.mxu0 %v1373_v11  ;;  %1340 = vmatprep.subr.bf16.mxu1 %v1373_v11  ;;  %v331_v35 = vadd.f32 %v1491_v24, %v292_v20  ;;  %v332_v36 = vadd.f32 %v1491_v24, %v293_v21  ;;  %v310_v63 = vmul.f32 %v1295_v55, %v1472_v15  ;;  %v401_v11 = vadd.s32 40, %v1474_v16 }
  0x16   : > { %v347_v49 = vadd.f32 %v1491_v24, %v308_v41  ;;  %v348_v54 = vadd.f32 %v1491_v24, %v309_v46  ;;  %v311_v0 = vmul.f32 %v1296_v59, %v1472_v15  ;;  %v333_v4 = vadd.f32 %v1491_v24, %v294_v44 }
  0x17   : > { %v363_v52 = vmax.f32 %v331_v35, 0.0  ;;  %v364_v53 = vmax.f32 %v332_v36, 0.0  ;;  %v334_v5 = vadd.f32 %v1491_v24, %v295_v47  ;;  %v349_v8 = vadd.f32 %v1491_v24, %v310_v63  ;;  %v1324_v47 = vld [vmem:[%s1456_s9 + $0x20] sm:$0xff]  }
  0x18   : > { %711 = vmatpush1.bf16.msra.mxu0 %v1375_v14  ;;  %1348 = vmatpush1.bf16.msra.mxu1 %v1375_v14  ;;  %v379_v58 = vmax.f32 %v347_v49, 0.0  ;;  %v380_v62 = vmax.f32 %v348_v54, 0.0  ;;  %v350_v9 = vadd.f32 %v1491_v24, %v311_v0  ;;  %v448_v13 = vadd.s32 %v1479_v18, %v414_v1 }
  0x19   : > { %712 = vmatprep.subr.bf16.mxu0 %v1376_v17  ;;  %1341 = vmatprep.subr.bf16.mxu1 %v1376_v17  ;;  %v1206_v3 = vpack.c.bf16 %v364_v53, %v363_v52  ;;  %v296_v14 = vmul.f32 %v1267_v60, %v1472_v15  ;;  %v1552_v17 = vadd.s32 %v1479_v18, %v400_v57  ;;  %v365_v20 = vmax.f32 %v333_v4, 0.0 }
  0x1a   : > { %v1230_v7 = vpack.c.bf16 %v380_v62, %v379_v58  ;;  %v449_v19 = vadd.s32 %v1479_v18, %v415_v6  ;;  %v366_v21 = vmax.f32 %v334_v5, 0.0  ;;  %v297_v22 = vmul.f32 %v1268_v61, %v1472_v15 }
  0x1b   : > { %v1271_v25 = vunpack.c.l.bf16 %v1323_v12  ;;  %v381_v26 = vmax.f32 %v349_v8, 0.0  ;;  %v1300_v28 = vunpack.c.h.bf16 %v1330_v10  ;;  %v435_v29 = vadd.s32 %v1479_v18, %v401_v11 }
  0x1c   : > { %713 = vmatpush1.bf16.msra.mxu0 %v1378_v23  ;;  %1349 = vmatpush1.bf16.msra.mxu1 %v1378_v23  ;;  %v1299_v23 = vunpack.c.l.bf16 %v1330_v10  ;;  %v1272_v30 = vunpack.c.h.bf16 %v1323_v12  ;;  %vm480_vm8 = vcmp.lt.s32.totalorder %v448_v13, 600  ;;  %vm481_vm9 = vcmp.lt.s32.totalorder %v449_v19, 600  ;;  %v1325_v12 = vld [vmem:[%s1456_s9 + $0x28] sm:$0xff]  }
  0x1d   : > { %714 = vmatprep.subr.bf16.mxu0 %v1379_v27  ;;  %1342 = vmatprep.subr.bf16.mxu1 %v1379_v27  ;;  %v382_v27 = vmax.f32 %v350_v9, 0.0  ;;  %v313_v32 = vmul.f32 %v1300_v28, %v1472_v15  ;;  %v1209_v35 = vpack.c.bf16 %v366_v21, %v365_v20  ;;  %v335_v36 = vadd.f32 %v1491_v24, %v296_v14  ;;  %vm1232_vm12 = vmpackc.low %vm481_vm9, %vm480_vm8 }
  0x1e   : > { %v312_v31 = vmul.f32 %v1299_v23, %v1472_v15  ;;  %v336_v37 = vadd.f32 %v1491_v24, %v297_v22  ;;  %vm466_vm11 = vcmp.lt.s32.totalorder %v1552_v17, 600  ;;  %v299_v44 = vmul.f32 %v1272_v30, %v1472_v15  ;;  %v1333_v30 = vld [vmem:[%s1456_s9 + $0x68] sm:$0xff]  }
  0x1f   : > { %v1233_v39 = vpack.c.bf16 %v382_v27, %v381_v26  ;;  %v352_v42 = vadd.f32 %v1491_v24, %v313_v32  ;;  %v402_v46 = vadd.s32 48, %v1474_v16  ;;  %vm467_vm13 = vcmp.lt.s32.totalorder %v435_v29, 600 }
  0x20   : > { %715 = vmatpush1.bf16.msra.mxu0 %v1381_v38  ;;  %1350 = vmatpush1.bf16.msra.mxu1 %v1381_v38  ;;  %v298_v38 = vmul.f32 %v1271_v25, %v1472_v15  ;;  %v351_v41 = vadd.f32 %v1491_v24, %v312_v31  ;;  %v451_v48 = vadd.s32 %v1479_v18, %v417_v34  ;;  %v367_v49 = vmax.f32 %v335_v36, 0.0  ;;  %vm1211_vm0 = vmpackc.low %vm467_vm13, %vm466_vm11 }
  0x21   : > { %716 = vmatprep.subr.bf16.mxu0 %v1382_v43  ;;  %1343 = vmatprep.subr.bf16.mxu1 %v1382_v43  ;;  %v1331_v43 = vld [vmem:[%s1456_s9 + $0x58] sm:$0xff]   ;;  %v368_v50 = vmax.f32 %v336_v37, 0.0  ;;  %v1275_v54 = vunpack.c.l.bf16 %v1324_v47  ;;  %v338_v57 = vadd.f32 %v1491_v24, %v299_v44  ;;  %v1276_v58 = vunpack.c.h.bf16 %v1324_v47  ;;  %v1326_v47 = vld [vmem:[%s1456_s9 + $0x30] sm:$0xff]  }
  0x22   : > { %v1303_v51 = vunpack.c.l.bf16 %v1331_v43  ;;  %v1304_v52 = vunpack.c.h.bf16 %v1331_v43  ;;  %v337_v53 = vadd.f32 %v1491_v24, %v298_v38  ;;  %v383_v55 = vmax.f32 %v351_v41, 0.0 }
  0x23   : > { %vm482_vm14 = vcmp.lt.s32.totalorder %v450_v45, 600  ;;  %vm483_vm15 = vcmp.lt.s32.totalorder %v451_v48, 600  ;;  %v418_v61 = vadd.s32 176, %v1474_v16  ;;  %v419_v62 = vadd.s32 184, %v1474_v16 }
  0x24   : > { %717 = vmatpush1.bf16.msra.mxu0 %v1384_v56  ;;  %1351 = vmatpush1.bf16.msra.mxu1 %v1384_v56  ;;  %v384_v56 = vmax.f32 %v352_v42, 0.0  ;;  %v314_v59 = vmul.f32 %v1303_v51, %v1472_v15  ;;  %v315_v60 = vmul.f32 %v1304_v52, %v1472_v15  ;;  %v1212_v63 = vpack.c.bf16 %v368_v50, %v367_v49  ;;  %vm1235_vm1 = vmpackc.low %vm483_vm15, %vm482_vm14 }
  0x25   : > { %v436_v4 = vadd.s32 %v1479_v18, %v402_v46  ;;  %v437_v5 = vadd.s32 %v1479_v18, %v403_v40  ;;  %v300_v6 = vmul.f32 %v1275_v54, %v1472_v15  ;;  %v369_v8 = vmax.f32 %v337_v53, 0.0  ;;  %v1334_v54 = vld [vmem:[%s1456_s9 + $0x70] sm:$0xff]  }
  0x26   : > { %v353_v0 = vadd.f32 %v1491_v24, %v314_v59  ;;  %v354_v1 = vadd.f32 %v1491_v24, %v315_v60  ;;  %v370_v9 = vmax.f32 %v338_v57, 0.0  ;;  %v301_v10 = vmul.f32 %v1276_v58, %v1472_v15 }
  0x27   : > { %1207 = vmatmul.mubr.msk.bf16.vlgmr.msra.gmra.mrb[0].mxu0 %vm1205_vm4, %v1206_v3  ;;  %1231 = vmatmul.mubr.msk.bf16.vlgmr.msra.gmra.mrb[0].mxu1 %vm1229_vm6, %v1230_v7  ;;  %v1332_v3 = vld [vmem:[%s1456_s9 + $0x60] sm:$0xff]   ;;  %v1236_v7 = vpack.c.bf16 %v384_v56, %v383_v55  ;;  %v404_v11 = vadd.s32 64, %v1474_v16  ;;  %v452_v13 = vadd.s32 %v1479_v18, %v418_v61  ;;  %v453_v14 = vadd.s32 %v1479_v18, %v419_v62 }
  0x28   : > { %744 = vmatprep.mubr.bf16.mxu0 %v1393_v2  ;;  %824 = vmatprep.mubr.bf16.mxu1 %v1393_v2  ;;  %v1307_v17 = vunpack.c.l.bf16 %v1332_v3  ;;  %v405_v19 = vadd.s32 72, %v1474_v16  ;;  %v385_v20 = vmax.f32 %v353_v0, 0.0  ;;  %v386_v21 = vmax.f32 %v354_v1, 0.0 }
  0x29   : > { %v1308_v22 = vunpack.c.h.bf16 %v1332_v3  ;;  %vm468_vm2 = vcmp.lt.s32.totalorder %v436_v4, 600  ;;  %vm469_vm3 = vcmp.lt.s32.totalorder %v437_v5, 600  ;;  %v339_v23 = vadd.f32 %v1491_v24, %v300_v6 }
  0x2a   : > { %v316_v25 = vmul.f32 %v1307_v17, %v1472_v15  ;;  %v340_v26 = vadd.f32 %v1491_v24, %v301_v10  ;;  %v1279_v27 = vunpack.c.l.bf16 %v1325_v12  ;;  %v1280_v28 = vunpack.c.h.bf16 %v1325_v12  ;;  %vm1214_vm6 = vmpackc.low %vm469_vm3, %vm468_vm2 }
  0x2b   : > { %v317_v29 = vmul.f32 %v1308_v22, %v1472_v15  ;;  %vm484_vm4 = vcmp.lt.s32.totalorder %v452_v13, 600  ;;  %vm485_vm5 = vcmp.lt.s32.totalorder %v453_v14, 600  ;;  %v420_v31 = vadd.s32 192, %v1474_v16  ;;  %v1327_v13 = vld [vmem:[%s1456_s9 + $0x38] sm:$0xff]  }
  0x2c   : > { %v421_v32 = vadd.s32 200, %v1474_v16  ;;  %v1215_v33 = vpack.c.bf16 %v370_v9, %v369_v8  ;;  %v438_v34 = vadd.s32 %v1479_v18, %v404_v11  ;;  %v1239_v36 = vpack.c.bf16 %v386_v21, %v385_v20  ;;  %vm1238_vm7 = vmpackc.low %vm485_vm5, %vm484_vm4 }
  0x2d   : > { %v355_v37 = vadd.f32 %v1491_v24, %v316_v25  ;;  %v356_v38 = vadd.f32 %v1491_v24, %v317_v29  ;;  %v1312_v41 = vunpack.c.h.bf16 %v1333_v30  ;;  %v371_v42 = vmax.f32 %v339_v23, 0.0  ;;  %v1335_v25 = vld [vmem:[%s1456_s9 + $0x78] sm:$0xff]   ;;  %s1256_s9 = sshll.u32 %s1869_s16, 2 }
  0x2e   : > { %v372_v43 = vmax.f32 %v340_v26, 0.0  ;;  %v302_v44 = vmul.f32 %v1279_v27, %v1472_v15  ;;  %v303_v46 = vmul.f32 %v1280_v28, %v1472_v15  ;;  %v454_v40 = vadd.s32 %v1479_v18, %v420_v31  ;;  %s219_s12 = scalar_lea.vmem %s1865_s4, %s1256_s9 }
  0x2f   : > { %1210 = vmatmul.mubr.msk.bf16.gmra.mrb[4].mxu0 %vm1208_vm10, %v1209_v35  ;;  %1234 = vmatmul.mubr.msk.bf16.gmra.mrb[4].mxu1 %vm1232_vm12, %v1233_v39  ;;  %v439_v35 = vadd.s32 %v1479_v18, %v405_v19  ;;  %v1311_v39 = vunpack.c.l.bf16 %v1333_v30  ;;  %v455_v45 = vadd.s32 %v1479_v18, %v421_v32  ;;  %vm470_vm8 = vcmp.lt.s32.totalorder %v438_v34, 600 }
  0x30   : > { %754 = vmatprep.mubr.bf16.mxu0 %v1393_v2  ;;  %834 = vmatprep.mubr.bf16.mxu1 %v1393_v2  ;;  %v406_v48 = vadd.s32 80, %v1474_v16  ;;  %v407_v49 = vadd.s32 88, %v1474_v16  ;;  %v387_v50 = vmax.f32 %v355_v37, 0.0  ;;  %v388_v51 = vmax.f32 %v356_v38, 0.0 }
  0x31   : > { %vm471_vm9 = vcmp.lt.s32.totalorder %v439_v35, 600  ;;  %v318_v52 = vmul.f32 %v1311_v39, %v1472_v15  ;;  %v319_v53 = vmul.f32 %v1312_v41, %v1472_v15  ;;  %v1218_v55 = vpack.c.bf16 %v372_v43, %v371_v42 }
  0x32   : > { %v341_v56 = vadd.f32 %v1491_v24, %v302_v44  ;;  %v342_v57 = vadd.f32 %v1491_v24, %v303_v46  ;;  %v1283_v58 = vunpack.c.l.bf16 %v1326_v47  ;;  %vm486_vm10 = vcmp.lt.s32.totalorder %v454_v40, 600  ;;  %vm1217_vm12 = vmpackc.low %vm471_vm9, %vm470_vm8 }
  0x33   : > { %vm487_vm11 = vcmp.lt.s32.totalorder %v455_v45, 600  ;;  %v422_v59 = vadd.s32 208, %v1474_v16  ;;  %v423_v60 = vadd.s32 216, %v1474_v16  ;;  %v440_v61 = vadd.s32 %v1479_v18, %v406_v48 }
  0x34   : > { %v441_v62 = vadd.s32 %v1479_v18, %v407_v49  ;;  %v1315_v0 = vunpack.c.l.bf16 %v1334_v54  ;;  %v1242_v1 = vpack.c.bf16 %v388_v51, %v387_v50  ;;  %v357_v3 = vadd.f32 %v1491_v24, %v318_v52  ;;  %vm1241_vm13 = vmpackc.low %vm487_vm11, %vm486_vm10 }
  0x35   : > { %v358_v4 = vadd.f32 %v1491_v24, %v319_v53  ;;  %v1316_v5 = vunpack.c.h.bf16 %v1334_v54  ;;  %v373_v6 = vmax.f32 %v341_v56, 0.0  ;;  %v304_v8 = vmul.f32 %v1283_v58, %v1472_v15 }
  0x36   : > { %v456_v9 = vadd.s32 %v1479_v18, %v422_v59  ;;  %v457_v10 = vadd.s32 %v1479_v18, %v423_v60  ;;  %vm472_vm14 = vcmp.lt.s32.totalorder %v440_v61, 600  ;;  %v320_v12 = vmul.f32 %v1315_v0, %v1472_v15 }
  0x37   : > { %1213 = vmatmul.mubr.msk.bf16.gmra.mrb[8].mxu0 %vm1211_vm0, %v1212_v63  ;;  %1237 = vmatmul.mubr.msk.bf16.gmra.mrb[8].mxu1 %vm1235_vm1, %v1236_v7  ;;  %v1284_v63 = vunpack.c.h.bf16 %v1326_v47  ;;  %v374_v7 = vmax.f32 %v342_v57, 0.0  ;;  %vm473_vm15 = vcmp.lt.s32.totalorder %v441_v62, 600  ;;  %v389_v14 = vmax.f32 %v357_v3, 0.0 }
  0x38   : > { %764 = vmatprep.mubr.bf16.mxu0 %v1393_v2  ;;  %844 = vmatprep.mubr.bf16.mxu1 %v1393_v2  ;;  %v390_v17 = vmax.f32 %v358_v4, 0.0  ;;  %v321_v19 = vmul.f32 %v1316_v5, %v1472_v15  ;;  %v343_v21 = vadd.f32 %v1491_v24, %v304_v8  ;;  %v408_v22 = vadd.s32 96, %v1474_v16  ;;  %vm1220_vm2 = vmpackc.low %vm473_vm15, %vm472_vm14 }
  0x39   : > { %v305_v11 = vmul.f32 %v1284_v63, %v1472_v15  ;;  %v1221_v20 = vpack.c.bf16 %v374_v7, %v373_v6  ;;  %v409_v23 = vadd.s32 104, %v1474_v16  ;;  %vm488_vm0 = vcmp.lt.s32.totalorder %v456_v9, 600 }
  0x3a   : > { %vm489_vm1 = vcmp.lt.s32.totalorder %v457_v10, 600  ;;  %v424_v26 = vadd.s32 224, %v1474_v16  ;;  %v425_v27 = vadd.s32 232, %v1474_v16  ;;  %v1287_v29 = vunpack.c.l.bf16 %v1327_v13 }
  0x3b   : > { %v344_v28 = vadd.f32 %v1491_v24, %v305_v11  ;;  %v1288_v30 = vunpack.c.h.bf16 %v1327_v13  ;;  %v359_v31 = vadd.f32 %v1491_v24, %v320_v12  ;;  %v1245_v32 = vpack.c.bf16 %v390_v17, %v389_v14  ;;  %vm1244_vm3 = vmpackc.low %vm489_vm1, %vm488_vm0 }
  0x3c   : > { %v1319_v34 = vunpack.c.l.bf16 %v1335_v25  ;;  %v1320_v35 = vunpack.c.h.bf16 %v1335_v25  ;;  %v443_v37 = vadd.s32 %v1479_v18, %v409_v23  ;;  %v458_v38 = vadd.s32 %v1479_v18, %v424_v26 }
  0x3d   : > { %v459_v39 = vadd.s32 %v1479_v18, %v425_v27  ;;  %v375_v41 = vmax.f32 %v343_v21, 0.0  ;;  %v376_v42 = vmax.f32 %v344_v28, 0.0  ;;  %v306_v43 = vmul.f32 %v1287_v29, %v1472_v15 }
  0x3e   : > { %v307_v44 = vmul.f32 %v1288_v30, %v1472_v15  ;;  %v391_v46 = vmax.f32 %v359_v31, 0.0  ;;  %v322_v40 = vmul.f32 %v1319_v34, %v1472_v15  ;;  %v323_v45 = vmul.f32 %v1320_v35, %v1472_v15 }
  0x3f   : > { %1216 = vmatmul.mubr.msk.bf16.gmra.mrb[12].mxu0 %vm1214_vm6, %v1215_v33  ;;  %1240 = vmatmul.mubr.msk.bf16.gmra.mrb[12].mxu1 %vm1238_vm7, %v1239_v36  ;;  %v360_v33 = vadd.f32 %v1491_v24, %v321_v19  ;;  %v442_v36 = vadd.s32 %v1479_v18, %v408_v22  ;;  %vm475_vm5 = vcmp.lt.s32.totalorder %v443_v37, 600  ;;  %v410_v48 = vadd.s32 112, %v1474_v16 }
  0x40   : > { %774 = vmatprep.mubr.bf16.mxu0 %v1393_v2  ;;  %854 = vmatprep.mubr.bf16.mxu1 %v1393_v2  ;;  %v411_v49 = vadd.s32 120, %v1474_v16  ;;  %vm490_vm6 = vcmp.lt.s32.totalorder %v458_v38, 600  ;;  %vm491_vm7 = vcmp.lt.s32.totalorder %v459_v39, 600  ;;  %v426_v50 = vadd.s32 240, %v1474_v16 }
  0x41   : > { %v392_v47 = vmax.f32 %v360_v33, 0.0  ;;  %vm474_vm4 = vcmp.lt.s32.totalorder %v442_v36, 600  ;;  %v427_v51 = vadd.s32 248, %v1474_v16  ;;  %v1224_v52 = vpack.c.bf16 %v376_v42, %v375_v41  ;;  %vm1247_vm9 = vmpackc.low %vm491_vm7, %vm490_vm6 }
  0x42   : > { %v345_v53 = vadd.f32 %v1491_v24, %v306_v43  ;;  %v346_v54 = vadd.f32 %v1491_v24, %v307_v44  ;;  %vm1223_vm8 = vmpackc.low %vm475_vm5, %vm474_vm4  ;;  %v362_v56 = vadd.f32 %v1491_v24, %v323_v45  ;;  %v444_v57 = vadd.s32 %v1479_v18, %v410_v48 }
  0x43   : > { %v1248_v15 = vpack.c.bf16 %v392_v47, %v391_v46  ;;  %v445_v58 = vadd.s32 %v1479_v18, %v411_v49  ;;  %v460_v59 = vadd.s32 %v1479_v18, %v426_v50  ;;  %v461_v16 = vadd.s32 %v1479_v18, %v427_v51 }
  0x44   : > { %v377_v60 = vmax.f32 %v345_v53, 0.0  ;;  %v378_v61 = vmax.f32 %v346_v54, 0.0  ;;  %v394_v63 = vmax.f32 %v362_v56, 0.0  ;;  %vm476_vm10 = vcmp.lt.s32.totalorder %v444_v57, 600 }
  0x45   : > { %vm477_vm11 = vcmp.lt.s32.totalorder %v445_v58, 600  ;;  %vm1107_vm0 = vcmask 1040384  }
  0x46   : > { %vm1226_vm14 = vmpackc.low %vm477_vm11, %vm476_vm10 }
  0x47   : > { %1219 = vmatmul.mubr.msk.bf16.gmra.mrb[16].mxu0 %vm1217_vm12, %v1218_v55  ;;  %1243 = vmatmul.mubr.msk.bf16.gmra.mrb[16].mxu1 %vm1241_vm13, %v1242_v1  ;;  %v361_v55 = vadd.f32 %v1491_v24, %v322_v40  ;;  %vm492_vm12 = vcmp.lt.s32.totalorder %v460_v59, 600  ;;  %vm493_vm13 = vcmp.lt.s32.totalorder %v461_v16, 600  ;;  %v1227_v24 = vpack.c.bf16 %v378_v61, %v377_v60 }
  0x48   : > { %784 = vmatprep.mubr.bf16.mxu0 %v1393_v2  ;;  %864 = vmatprep.mubr.bf16.mxu1 %v1393_v2  ;;  %vm1250_vm15 = vmpackc.low %vm493_vm13, %vm492_vm12 }
  0x49   : > { %v393_v62 = vmax.f32 %v361_v55, 0.0 }
  0x4b   : > { %v1251_v0 = vpack.c.bf16 %v394_v63, %v393_v62 }
  0x4f   : > { %1222 = vmatmul.mubr.msk.bf16.gmra.mrb[20].mxu0 %vm1220_vm2, %v1221_v20  ;;  %1246 = vmatmul.mubr.msk.bf16.gmra.mrb[20].mxu1 %vm1244_vm3, %v1245_v32 }
  0x50   : > { %794 = vmatprep.mubr.bf16.mxu0 %v1393_v2  ;;  %874 = vmatprep.mubr.bf16.mxu1 %v1393_v2 }
  0x57   : > { %1225 = vmatmul.mubr.msk.bf16.gmra.mrb[24].mxu0 %vm1223_vm8, %v1224_v52  ;;  %1249 = vmatmul.mubr.msk.bf16.gmra.mrb[24].mxu1 %vm1247_vm9, %v1248_v15 }
  0x58   : > { %804 = vmatprep.mubr.bf16.mxu0 %v1393_v2  ;;  %884 = vmatprep.mubr.bf16.mxu1 %v1393_v2 }
  0x5f   : > { %1228 = vmatmul.mubr.msk.bf16.gmra.mrb[28].mxu0 %vm1226_vm14, %v1227_v24  ;;  %1252 = vmatmul.mubr.msk.bf16.gmra.mrb[28].mxu1 %vm1250_vm15, %v1251_v0 }
  0xfa   : > { %v736_v18 = vpop.f32.mrb[0].mxu0  ;;  %v1693_v3 = vpop.f32.mrb[0].mxu1 }
  0xfb   : > { %v738_v1 = vpop.f32.mrb[1].mxu0  ;;  %v1695_v5 = vpop.f32.mrb[1].mxu1  ;;  %v969_v6 = vmul.f32 %v736_v18, %v736_v18 }
  0xfc   : > { %v740_v4 = vpop.f32.mrb[2].mxu0  ;;  %v1697_v2 = vpop.f32.mrb[2].mxu1  ;;  %v970_v10 = vmul.f32 %v738_v1, %v738_v1 }
  0xfd   : > { %v895_v7 = vadd.f32 %v740_v4, %v736_v18  ;;  %v971_v8 = vmul.f32 %v740_v4, %v740_v4  ;;  %v742_v9 = vpop.f32.mrb[3].mxu0  ;;  %v1699_v13 = vpop.f32.mrb[3].mxu1 }
  0xfe   : > { %v932_v11 = vadd.f32 %v742_v9, %v738_v1  ;;  %v972_v12 = vmul.f32 %v742_v9, %v742_v9 }
  0xff   : > { %v1033_v14 = vadd.f32 %v971_v8, %v969_v6 }
 0x100   : > { %v1070_v17 = vadd.f32 %v972_v12, %v970_v10 }
 0x102   : > { %v746_v19 = vpop.f32.mrb[4].mxu0  ;;  %v1701_v23 = vpop.f32.mrb[4].mxu1 }
 0x103   : > { %v896_v20 = vadd.f32 %v895_v7, %v746_v19  ;;  %v973_v21 = vmul.f32 %v746_v19, %v746_v19  ;;  %v748_v22 = vpop.f32.mrb[5].mxu0  ;;  %v1703_v28 = vpop.f32.mrb[5].mxu1 }
 0x104   : > { %v933_v25 = vadd.f32 %v932_v11, %v748_v22  ;;  %v974_v26 = vmul.f32 %v748_v22, %v748_v22  ;;  %v750_v27 = vpop.f32.mrb[6].mxu0  ;;  %v1705_v33 = vpop.f32.mrb[6].mxu1 }
 0x105   : > { %v1034_v29 = vadd.f32 %v1033_v14, %v973_v21  ;;  %v897_v30 = vadd.f32 %v896_v20, %v750_v27  ;;  %v975_v31 = vmul.f32 %v750_v27, %v750_v27  ;;  %v752_v32 = vpop.f32.mrb[7].mxu0  ;;  %v1707_v37 = vpop.f32.mrb[7].mxu1 }
 0x106   : > { %v1071_v34 = vadd.f32 %v1070_v17, %v974_v26  ;;  %v934_v35 = vadd.f32 %v933_v25, %v752_v32  ;;  %v976_v36 = vmul.f32 %v752_v32, %v752_v32 }
 0x107   : > { %v1035_v38 = vadd.f32 %v1034_v29, %v975_v31 }
 0x108   : > { %v1072_v39 = vadd.f32 %v1071_v34, %v976_v36 }
 0x10a   : > { %v756_v41 = vpop.f32.mrb[8].mxu0  ;;  %v1709_v46 = vpop.f32.mrb[8].mxu1 }
 0x10b   : > { %v898_v42 = vadd.f32 %v897_v30, %v756_v41  ;;  %v977_v43 = vmul.f32 %v756_v41, %v756_v41  ;;  %v758_v44 = vpop.f32.mrb[9].mxu0  ;;  %v1711_v48 = vpop.f32.mrb[9].mxu1 }
 0x10c   : > { %v935_v47 = vadd.f32 %v934_v35, %v758_v44  ;;  %v978_v40 = vmul.f32 %v758_v44, %v758_v44  ;;  %v760_v45 = vpop.f32.mrb[10].mxu0  ;;  %v1713_v53 = vpop.f32.mrb[10].mxu1 }
 0x10d   : > { %v1036_v49 = vadd.f32 %v1035_v38, %v977_v43  ;;  %v899_v50 = vadd.f32 %v898_v42, %v760_v45  ;;  %v979_v51 = vmul.f32 %v760_v45, %v760_v45  ;;  %v762_v52 = vpop.f32.mrb[11].mxu0  ;;  %v1715_v56 = vpop.f32.mrb[11].mxu1 }
 0x10e   : > { %v1073_v54 = vadd.f32 %v1072_v39, %v978_v40  ;;  %v936_v15 = vadd.f32 %v935_v47, %v762_v52  ;;  %v980_v55 = vmul.f32 %v762_v52, %v762_v52 }
 0x10f   : > { %v1037_v57 = vadd.f32 %v1036_v49, %v979_v51 }
 0x110   : > { %v1074_v58 = vadd.f32 %v1073_v54, %v980_v55 }
 0x112   : > { %v766_v59 = vpop.f32.mrb[12].mxu0  ;;  %v1717_v62 = vpop.f32.mrb[12].mxu1 }
 0x113   : > { %v900_v16 = vadd.f32 %v899_v50, %v766_v59  ;;  %v981_v60 = vmul.f32 %v766_v59, %v766_v59  ;;  %v768_v61 = vpop.f32.mrb[13].mxu0  ;;  %v1719_v18 = vpop.f32.mrb[13].mxu1 }
 0x114   : > { %v937_v63 = vadd.f32 %v936_v15, %v768_v61  ;;  %v982_v24 = vmul.f32 %v768_v61, %v768_v61  ;;  %v770_v0 = vpop.f32.mrb[14].mxu0  ;;  %v1721_v8 = vpop.f32.mrb[14].mxu1 }
 0x115   : > { %v1038_v1 = vadd.f32 %v1037_v57, %v981_v60  ;;  %v901_v4 = vadd.f32 %v900_v16, %v770_v0  ;;  %v983_v6 = vmul.f32 %v770_v0, %v770_v0  ;;  %v772_v7 = vpop.f32.mrb[15].mxu0  ;;  %v1723_v12 = vpop.f32.mrb[15].mxu1 }
 0x116   : > { %v1075_v9 = vadd.f32 %v1074_v58, %v982_v24  ;;  %v938_v10 = vadd.f32 %v937_v63, %v772_v7  ;;  %v984_v11 = vmul.f32 %v772_v7, %v772_v7 }
 0x117   : > { %v1039_v14 = vadd.f32 %v1038_v1, %v983_v6 }
 0x118   : > { %v1076_v17 = vadd.f32 %v1075_v9, %v984_v11 }
 0x11a   : > { %v776_v19 = vpop.f32.mrb[16].mxu0  ;;  %v1725_v25 = vpop.f32.mrb[16].mxu1 }
 0x11b   : > { %v902_v20 = vadd.f32 %v901_v4, %v776_v19  ;;  %v985_v21 = vmul.f32 %v776_v19, %v776_v19  ;;  %v778_v22 = vpop.f32.mrb[17].mxu0  ;;  %v1727_v30 = vpop.f32.mrb[17].mxu1 }
 0x11c   : > { %v939_v26 = vadd.f32 %v938_v10, %v778_v22  ;;  %v986_v27 = vmul.f32 %v778_v22, %v778_v22  ;;  %v780_v29 = vpop.f32.mrb[18].mxu0  ;;  %v1729_v36 = vpop.f32.mrb[18].mxu1 }
 0x11d   : > { %v1040_v31 = vadd.f32 %v1039_v14, %v985_v21  ;;  %v903_v32 = vadd.f32 %v902_v20, %v780_v29  ;;  %v987_v34 = vmul.f32 %v780_v29, %v780_v29  ;;  %v782_v35 = vpop.f32.mrb[19].mxu0  ;;  %v1731_v42 = vpop.f32.mrb[19].mxu1 }
 0x11e   : > { %v1077_v38 = vadd.f32 %v1076_v17, %v986_v27  ;;  %v940_v39 = vadd.f32 %v939_v26, %v782_v35  ;;  %v988_v41 = vmul.f32 %v782_v35, %v782_v35 }
 0x11f   : > { %v1041_v43 = vadd.f32 %v1040_v31, %v987_v34 }
 0x120   : > { %v1078_v44 = vadd.f32 %v1077_v38, %v988_v41 }
 0x122   : > { %v786_v47 = vpop.f32.mrb[20].mxu0  ;;  %v1733_v50 = vpop.f32.mrb[20].mxu1 }
 0x123   : > { %v904_v40 = vadd.f32 %v903_v32, %v786_v47  ;;  %v989_v45 = vmul.f32 %v786_v47, %v786_v47  ;;  %v788_v49 = vpop.f32.mrb[21].mxu0  ;;  %v1735_v15 = vpop.f32.mrb[21].mxu1 }
 0x124   : > { %v941_v51 = vadd.f32 %v940_v39, %v788_v49  ;;  %v990_v52 = vmul.f32 %v788_v49, %v788_v49  ;;  %v790_v54 = vpop.f32.mrb[22].mxu0  ;;  %v1737_v16 = vpop.f32.mrb[22].mxu1 }
 0x125   : > { %v1042_v55 = vadd.f32 %v1041_v43, %v989_v45  ;;  %v905_v57 = vadd.f32 %v904_v40, %v790_v54  ;;  %v991_v58 = vmul.f32 %v790_v54, %v790_v54  ;;  %v792_v59 = vpop.f32.mrb[23].mxu0  ;;  %v1739_v24 = vpop.f32.mrb[23].mxu1 }
 0x126   : > { %v1079_v60 = vadd.f32 %v1078_v44, %v990_v52  ;;  %v942_v61 = vadd.f32 %v941_v51, %v792_v59  ;;  %v992_v63 = vmul.f32 %v792_v59, %v792_v59 }
 0x127   : > { %v1043_v0 = vadd.f32 %v1042_v55, %v991_v58 }
 0x128   : > { %v1080_v1 = vadd.f32 %v1079_v60, %v992_v63 }
 0x12a   : > { %v796_v4 = vpop.f32.mrb[24].mxu0  ;;  %v1741_v10 = vpop.f32.mrb[24].mxu1 }
 0x12b   : > { %v906_v6 = vadd.f32 %v905_v57, %v796_v4  ;;  %v993_v7 = vmul.f32 %v796_v4, %v796_v4  ;;  %v798_v9 = vpop.f32.mrb[25].mxu0  ;;  %v1743_v19 = vpop.f32.mrb[25].mxu1 }
 0x12c   : > { %v943_v11 = vadd.f32 %v942_v61, %v798_v9  ;;  %v994_v14 = vmul.f32 %v798_v9, %v798_v9  ;;  %v800_v17 = vpop.f32.mrb[26].mxu0  ;;  %v1745_v27 = vpop.f32.mrb[26].mxu1 }
 0x12d   : > { %v1044_v20 = vadd.f32 %v1043_v0, %v993_v7  ;;  %v907_v21 = vadd.f32 %v906_v6, %v800_v17  ;;  %v995_v22 = vmul.f32 %v800_v17, %v800_v17  ;;  %v802_v26 = vpop.f32.mrb[27].mxu0  ;;  %v1747_v34 = vpop.f32.mrb[27].mxu1  ;;  %v1001_v0 = vmul.f32 %v1693_v3, %v1693_v3 }
 0x12e   : > { %v1081_v29 = vadd.f32 %v1080_v1, %v994_v14  ;;  %v944_v31 = vadd.f32 %v943_v11, %v802_v26  ;;  %v996_v32 = vmul.f32 %v802_v26, %v802_v26  ;;  %v1002_v6 = vmul.f32 %v1695_v5, %v1695_v5 }
 0x12f   : > { %v1045_v35 = vadd.f32 %v1044_v20, %v995_v22  ;;  %v1003_v11 = vmul.f32 %v1697_v2, %v1697_v2  ;;  %v1004_v20 = vmul.f32 %v1699_v13, %v1699_v13 }
 0x130   : > { %v1082_v38 = vadd.f32 %v1081_v29, %v996_v32 }
 0x132   : > { %v806_v39 = vpop.f32.mrb[28].mxu0  ;;  %v1749_v47 = vpop.f32.mrb[28].mxu1 }
 0x133   : > { %v908_v41 = vadd.f32 %v907_v21, %v806_v39  ;;  %v997_v43 = vmul.f32 %v806_v39, %v806_v39  ;;  %v808_v44 = vpop.f32.mrb[29].mxu0  ;;  %v1751_v51 = vpop.f32.mrb[29].mxu1 }
 0x134   : > { %v945_v40 = vadd.f32 %v944_v31, %v808_v44  ;;  %v998_v45 = vmul.f32 %v808_v44, %v808_v44  ;;  %v810_v49 = vpop.f32.mrb[30].mxu0  ;;  %v1753_v58 = vpop.f32.mrb[30].mxu1 }
 0x135   : > { %v1046_v52 = vadd.f32 %v1045_v35, %v997_v43  ;;  %v909_v54 = vadd.f32 %v908_v41, %v810_v49  ;;  %v999_v55 = vmul.f32 %v810_v49, %v810_v49  ;;  %v812_v57 = vpop.f32.mrb[31].mxu0  ;;  %v1755_v63 = vpop.f32.mrb[31].mxu1 }
 0x136   : > { %v1083_v59 = vadd.f32 %v1082_v38, %v998_v45  ;;  %v946_v60 = vadd.f32 %v945_v40, %v812_v57  ;;  %v1000_v61 = vmul.f32 %v812_v57, %v812_v57 }
 0x137   : > { %v910_v1 = vadd.f32 %v909_v54, %v1693_v3  ;;  %v1047_v4 = vadd.f32 %v1046_v52, %v999_v55  ;;  %v1005_v3 = vmul.f32 %v1701_v23, %v1701_v23 }
 0x138   : > { %v947_v7 = vadd.f32 %v946_v60, %v1695_v5  ;;  %v1084_v9 = vadd.f32 %v1083_v59, %v1000_v61  ;;  %v1006_v5 = vmul.f32 %v1703_v28, %v1703_v28 }
 0x139   : > { %v911_v14 = vadd.f32 %v910_v1, %v1697_v2  ;;  %v1048_v17 = vadd.f32 %v1047_v4, %v1001_v0  ;;  %v1007_v2 = vmul.f32 %v1705_v33, %v1705_v33 }
 0x13a   : > { %v948_v21 = vadd.f32 %v947_v7, %v1699_v13  ;;  %v1085_v22 = vadd.f32 %v1084_v9, %v1002_v6  ;;  %v1008_v13 = vmul.f32 %v1707_v37, %v1707_v37  ;;  %v1017_v7 = vmul.f32 %v1725_v25, %v1725_v25 }
 0x13b   : > { %v912_v26 = vadd.f32 %v911_v14, %v1701_v23  ;;  %v1049_v29 = vadd.f32 %v1048_v17, %v1003_v11  ;;  %v1009_v23 = vmul.f32 %v1709_v46, %v1709_v46  ;;  %v1018_v11 = vmul.f32 %v1727_v30, %v1727_v30 }
 0x13c   : > { %v949_v31 = vadd.f32 %v948_v21, %v1703_v28  ;;  %v1086_v32 = vadd.f32 %v1085_v22, %v1004_v20  ;;  %v1010_v28 = vmul.f32 %v1711_v48, %v1711_v48  ;;  %v1019_v20 = vmul.f32 %v1729_v36, %v1729_v36 }
 0x13d   : > { %v913_v35 = vadd.f32 %v912_v26, %v1705_v33  ;;  %v1050_v38 = vadd.f32 %v1049_v29, %v1005_v3  ;;  %v1011_v33 = vmul.f32 %v1713_v53, %v1713_v53  ;;  %v1020_v22 = vmul.f32 %v1731_v42, %v1731_v42 }
 0x13e   : > { %v950_v39 = vadd.f32 %v949_v31, %v1707_v37  ;;  %v1087_v41 = vadd.f32 %v1086_v32, %v1006_v5  ;;  %v1012_v37 = vmul.f32 %v1715_v56, %v1715_v56  ;;  %v1021_v26 = vmul.f32 %v1733_v50, %v1733_v50 }
 0x13f   : > { %v1051_v43 = vadd.f32 %v1050_v38, %v1007_v2  ;;  %v914_v44 = vadd.f32 %v913_v35, %v1709_v46  ;;  %v1013_v46 = vmul.f32 %v1717_v62, %v1717_v62  ;;  %v1022_v5 = vmul.f32 %v1735_v15, %v1735_v15 }
 0x140   : > { %v1088_v40 = vadd.f32 %v1087_v41, %v1008_v13  ;;  %v951_v45 = vadd.f32 %v950_v39, %v1711_v48  ;;  %v1014_v48 = vmul.f32 %v1719_v18, %v1719_v18  ;;  %v1023_v32 = vmul.f32 %v1737_v16, %v1737_v16 }
 0x141   : > { %v915_v49 = vadd.f32 %v914_v44, %v1713_v53  ;;  %v1052_v52 = vadd.f32 %v1051_v43, %v1009_v23  ;;  %v1015_v53 = vmul.f32 %v1721_v8, %v1721_v8  ;;  %v1024_v35 = vmul.f32 %v1739_v24, %v1739_v24 }
 0x142   : > { %v952_v54 = vadd.f32 %v951_v45, %v1715_v56  ;;  %v1089_v55 = vadd.f32 %v1088_v40, %v1010_v28  ;;  %v1016_v56 = vmul.f32 %v1723_v12, %v1723_v12  ;;  %v1025_v13 = vmul.f32 %v1741_v10, %v1741_v10 }
 0x143   : > { %v916_v57 = vadd.f32 %v915_v49, %v1717_v62  ;;  %v1053_v59 = vadd.f32 %v1052_v52, %v1011_v33  ;;  %v1026_v41 = vmul.f32 %v1743_v19, %v1743_v19  ;;  %v1027_v43 = vmul.f32 %v1745_v27, %v1745_v27 }
 0x144   : > { %v953_v60 = vadd.f32 %v952_v54, %v1719_v18  ;;  %v1090_v61 = vadd.f32 %v1089_v55, %v1012_v37  ;;  %v1030_v40 = vmul.f32 %v1751_v51, %v1751_v51  ;;  %v1031_v37 = vmul.f32 %v1753_v58, %v1753_v58 }
 0x145   : > { %v917_v0 = vadd.f32 %v916_v57, %v1721_v8  ;;  %v1054_v1 = vadd.f32 %v1053_v59, %v1013_v46 }
 0x146   : > { %v954_v4 = vadd.f32 %v953_v60, %v1723_v12  ;;  %v1091_v6 = vadd.f32 %v1090_v61, %v1014_v48 }
 0x147   : > { %v918_v62 = vadd.f32 %v917_v0, %v1725_v25  ;;  %v1055_v9 = vadd.f32 %v1054_v1, %v1015_v53 }
 0x148   : > { %v955_v18 = vadd.f32 %v954_v4, %v1727_v30  ;;  %v1092_v14 = vadd.f32 %v1091_v6, %v1016_v56 }
 0x149   : > { %v1056_v8 = vadd.f32 %v1055_v9, %v1017_v7  ;;  %v919_v17 = vadd.f32 %v918_v62, %v1729_v36 }
 0x14a   : > { %v1093_v12 = vadd.f32 %v1092_v14, %v1018_v11  ;;  %v956_v21 = vadd.f32 %v955_v18, %v1731_v42 }
 0x14b   : > { %v1057_v25 = vadd.f32 %v1056_v8, %v1019_v20  ;;  %v920_v3 = vadd.f32 %v919_v17, %v1733_v50 }
 0x14c   : > { %v1094_v30 = vadd.f32 %v1093_v12, %v1020_v22  ;;  %v957_v29 = vadd.f32 %v956_v21, %v1735_v15 }
 0x14d   : > { %v1058_v31 = vadd.f32 %v1057_v25, %v1021_v26  ;;  %v921_v36 = vadd.f32 %v920_v3, %v1737_v16 }
 0x14e   : > { %v1095_v2 = vadd.f32 %v1094_v30, %v1022_v5  ;;  %v958_v42 = vadd.f32 %v957_v29, %v1739_v24  ;;  %v1029_v24 = vmul.f32 %v1749_v47, %v1749_v47 }
 0x14f   : > { %v1059_v38 = vadd.f32 %v1058_v31, %v1023_v32  ;;  %v922_v50 = vadd.f32 %v921_v36, %v1741_v10  ;;  %v1028_v10 = vmul.f32 %v1747_v34, %v1747_v34 }
 0x150   : > { %v1096_v39 = vadd.f32 %v1095_v2, %v1024_v35  ;;  %v959_v15 = vadd.f32 %v958_v42, %v1743_v19 }
 0x151   : > { %v1060_v23 = vadd.f32 %v1059_v38, %v1025_v13  ;;  %v923_v16 = vadd.f32 %v922_v50, %v1745_v27 }
 0x152   : > { %v1097_v44 = vadd.f32 %v1096_v39, %v1026_v41  ;;  %v960_v28 = vadd.f32 %v959_v15, %v1747_v34  ;;  %v1032_v34 = vmul.f32 %v1755_v63, %v1755_v63 }
 0x153   : > { %v1061_v45 = vadd.f32 %v1060_v23, %v1027_v43  ;;  %v924_v19 = vadd.f32 %v923_v16, %v1749_v47 }
 0x154   : > { %v1098_v33 = vadd.f32 %v1097_v44, %v1028_v10  ;;  %v961_v49 = vadd.f32 %v960_v28, %v1751_v51 }
 0x155   : > { %v1062_v52 = vadd.f32 %v1061_v45, %v1029_v24  ;;  %v925_v27 = vadd.f32 %v924_v19, %v1753_v58 }
 0x156   : > { %v1099_v54 = vadd.f32 %v1098_v33, %v1030_v40  ;;  %v962_v55 = vadd.f32 %v961_v49, %v1755_v63 }
 0x157   : > { %v926_v46 = vrot.slane %v925_v27, 4  ;;  %v1063_v57 = vadd.f32 %v1062_v52, %v1031_v37 }
 0x158   : > { %v963_v59 = vrot.slane %v962_v55, 4  ;;  %v1100_v47 = vadd.f32 %v1099_v54, %v1032_v34 }
 0x159   : > { %v927_v48 = vadd.f32 %v926_v46, %v925_v27  ;;  %v1064_v51 = vrot.slane %v1063_v57, 4 }
 0x15a   : > { %v964_v60 = vadd.f32 %v963_v59, %v962_v55  ;;  %v1101_v61 = vrot.slane %v1100_v47, 4 }
 0x15b   : > { %v928_v53 = vrot.slane %v927_v48, 2  ;;  %v1065_v0 = vadd.f32 %v1064_v51, %v1063_v57 }
 0x15c   : > { %v965_v1 = vrot.slane %v964_v60, 2  ;;  %v1102_v58 = vadd.f32 %v1101_v61, %v1100_v47 }
 0x15d   : > { %v929_v56 = vadd.f32 %v928_v53, %v927_v48  ;;  %v1066_v4 = vrot.slane %v1065_v0, 2 }
 0x15e   : > { %v966_v6 = vadd.f32 %v965_v1, %v964_v60  ;;  %v1103_v62 = vrot.slane %v1102_v58, 2 }
 0x15f   : > { %v930_v7 = vrot.slane %v929_v56, 1  ;;  %v1067_v63 = vadd.f32 %v1066_v4, %v1065_v0 }
 0x160   : > { %v967_v9 = vrot.slane %v966_v6, 1  ;;  %v1104_v18 = vadd.f32 %v1103_v62, %v1102_v58 }
 0x161   : > { %v1068_v11 = vrot.slane %v1067_v63, 1  ;;  %v931_v8 = vadd.f32 %v930_v7, %v929_v56 }
 0x162   : > { %v1105_v14 = vrot.slane %v1104_v18, 1  ;;  %v968_v20 = vadd.f32 %v967_v9, %v966_v6 }
 0x163   : > { %v1069_v17 = vadd.f32 %v1068_v11, %v1067_v63 }
 0x164   : > { %v1106_v12 = vadd.f32 %v1105_v14, %v1104_v18 }
 0x165   : > { %v1108_v21 = vsel %vm1107_vm0, %v931_v8, %v1069_v17 }
 0x166   : > { %v1109_v22 = vsel %vm1107_vm0, %v968_v20, %v1106_v12 }
 0x167   : > { %v1112_v25 = vcombine.low %v1108_v21, %v1109_v22 }
 0x169   : > { %1253 = vst.sshfl [vmem:[%s219_s12] sm:$0x33 pattern:$0x76325410] %v1112_v25 }
 0x16a PF: > { %s14_s15 = sadd.s32 1, %s1391_s15  }
 0x16b   : > { %p11_p5 = scmp.ge.s32.totalorder %s14_s15, 5  }
 0x16d   :  { %13 = sbr.rel (!%p11_p5) target bundleno = 1 (0x1), region = 66 }

// kernel: generator_forward.5
= control target key start
LH: loop header
LB: loop body
LE: loop exit
PB: predicated region body
PF: predicated region fallthrough
CT: control target
= control target key end

     0   :  { %s2162_s24 = smov 0   ;;  %s2164_s25 = smov 0   ;;  %s2731_s0 = inlined_call_operand.vmem [shape: bf16[600,128], index: 0, kind: input, shape index: {}]   ;;  %s2732_s1 = inlined_call_operand.vmem [shape: f32[1,128], index: 1, kind: input, shape index: {}]   ;;  %s2733_s2 = inlined_call_operand.vmem [shape: f32[1,128], index: 2, kind: input, shape index: {}]   ;;  %s2734_s3 = inlined_call_operand.vmem [shape: bf16[128,256], index: 3, kind: input, shape index: {}]   ;;  %s2735_s4 = inlined_call_operand.vmem [shape: f32[1,256], index: 4, kind: input, shape index: {}]   ;;  %s2736_s5 = inlined_call_operand.vmem [shape: bf16[256,128], index: 5, kind: input, shape index: {}]   ;;  %s2737_s6 = inlined_call_operand.vmem [shape: f32[1,128], index: 6, kind: input, shape index: {}]   ;;  %s2738_s7 = inlined_call_operand.vmem [shape: f32[600,128], index: 7, kind: output, shape index: {}]  }
   0x1   :  { %s2166_s26 = smov 0  }
   0x2 LB: > { %s2175_s27 = sadd.s32 4294967295, %s2087_s26   ;;  %s2177_s28 = sadd.s32 1, %s2087_s26   ;;  %s2087_s26 = sphi %s2166_s26, %s2747_s26   ;;  %s2083_s25 = sphi %s2164_s25, %s2746_s25   ;;  %s2079_s24 = sphi %s2162_s24, %s2745_s24  }
   0x3   : > { %s173_s29 = ssub.s32 %s2087_s26, %s2177_s28  ;;  %s176_s30 = sadd.s32 1, %s2083_s25 }
   0x4   : > { %p174_p0 = scmp.eq.s32.totalorder %s173_s29, 0  ;;  %p186_p1 = scmp.ne.s32.totalorder %s2083_s25, %s2079_s24 }
   0x5   : > { %p187_p2 = scmp.eq.s32.totalorder %s2175_s27, 2  ;;  %p1590_p3 = scmp.ge.s32.totalorder %s2087_s26, 1 }
   0x6   : > { %s2185_s8 = scalar_select %p174_p0, %s2083_s25, %s176_s30  }
   0x7   : > { %p2187_p4 = por %p187_p2, %p186_p1  ;;  %p246_p5 = scmp.lt.s32.totalorder %s2087_s26, 4 }
   0x9   : > { %p247_p6 = pnand %p1590_p3, %p246_p5 }
   0xa   : > { %v1929_v0 = vld [vmem:[%s2734_s3 + $0x4] ss:$8 sps:$4 sm:$0xff] (!%p247_p6)   ;;  %s2195_s12 = sshll.u32 (!%p247_p6), %s2175_s27, 5  ;;  %v1931_v1 = vld [vmem:[%s2734_s3] ss:$8 sps:$4 sm:$0xff] (!%p247_p6)   ;;  %v2121_v2 = vmov (!%p247_p6), 0  }
   0xb   : > { %250 = sbr.rel (%p247_p6) target bundleno = 672 (0x2a0), region = 48  ;;  %631 = vmatprep.mubr.bf16.mxu0 (!%p247_p6), %v2121_v2  ;;  %p286_p7 = scmp.lt.s32.totalorder (!%p247_p6), %s2195_s12, 74  ;;  %599 = vmatprep.subr.bf16.mxu0 (!%p247_p6), %v1929_v0  ;;  %v1932_v3 = vld [vmem:[%s2734_s3 + $0x14] ss:$8 sps:$4 sm:$0xff] (!%p247_p6)   ;;  %v1934_v4 = vld [vmem:[%s2734_s3 + $0x10] ss:$8 sps:$4 sm:$0xff] (!%p247_p6)  }
   0xc   : > { %600 = vmatpush1.bf16.msra.mxu0 (!%p247_p6), %v1931_v1  ;;  %v1935_v5 = vld [vmem:[%s2734_s3 + $0x24] ss:$8 sps:$4 sm:$0xff] (!%p247_p6)   ;;  %v1937_v6 = vld [vmem:[%s2734_s3 + $0x20] ss:$8 sps:$4 sm:$0xff] (!%p247_p6)   ;;  %v1938_v7 = vld [vmem:[%s2734_s3 + $0x34] ss:$8 sps:$4 sm:$0xff] (!%p247_p6)  }
   0xd   : > { %601 = vmatprep.subr.bf16.mxu0 (!%p247_p6), %v1932_v3  ;;  %v1940_v9 = vld [vmem:[%s2734_s3 + $0x30] ss:$8 sps:$4 sm:$0xff] (!%p247_p6)   ;;  %v1941_v10 = vld [vmem:[%s2734_s3 + $0x44] ss:$8 sps:$4 sm:$0xff] (!%p247_p6)   ;;  %v2234_v14 = vld [vmem:[%s2732_s1] ss:$0 sm:$0xff] (!%p247_p6) }
   0xe   : > { %v1943_v16 = vld [vmem:[%s2734_s3 + $0x40] ss:$8 sps:$4 sm:$0xff] (!%p247_p6)   ;;  %v1944_v17 = vld [vmem:[%s2734_s3 + $0x54] ss:$8 sps:$4 sm:$0xff] (!%p247_p6)   ;;  %v1946_v26 = vld [vmem:[%s2734_s3 + $0x50] ss:$8 sps:$4 sm:$0xff] (!%p247_p6)  }
   0xf   : > { %v2249_v24 = vld [vmem:[%s2733_s2] ss:$0 sm:$0xff] (!%p247_p6)  ;;  %v1947_v27 = vld [vmem:[%s2734_s3 + $0x64] ss:$8 sps:$4 sm:$0xff] (!%p247_p6)   ;;  %v1950_v36 = vld [vmem:[%s2734_s3 + $0x74] ss:$8 sps:$4 sm:$0xff] (!%p247_p6)  }
  0x10   : > { %602 = vmatpush1.bf16.msra.mxu0 (!%p247_p6), %v1934_v4  ;;  %v1949_v32 = vld [vmem:[%s2734_s3 + $0x60] ss:$8 sps:$4 sm:$0xff] (!%p247_p6)   ;;  %v1952_v50 = vld [vmem:[%s2734_s3 + $0x70] ss:$8 sps:$4 sm:$0xff] (!%p247_p6)   ;;  %s278_s30 = sand.u32 (!%p247_p6), 1, %s2079_s24  }
  0x11   : > { %603 = vmatprep.subr.bf16.mxu0 (!%p247_p6), %v1935_v5  ;;  %v1953_v47 = vld [vmem:[%s2736_s5 + $0x40] sm:$0xff] (!%p247_p6)   ;;  %v1955_v49 = vld [vmem:[%s2736_s5 + $0x48] sm:$0xff] (!%p247_p6)   ;;  %s1591_s11 = sshll.u32 (!%p247_p6), %s278_s30, 8 }
  0x12   : > { %s287_s19 = scalar_select %p286_p7, %s2195_s12, 74  ;;  %v1954_v48 = vld [vmem:[%s2736_s5] sm:$0xff]   ;;  %1728 = vmatprep.subr.bf16.mxu1 %v1953_v47  ;;  %v1956_v0 = vld [vmem:[%s2736_s5 + $0x8] sm:$0xff]  }
  0x13   : > { %1729 = vmatpush3.bf16.msra.mxu1 %v1954_v48  ;;  %s1256_s24 = ssub.s32 (%p2187_p4), 75, %s2195_s12  ;;  %s1646_s13 = sshll.u32 (%p2187_p4), %s2175_s27, 8 }
  0x14   : > { %s1593_s22 = sshll.u32 %s287_s19, 2  ;;  %604 = vmatpush1.bf16.msra.mxu0 %v1937_v6  ;;  %1730 = vmatprep.subr.bf16.mxu1 %v1955_v49  ;;  %p1257_p8 = scmp.lt.s32.totalorder (%p2187_p4), %s1256_s24, 32 }
  0x15   : > { %s2218_s10 = scalar_lea.vmem %s2731_s0, %s1593_s22  ;;  %605 = vmatprep.subr.bf16.mxu0 %v1938_v7  ;;  %v1957_v7 = vld [vmem:[%s2736_s5 + $0x50] sm:$0xff]   ;;  %s2599_s16 = scalar_lea.vmem (%p2187_p4), %s2738_s7, %s1646_s13  }
  0x16   : > { %v1650_v8 = vld [vmem:[%s2218_s10] sm:$0xff]   ;;  %v1713_v13 = vld [vmem:[%s2218_s10 + $0x8] sm:$0xff]   ;;  %v1714_v15 = vld [vmem:[%s2218_s10 + $0x10] sm:$0xff]  }
  0x17   : > { %v1651_v11 = vunpack.c.l.bf16 %v1650_v8  ;;  %v1652_v12 = vunpack.c.h.bf16 %v1650_v8  ;;  %v1655_v18 = vunpack.c.l.bf16 %v1713_v13  ;;  %v1656_v19 = vunpack.c.h.bf16 %v1713_v13  ;;  %v1715_v23 = vld [vmem:[%s2218_s10 + $0x18] sm:$0xff]   ;;  %v1720_v38 = vld [vmem:[%s2218_s10 + $0x40] sm:$0xff]   ;;  %v1721_v53 = vld [vmem:[%s2218_s10 + $0x48] sm:$0xff]   ;;  %1731 = vmatpush3.bf16.msra.mxu1 %v1956_v0 }
  0x18   : > { %606 = vmatpush1.bf16.msra.mxu0 %v1940_v9  ;;  %v1659_v22 = vunpack.c.l.bf16 %v1714_v15  ;;  %v1660_v25 = vunpack.c.h.bf16 %v1714_v15  ;;  %v1663_v30 = vunpack.c.l.bf16 %v1715_v23  ;;  %v1664_v31 = vunpack.c.h.bf16 %v1715_v23  ;;  %v2293_v51 = vld [vmem:[%s2218_s10 + $0x20] sm:$0xff]   ;;  %v1722_v58 = vld [vmem:[%s2218_s10 + $0x50] sm:$0xff]   ;;  %v1723_v63 = vld [vmem:[%s2218_s10 + $0x58] sm:$0xff]   ;;  %1732 = vmatprep.subr.bf16.mxu1 %v1957_v7 }
  0x19   : > { %607 = vmatprep.subr.bf16.mxu0 %v1941_v10  ;;  %v372_v20 = vmul.f32 %v1651_v11, %v2234_v14  ;;  %v373_v21 = vmul.f32 %v1652_v12, %v2234_v14  ;;  %v374_v28 = vmul.f32 %v1655_v18, %v2234_v14  ;;  %v375_v29 = vmul.f32 %v1656_v19, %v2234_v14  ;;  %v1724_v6 = vld [vmem:[%s2218_s10 + $0x60] sm:$0xff]   ;;  %v1727_v49 = vld [vmem:[%s2218_s10 + $0x78] sm:$0xff]  }
  0x1a   : > { %v376_v35 = vmul.f32 %v1659_v22, %v2234_v14  ;;  %v377_v37 = vmul.f32 %v1660_v25, %v2234_v14  ;;  %v378_v41 = vmul.f32 %v1663_v30, %v2234_v14  ;;  %v379_v42 = vmul.f32 %v1664_v31, %v2234_v14 }
  0x1b   : > { %v411_v33 = vadd.f32 %v2249_v24, %v372_v20  ;;  %v412_v34 = vadd.f32 %v2249_v24, %v373_v21  ;;  %v413_v39 = vadd.f32 %v2249_v24, %v374_v28  ;;  %v414_v40 = vadd.f32 %v2249_v24, %v375_v29  ;;  %v1958_v21 = vld [vmem:[%s2736_s5 + $0x10] sm:$0xff]  }
  0x1c   : > { %608 = vmatpush1.bf16.msra.mxu0 %v1943_v16  ;;  %v2275_v45 = vadd.f32 %v2249_v24, %v376_v35  ;;  %v2278_v46 = vadd.f32 %v2249_v24, %v377_v37  ;;  %v1683_v52 = vunpack.c.l.bf16 %v1720_v38  ;;  %v2297_v56 = vadd.f32 %v2249_v24, %v378_v41  ;;  %v1726_v41 = vld [vmem:[%s2218_s10 + $0x70] sm:$0xff]   ;;  %1733 = vmatpush3.bf16.msra.mxu1 %v1958_v21 }
  0x1d   : > { %609 = vmatprep.subr.bf16.mxu0 %v1944_v17  ;;  %v443_v43 = vmax.f32 %v411_v33, 0.0  ;;  %v444_v44 = vmax.f32 %v412_v34, 0.0  ;;  %v445_v54 = vmax.f32 %v413_v39, 0.0  ;;  %v446_v55 = vmax.f32 %v414_v40, 0.0 }
  0x1e   : > { %v2300_v57 = vadd.f32 %v2249_v24, %v379_v42  ;;  %v447_v60 = vmax.f32 %v2275_v45, 0.0  ;;  %v1684_v61 = vunpack.c.h.bf16 %v1720_v38  ;;  %v388_v62 = vmul.f32 %v1683_v52, %v2234_v14  ;;  %v1960_v42 = vld [vmem:[%s2736_s5 + $0x18] sm:$0xff]  }
  0x1f   : > { %v475_v59 = vpack.c.bf16 %v444_v44, %v443_v43  ;;  %v448_v1 = vmax.f32 %v2278_v46, 0.0  ;;  %v1667_v3 = vunpack.c.l.bf16 %v2293_v51  ;;  %v1687_v4 = vunpack.c.l.bf16 %v1721_v53 }
  0x20   : > { %610 = vmatpush1.bf16.msra.mxu0 %v1946_v26  ;;  %v1688_v5 = vunpack.c.h.bf16 %v1721_v53  ;;  %v389_v8 = vmul.f32 %v1684_v61, %v2234_v14  ;;  %v427_v9 = vadd.f32 %v2249_v24, %v388_v62  ;;  %v1691_v10 = vunpack.c.l.bf16 %v1722_v58 }
  0x21   : > { %611 = vmatprep.subr.bf16.mxu0 %v1947_v27  ;;  %v1692_v11 = vunpack.c.h.bf16 %v1722_v58  ;;  %v476_v12 = vpack.c.bf16 %v446_v55, %v445_v54  ;;  %v390_v13 = vmul.f32 %v1687_v4, %v2234_v14  ;;  %v1695_v16 = vunpack.c.l.bf16 %v1723_v63  ;;  %v1959_v27 = vld [vmem:[%s2736_s5 + $0x58] sm:$0xff]  }
  0x22   : > { %v391_v15 = vmul.f32 %v1688_v5, %v2234_v14  ;;  %v428_v17 = vadd.f32 %v2249_v24, %v389_v8  ;;  %v459_v18 = vmax.f32 %v427_v9, 0.0  ;;  %v392_v19 = vmul.f32 %v1691_v10, %v2234_v14  ;;  %1734 = vmatprep.subr.bf16.mxu1 %v1959_v27 }
  0x23   : > { %v393_v20 = vmul.f32 %v1692_v11, %v2234_v14  ;;  %v429_v22 = vadd.f32 %v2249_v24, %v390_v13  ;;  %v1696_v25 = vunpack.c.h.bf16 %v1723_v63  ;;  %v394_v26 = vmul.f32 %v1695_v16, %v2234_v14  ;;  %1735 = vmatpush3.bf16.msra.mxu1 %v1960_v42  ;;  %v1963_v11 = vld [vmem:[%s2736_s5 + $0x68] sm:$0xff]  }
  0x24   : > { %612 = vmatpush1.bf16.msra.mxu0 %v1949_v32  ;;  %v430_v23 = vadd.f32 %v2249_v24, %v391_v15  ;;  %v460_v28 = vmax.f32 %v428_v17, 0.0  ;;  %v431_v29 = vadd.f32 %v2249_v24, %v392_v19  ;;  %v1699_v31 = vunpack.c.l.bf16 %v1724_v6 }
  0x25   : > { %613 = vmatprep.subr.bf16.mxu0 %v1950_v36  ;;  %v432_v30 = vadd.f32 %v2249_v24, %v393_v20  ;;  %v461_v32 = vmax.f32 %v429_v22, 0.0  ;;  %v395_v34 = vmul.f32 %v1696_v25, %v2234_v14  ;;  %v433_v35 = vadd.f32 %v2249_v24, %v394_v26  ;;  %v1725_v36 = vld [vmem:[%s2218_s10 + $0x68] sm:$0xff]  }
  0x26   : > { %v462_v33 = vmax.f32 %v430_v23, 0.0  ;;  %v2337_v37 = vpack.c.bf16 %v460_v28, %v459_v18  ;;  %v463_v38 = vmax.f32 %v431_v29, 0.0  ;;  %v1700_v40 = vunpack.c.h.bf16 %v1724_v6  ;;  %v1962_v6 = vld [vmem:[%s2736_s5 + $0x20] sm:$0xff]  }
  0x27   : > { %v464_v39 = vmax.f32 %v432_v30, 0.0  ;;  %v434_v44 = vadd.f32 %v2249_v24, %v395_v34  ;;  %v465_v47 = vmax.f32 %v433_v35, 0.0  ;;  %v396_v48 = vmul.f32 %v1699_v31, %v2234_v14  ;;  %v1717_v35 = vld [vmem:[%s2218_s10 + $0x28] sm:$0xff]  }
  0x28   : > { %614 = vmatpush1.bf16.msra.mxu0 %v1952_v50  ;;  %v2343_v43 = vpack.c.bf16 %v462_v33, %v461_v32  ;;  %v1961_v50 = vld [vmem:[%s2736_s5 + $0x60] sm:$0xff]   ;;  %v397_v53 = vmul.f32 %v1700_v40, %v2234_v14  ;;  %v1703_v54 = vunpack.c.l.bf16 %v1725_v36  ;;  %v1704_v55 = vunpack.c.h.bf16 %v1725_v36 }
  0x29   : > { %v2351_v52 = vpack.c.bf16 %v464_v39, %v463_v38  ;;  %v466_v58 = vmax.f32 %v434_v44, 0.0  ;;  %v1707_v61 = vunpack.c.l.bf16 %v1726_v41  ;;  %v1708_v62 = vunpack.c.h.bf16 %v1726_v41  ;;  %1736 = vmatprep.subr.bf16.mxu1 %v1961_v50  ;;  %v1718_v44 = vld [vmem:[%s2218_s10 + $0x30] sm:$0xff]  }
  0x2a   : > { %v436_v63 = vadd.f32 %v2249_v24, %v397_v53  ;;  %v398_v0 = vmul.f32 %v1703_v54, %v2234_v14  ;;  %v399_v4 = vmul.f32 %v1704_v55, %v2234_v14  ;;  %v1711_v5 = vunpack.c.l.bf16 %v1727_v49  ;;  %1737 = vmatpush3.bf16.msra.mxu1 %v1962_v6 }
  0x2b   : > { %632 = vmatmul.mubr.bf16.vlgmr.msra.gmra.mrb[0].mxu0 %v475_v59  ;;  %v435_v59 = vadd.f32 %v2249_v24, %v396_v48  ;;  %v2361_v7 = vpack.c.bf16 %v466_v58, %v465_v47  ;;  %v400_v9 = vmul.f32 %v1707_v61, %v2234_v14  ;;  %v401_v10 = vmul.f32 %v1708_v62, %v2234_v14  ;;  %v1719_v61 = vld [vmem:[%s2218_s10 + $0x38] sm:$0xff]   ;;  %s2530_s10 = scalar_lea.vmem [#allocation2], %s1591_s11  }
  0x2c   : > { %641 = vmatprep.mubr.bf16.mxu0 %v2121_v2  ;;  %v468_v13 = vmax.f32 %v436_v63, 0.0  ;;  %v437_v15 = vadd.f32 %v2249_v24, %v398_v0  ;;  %v438_v16 = vadd.f32 %v2249_v24, %v399_v4  ;;  %v1668_v17 = vunpack.c.h.bf16 %v2293_v51  ;;  %1738 = vmatprep.subr.bf16.mxu1 %v1963_v11 }
  0x2d   : > { %v467_v8 = vmax.f32 %v435_v59, 0.0  ;;  %v439_v18 = vadd.f32 %v2249_v24, %v400_v9  ;;  %v440_v19 = vadd.f32 %v2249_v24, %v401_v10  ;;  %v402_v20 = vmul.f32 %v1711_v5, %v2234_v14 }
  0x2e   : > { %v469_v22 = vmax.f32 %v437_v15, 0.0  ;;  %v470_v23 = vmax.f32 %v438_v16, 0.0  ;;  %v477_v26 = vpack.c.bf16 %v448_v1, %v447_v60  ;;  %v449_v45 = vmax.f32 %v2297_v56, 0.0 }
  0x2f   : > { %v2375_v21 = vpack.c.bf16 %v468_v13, %v467_v8  ;;  %v471_v27 = vmax.f32 %v439_v18, 0.0  ;;  %v472_v28 = vmax.f32 %v440_v19, 0.0  ;;  %v441_v29 = vadd.f32 %v2249_v24, %v402_v20  ;;  %v507_v20 = vld [vmem:[%s2735_s4] sm:$0x3] }
  0x30   : > { %v2383_v30 = vpack.c.bf16 %v470_v23, %v469_v22  ;;  %v450_v46 = vmax.f32 %v2300_v57, 0.0  ;;  %v380_v60 = vmul.f32 %v1667_v3, %v2234_v14  ;;  %v381_v1 = vmul.f32 %v1668_v17, %v2234_v14 }
  0x31   : > { %v2386_v32 = vpack.c.bf16 %v472_v28, %v471_v27  ;;  %v473_v33 = vmax.f32 %v441_v29, 0.0  ;;  %v1671_v38 = vunpack.c.l.bf16 %v1717_v35  ;;  %v1672_v41 = vunpack.c.h.bf16 %v1717_v35 }
  0x32   : > { %v478_v39 = vpack.c.bf16 %v450_v46, %v449_v45  ;;  %v419_v40 = vadd.f32 %v2249_v24, %v380_v60  ;;  %v420_v56 = vadd.f32 %v2249_v24, %v381_v1  ;;  %v1675_v47 = vunpack.c.l.bf16 %v1718_v44 }
  0x33   : > { %642 = vmatmul.mubr.bf16.gmra.mrb[4].mxu0 %v476_v12  ;;  %v1712_v12 = vunpack.c.h.bf16 %v1727_v49  ;;  %v382_v3 = vmul.f32 %v1671_v38, %v2234_v14  ;;  %v383_v42 = vmul.f32 %v1672_v41, %v2234_v14  ;;  %v1676_v53 = vunpack.c.h.bf16 %v1718_v44 }
  0x34   : > { %651 = vmatprep.mubr.bf16.mxu0 %v2121_v2  ;;  %v451_v57 = vmax.f32 %v419_v40, 0.0  ;;  %v452_v51 = vmax.f32 %v420_v56, 0.0  ;;  %v384_v58 = vmul.f32 %v1675_v47, %v2234_v14  ;;  %v1679_v62 = vunpack.c.l.bf16 %v1719_v61 }
  0x35   : > { %v403_v25 = vmul.f32 %v1712_v12, %v2234_v14  ;;  %v421_v49 = vadd.f32 %v2249_v24, %v382_v3  ;;  %v422_v50 = vadd.f32 %v2249_v24, %v383_v42  ;;  %v385_v59 = vmul.f32 %v1676_v53, %v2234_v14 }
  0x36   : > { %v479_v48 = vpack.c.bf16 %v452_v51, %v451_v57  ;;  %v423_v0 = vadd.f32 %v2249_v24, %v384_v58  ;;  %v1680_v5 = vunpack.c.h.bf16 %v1719_v61  ;;  %v386_v9 = vmul.f32 %v1679_v62, %v2234_v14 }
  0x37   : > { %v442_v31 = vadd.f32 %v2249_v24, %v403_v25  ;;  %v453_v54 = vmax.f32 %v421_v49, 0.0  ;;  %v454_v55 = vmax.f32 %v422_v50, 0.0  ;;  %v424_v4 = vadd.f32 %v2249_v24, %v385_v59 }
  0x38   : > { %v455_v6 = vmax.f32 %v423_v0, 0.0  ;;  %v387_v10 = vmul.f32 %v1680_v5, %v2234_v14  ;;  %v425_v13 = vadd.f32 %v2249_v24, %v386_v9  ;;  %v1964_v14 = vld [vmem:[%s2736_s5 + $0x28] sm:$0xff]  }
  0x39   : > { %v474_v34 = vmax.f32 %v442_v31, 0.0  ;;  %v480_v63 = vpack.c.bf16 %v454_v55, %v453_v54  ;;  %v456_v8 = vmax.f32 %v424_v4, 0.0  ;;  %1739 = vmatpush3.bf16.msra.mxu1 %v1964_v14 }
  0x3a   : > { %v426_v15 = vadd.f32 %v2249_v24, %v387_v10  ;;  %v457_v16 = vmax.f32 %v425_v13, 0.0  ;;  %v1965_v24 = vld [vmem:[%s2736_s5 + $0x70] sm:$0xff]  }
  0x3b   : > { %652 = vmatmul.mubr.bf16.gmra.mrb[8].mxu0 %v477_v26  ;;  %v2396_v36 = vpack.c.bf16 %v474_v34, %v473_v33  ;;  %v481_v11 = vpack.c.bf16 %v456_v8, %v455_v6  ;;  %1740 = vmatprep.subr.bf16.mxu1 %v1965_v24 }
  0x3c   : > { %661 = vmatprep.mubr.bf16.mxu0 %v2121_v2  ;;  %v458_v12 = vmax.f32 %v426_v15, 0.0 }
  0x3e   : > { %v482_v17 = vpack.c.bf16 %v458_v12, %v457_v16 }
  0x43   : > { %662 = vmatmul.mubr.bf16.gmra.mrb[12].mxu0 %v478_v39 }
  0x44   : > { %671 = vmatprep.mubr.bf16.mxu0 %v2121_v2 }
  0x4b   : > { %672 = vmatmul.mubr.bf16.gmra.mrb[16].mxu0 %v479_v48 }
  0x4c   : > { %681 = vmatprep.mubr.bf16.mxu0 %v2121_v2 }
  0x53   : > { %682 = vmatmul.mubr.bf16.gmra.mrb[20].mxu0 %v480_v63 }
  0x54   : > { %691 = vmatprep.mubr.bf16.mxu0 %v2121_v2 }
  0x5b   : > { %692 = vmatmul.mubr.bf16.gmra.mrb[24].mxu0 %v481_v11 }
  0x5c   : > { %701 = vmatprep.mubr.bf16.mxu0 %v2121_v2 }
  0x63   : > { %702 = vmatmul.mubr.bf16.gmra.mrb[28].mxu0 %v482_v17 }
  0x64   : > { %711 = vmatprep.mubr.bf16.mxu0 %v2121_v2 }
  0x6b   : > { %712 = vmatmul.mubr.bf16.gmra.mrb[32].mxu0 %v2337_v37  ;;  %v1966_v37 = vld [vmem:[%s2736_s5 + $0x30] sm:$0xff]  }
  0x6c   : > { %721 = vmatprep.mubr.bf16.mxu0 %v2121_v2  ;;  %1741 = vmatpush3.bf16.msra.mxu1 %v1966_v37 }
  0x73   : > { %722 = vmatmul.mubr.bf16.gmra.mrb[36].mxu0 %v2343_v43  ;;  %v1967_v43 = vld [vmem:[%s2736_s5 + $0x78] sm:$0xff]  }
  0x74   : > { %731 = vmatprep.mubr.bf16.mxu0 %v2121_v2  ;;  %1742 = vmatprep.subr.bf16.mxu1 %v1967_v43 }
  0x7b   : > { %732 = vmatmul.mubr.bf16.gmra.mrb[40].mxu0 %v2351_v52  ;;  %v1968_v52 = vld [vmem:[%s2736_s5 + $0x38] sm:$0xff]  }
  0x7c   : > { %741 = vmatprep.mubr.bf16.mxu0 %v2121_v2  ;;  %1743 = vmatpush3.bf16.msra.mxu1 %v1968_v52 }
  0x83   : > { %742 = vmatmul.mubr.bf16.gmra.mrb[44].mxu0 %v2361_v7  ;;  %v509_v7 = vlaneseq }
  0x84   : > { %751 = vmatprep.mubr.bf16.mxu0 %v2121_v2 }
  0x85   : > { %v510_v18 = vshrl.u32 %v509_v7, 7 }
  0x87   : > { %v511_v19 = vsub.s32 0, %v510_v18 }
  0x89   : > { %v2452_v22 = vrot.slane %v507_v20, %v511_v19 }
  0x8b   : > { %752 = vmatmul.mubr.bf16.gmra.mrb[48].mxu0 %v2375_v21  ;;  %v515_v21 = vsub.s32 1, %v510_v18 }
  0x8c   : > { %761 = vmatprep.mubr.bf16.mxu0 %v2121_v2 }
  0x8d   : > { %v2454_v23 = vrot.slane %v507_v20, %v515_v21 }
  0x93   : > { %762 = vmatmul.mubr.bf16.gmra.mrb[52].mxu0 %v2383_v30 }
  0x94   : > { %771 = vmatprep.mubr.bf16.mxu0 %v2121_v2 }
  0x9b   : > { %772 = vmatmul.mubr.bf16.gmra.mrb[56].mxu0 %v2386_v32 }
  0x9c   : > { %781 = vmatprep.mubr.bf16.mxu0 %v2121_v2 }
  0xa3   : > { %782 = vmatmul.mubr.bf16.gmra.mrb[60].mxu0 %v2396_v36 }
  0xfe   : > { %v633_v25 = vpop.f32.mrb[0].mxu0 }
  0xff   : > { %v634_v26 = vadd.f32 %v633_v25, %v2452_v22  ;;  %v635_v27 = vpop.f32.mrb[1].mxu0 }
 0x100   : > { %v636_v2 = vadd.f32 %v635_v27, %v2454_v23  ;;  %v637_v28 = vpop.f32.mrb[2].mxu0 }
 0x101   : > { %v638_v29 = vadd.f32 %v637_v28, %v2452_v22  ;;  %v639_v30 = vpop.f32.mrb[3].mxu0  ;;  %v792_v32 = vmax.f32 %v634_v26, 0.0 }
 0x102   : > { %v640_v31 = vadd.f32 %v639_v30, %v2454_v23  ;;  %v793_v34 = vmax.f32 %v636_v2, 0.0 }
 0x103   : > { %v794_v33 = vmax.f32 %v638_v29, 0.0 }
 0x104   : > { %v795_v45 = vmax.f32 %v640_v31, 0.0 }
 0x105   : > { %v856_v46 = vpack.c.bf16 %v794_v33, %v792_v32 }
 0x106   : > { %v643_v60 = vpop.f32.mrb[4].mxu0  ;;  %v857_v1 = vpack.c.bf16 %v795_v45, %v793_v34 }
 0x107   : > { %v644_v35 = vadd.f32 %v643_v60, %v2452_v22  ;;  %v645_v36 = vpop.f32.mrb[5].mxu0 }
 0x108   : > { %v646_v38 = vadd.f32 %v645_v36, %v2454_v23  ;;  %v647_v39 = vpop.f32.mrb[6].mxu0  ;;  %1055 = vmatprep.mubr.bf16.mxu1 %v857_v1 }
 0x109   : > { %v648_v40 = vadd.f32 %v647_v39, %v2452_v22  ;;  %v649_v56 = vpop.f32.mrb[7].mxu0  ;;  %1056 = vmatmul.mubr.bf16.vlgmr.msra.gmra.mrb[0].mxu1 %v856_v46  ;;  %v796_v57 = vmax.f32 %v644_v35, 0.0 }
 0x10a   : > { %v650_v41 = vadd.f32 %v649_v56, %v2454_v23  ;;  %v797_v3 = vmax.f32 %v646_v38, 0.0 }
 0x10b   : > { %v798_v51 = vmax.f32 %v648_v40, 0.0 }
 0x10c   : > { %v799_v42 = vmax.f32 %v650_v41, 0.0 }
 0x10d   : > { %v858_v44 = vpack.c.bf16 %v798_v51, %v796_v57 }
 0x10e   : > { %v859_v47 = vpack.c.bf16 %v799_v42, %v797_v3  ;;  %v653_v48 = vpop.f32.mrb[8].mxu0 }
 0x10f   : > { %v654_v49 = vadd.f32 %v653_v48, %v2452_v22  ;;  %v655_v50 = vpop.f32.mrb[9].mxu0 }
 0x110   : > { %v656_v53 = vadd.f32 %v655_v50, %v2454_v23  ;;  %v657_v54 = vpop.f32.mrb[10].mxu0  ;;  %1063 = vmatprep.mubr.bf16.mxu1 %v859_v47 }
 0x111   : > { %v658_v55 = vadd.f32 %v657_v54, %v2452_v22  ;;  %v659_v58 = vpop.f32.mrb[11].mxu0  ;;  %1064 = vmatmul.mubr.bf16.gmra.mrb[4].mxu1 %v858_v44  ;;  %v800_v61 = vmax.f32 %v654_v49, 0.0 }
 0x112   : > { %v660_v59 = vadd.f32 %v659_v58, %v2454_v23  ;;  %v801_v63 = vmax.f32 %v656_v53, 0.0 }
 0x113   : > { %v802_v62 = vmax.f32 %v658_v55, 0.0 }
 0x114   : > { %v803_v0 = vmax.f32 %v660_v59, 0.0 }
 0x115   : > { %v860_v4 = vpack.c.bf16 %v802_v62, %v800_v61 }
 0x116   : > { %v861_v5 = vpack.c.bf16 %v803_v0, %v801_v63  ;;  %v663_v6 = vpop.f32.mrb[12].mxu0 }
 0x117   : > { %v664_v8 = vadd.f32 %v663_v6, %v2452_v22  ;;  %v665_v9 = vpop.f32.mrb[13].mxu0 }
 0x118   : > { %v666_v10 = vadd.f32 %v665_v9, %v2454_v23  ;;  %v667_v11 = vpop.f32.mrb[14].mxu0  ;;  %1071 = vmatprep.mubr.bf16.mxu1 %v861_v5 }
 0x119   : > { %v668_v13 = vadd.f32 %v667_v11, %v2452_v22  ;;  %v669_v15 = vpop.f32.mrb[15].mxu0  ;;  %1072 = vmatmul.mubr.bf16.gmra.mrb[8].mxu1 %v860_v4  ;;  %v804_v12 = vmax.f32 %v664_v8, 0.0 }
 0x11a   : > { %v670_v16 = vadd.f32 %v669_v15, %v2454_v23  ;;  %v805_v14 = vmax.f32 %v666_v10, 0.0 }
 0x11b   : > { %v806_v17 = vmax.f32 %v668_v13, 0.0 }
 0x11c   : > { %v807_v24 = vmax.f32 %v670_v16, 0.0 }
 0x11d   : > { %v862_v37 = vpack.c.bf16 %v806_v17, %v804_v12 }
 0x11e   : > { %v863_v43 = vpack.c.bf16 %v807_v24, %v805_v14  ;;  %v673_v52 = vpop.f32.mrb[16].mxu0 }
 0x11f   : > { %v674_v7 = vadd.f32 %v673_v52, %v2452_v22  ;;  %v675_v18 = vpop.f32.mrb[17].mxu0 }
 0x120   : > { %v676_v19 = vadd.f32 %v675_v18, %v2454_v23  ;;  %v677_v20 = vpop.f32.mrb[18].mxu0  ;;  %1079 = vmatprep.mubr.bf16.mxu1 %v863_v43 }
 0x121   : > { %v678_v21 = vadd.f32 %v677_v20, %v2452_v22  ;;  %v679_v25 = vpop.f32.mrb[19].mxu0  ;;  %1080 = vmatmul.mubr.bf16.gmra.mrb[12].mxu1 %v862_v37  ;;  %v808_v27 = vmax.f32 %v674_v7, 0.0 }
 0x122   : > { %v680_v26 = vadd.f32 %v679_v25, %v2454_v23  ;;  %v809_v28 = vmax.f32 %v676_v19, 0.0 }
 0x123   : > { %v810_v2 = vmax.f32 %v678_v21, 0.0 }
 0x124   : > { %v811_v29 = vmax.f32 %v680_v26, 0.0 }
 0x125   : > { %v864_v30 = vpack.c.bf16 %v810_v2, %v808_v27 }
 0x126   : > { %v865_v31 = vpack.c.bf16 %v811_v29, %v809_v28  ;;  %v683_v32 = vpop.f32.mrb[20].mxu0 }
 0x127   : > { %v684_v33 = vadd.f32 %v683_v32, %v2452_v22  ;;  %v685_v34 = vpop.f32.mrb[21].mxu0 }
 0x128   : > { %v686_v45 = vadd.f32 %v685_v34, %v2454_v23  ;;  %v687_v46 = vpop.f32.mrb[22].mxu0  ;;  %1087 = vmatprep.mubr.bf16.mxu1 %v865_v31 }
 0x129   : > { %v688_v60 = vadd.f32 %v687_v46, %v2452_v22  ;;  %v689_v1 = vpop.f32.mrb[23].mxu0  ;;  %1088 = vmatmul.mubr.bf16.gmra.mrb[16].mxu1 %v864_v30  ;;  %v812_v36 = vmax.f32 %v684_v33, 0.0 }
 0x12a   : > { %v690_v35 = vadd.f32 %v689_v1, %v2454_v23  ;;  %v813_v39 = vmax.f32 %v686_v45, 0.0 }
 0x12b   : > { %v814_v38 = vmax.f32 %v688_v60, 0.0 }
 0x12c   : > { %v815_v40 = vmax.f32 %v690_v35, 0.0 }
 0x12d   : > { %v866_v56 = vpack.c.bf16 %v814_v38, %v812_v36 }
 0x12e   : > { %v867_v41 = vpack.c.bf16 %v815_v40, %v813_v39  ;;  %v693_v57 = vpop.f32.mrb[24].mxu0 }
 0x12f   : > { %v694_v51 = vadd.f32 %v693_v57, %v2452_v22  ;;  %v695_v3 = vpop.f32.mrb[25].mxu0 }
 0x130   : > { %v696_v42 = vadd.f32 %v695_v3, %v2454_v23  ;;  %v697_v44 = vpop.f32.mrb[26].mxu0  ;;  %1095 = vmatprep.mubr.bf16.mxu1 %v867_v41 }
 0x131   : > { %v698_v47 = vadd.f32 %v697_v44, %v2452_v22  ;;  %v699_v48 = vpop.f32.mrb[27].mxu0  ;;  %1096 = vmatmul.mubr.bf16.gmra.mrb[20].mxu1 %v866_v56  ;;  %v816_v50 = vmax.f32 %v694_v51, 0.0 }
 0x132   : > { %v700_v49 = vadd.f32 %v699_v48, %v2454_v23  ;;  %v817_v54 = vmax.f32 %v696_v42, 0.0 }
 0x133   : > { %v818_v53 = vmax.f32 %v698_v47, 0.0 }
 0x134   : > { %v819_v55 = vmax.f32 %v700_v49, 0.0 }
 0x135   : > { %v868_v58 = vpack.c.bf16 %v818_v53, %v816_v50 }
 0x136   : > { %v869_v59 = vpack.c.bf16 %v819_v55, %v817_v54  ;;  %v703_v61 = vpop.f32.mrb[28].mxu0 }
 0x137   : > { %v704_v62 = vadd.f32 %v703_v61, %v2452_v22  ;;  %v705_v63 = vpop.f32.mrb[29].mxu0 }
 0x138   : > { %v706_v0 = vadd.f32 %v705_v63, %v2454_v23  ;;  %v707_v4 = vpop.f32.mrb[30].mxu0  ;;  %1103 = vmatprep.mubr.bf16.mxu1 %v869_v59 }
 0x139   : > { %v708_v5 = vadd.f32 %v707_v4, %v2452_v22  ;;  %v709_v6 = vpop.f32.mrb[31].mxu0  ;;  %1104 = vmatmul.mubr.bf16.gmra.mrb[24].mxu1 %v868_v58  ;;  %v820_v9 = vmax.f32 %v704_v62, 0.0 }
 0x13a   : > { %v710_v8 = vadd.f32 %v709_v6, %v2454_v23  ;;  %v821_v11 = vmax.f32 %v706_v0, 0.0 }
 0x13b   : > { %v822_v10 = vmax.f32 %v708_v5, 0.0 }
 0x13c   : > { %v823_v13 = vmax.f32 %v710_v8, 0.0 }
 0x13d   : > { %v870_v15 = vpack.c.bf16 %v822_v10, %v820_v9 }
 0x13e   : > { %v871_v16 = vpack.c.bf16 %v823_v13, %v821_v11  ;;  %v713_v12 = vpop.f32.mrb[32].mxu0 }
 0x13f   : > { %v714_v17 = vadd.f32 %v713_v12, %v2452_v22  ;;  %v715_v14 = vpop.f32.mrb[33].mxu0 }
 0x140   : > { %v716_v24 = vadd.f32 %v715_v14, %v2454_v23  ;;  %v717_v37 = vpop.f32.mrb[34].mxu0  ;;  %1111 = vmatprep.mubr.bf16.mxu1 %v871_v16 }
 0x141   : > { %v718_v43 = vadd.f32 %v717_v37, %v2452_v22  ;;  %v719_v52 = vpop.f32.mrb[35].mxu0  ;;  %1112 = vmatmul.mubr.bf16.gmra.mrb[28].mxu1 %v870_v15  ;;  %v824_v18 = vmax.f32 %v714_v17, 0.0 }
 0x142   : > { %v720_v7 = vadd.f32 %v719_v52, %v2454_v23  ;;  %v825_v20 = vmax.f32 %v716_v24, 0.0 }
 0x143   : > { %v826_v19 = vmax.f32 %v718_v43, 0.0 }
 0x144   : > { %v827_v21 = vmax.f32 %v720_v7, 0.0 }
 0x145   : > { %v872_v25 = vpack.c.bf16 %v826_v19, %v824_v18 }
 0x146   : > { %v873_v26 = vpack.c.bf16 %v827_v21, %v825_v20  ;;  %v723_v27 = vpop.f32.mrb[36].mxu0 }
 0x147   : > { %v724_v2 = vadd.f32 %v723_v27, %v2452_v22  ;;  %v725_v28 = vpop.f32.mrb[37].mxu0 }
 0x148   : > { %v726_v29 = vadd.f32 %v725_v28, %v2454_v23  ;;  %v727_v30 = vpop.f32.mrb[38].mxu0  ;;  %1119 = vmatprep.mubr.bf16.mxu1 %v873_v26 }
 0x149   : > { %v728_v31 = vadd.f32 %v727_v30, %v2452_v22  ;;  %v729_v32 = vpop.f32.mrb[39].mxu0  ;;  %1120 = vmatmul.mubr.bf16.gmra.mrb[32].mxu1 %v872_v25  ;;  %v828_v34 = vmax.f32 %v724_v2, 0.0 }
 0x14a   : > { %v730_v33 = vadd.f32 %v729_v32, %v2454_v23  ;;  %v829_v46 = vmax.f32 %v726_v29, 0.0 }
 0x14b   : > { %v830_v45 = vmax.f32 %v728_v31, 0.0 }
 0x14c   : > { %v831_v60 = vmax.f32 %v730_v33, 0.0 }
 0x14d   : > { %v874_v1 = vpack.c.bf16 %v830_v45, %v828_v34 }
 0x14e   : > { %v875_v35 = vpack.c.bf16 %v831_v60, %v829_v46  ;;  %v733_v36 = vpop.f32.mrb[40].mxu0 }
 0x14f   : > { %v734_v38 = vadd.f32 %v733_v36, %v2452_v22  ;;  %v735_v39 = vpop.f32.mrb[41].mxu0 }
 0x150   : > { %v736_v40 = vadd.f32 %v735_v39, %v2454_v23  ;;  %v737_v56 = vpop.f32.mrb[42].mxu0  ;;  %1127 = vmatprep.mubr.bf16.mxu1 %v875_v35 }
 0x151   : > { %v738_v41 = vadd.f32 %v737_v56, %v2452_v22  ;;  %v739_v57 = vpop.f32.mrb[43].mxu0  ;;  %1128 = vmatmul.mubr.bf16.gmra.mrb[36].mxu1 %v874_v1  ;;  %v832_v3 = vmax.f32 %v734_v38, 0.0 }
 0x152   : > { %v740_v51 = vadd.f32 %v739_v57, %v2454_v23  ;;  %v833_v44 = vmax.f32 %v736_v40, 0.0 }
 0x153   : > { %v834_v42 = vmax.f32 %v738_v41, 0.0 }
 0x154   : > { %v835_v47 = vmax.f32 %v740_v51, 0.0 }
 0x155   : > { %v876_v48 = vpack.c.bf16 %v834_v42, %v832_v3 }
 0x156   : > { %v877_v49 = vpack.c.bf16 %v835_v47, %v833_v44  ;;  %v743_v50 = vpop.f32.mrb[44].mxu0 }
 0x157   : > { %v744_v53 = vadd.f32 %v743_v50, %v2452_v22  ;;  %v745_v54 = vpop.f32.mrb[45].mxu0 }
 0x158   : > { %v746_v55 = vadd.f32 %v745_v54, %v2454_v23  ;;  %v747_v58 = vpop.f32.mrb[46].mxu0  ;;  %1135 = vmatprep.mubr.bf16.mxu1 %v877_v49 }
 0x159   : > { %v748_v59 = vadd.f32 %v747_v58, %v2452_v22  ;;  %v749_v61 = vpop.f32.mrb[47].mxu0  ;;  %1136 = vmatmul.mubr.bf16.gmra.mrb[40].mxu1 %v876_v48  ;;  %v836_v63 = vmax.f32 %v744_v53, 0.0 }
 0x15a   : > { %v750_v62 = vadd.f32 %v749_v61, %v2454_v23  ;;  %v837_v4 = vmax.f32 %v746_v55, 0.0 }
 0x15b   : > { %v838_v0 = vmax.f32 %v748_v59, 0.0 }
 0x15c   : > { %v839_v5 = vmax.f32 %v750_v62, 0.0 }
 0x15d   : > { %v878_v6 = vpack.c.bf16 %v838_v0, %v836_v63  ;;  %v2523_v0 = vld [vmem:[%s2737_s6] ss:$0 sm:$0xff] }
 0x15e   : > { %v879_v8 = vpack.c.bf16 %v839_v5, %v837_v4  ;;  %v753_v9 = vpop.f32.mrb[48].mxu0 }
 0x15f   : > { %v754_v10 = vadd.f32 %v753_v9, %v2452_v22  ;;  %v755_v11 = vpop.f32.mrb[49].mxu0 }
 0x160   : > { %v756_v13 = vadd.f32 %v755_v11, %v2454_v23  ;;  %v757_v15 = vpop.f32.mrb[50].mxu0  ;;  %1143 = vmatprep.mubr.bf16.mxu1 %v879_v8 }
 0x161   : > { %v758_v16 = vadd.f32 %v757_v15, %v2452_v22  ;;  %v759_v12 = vpop.f32.mrb[51].mxu0  ;;  %1144 = vmatmul.mubr.bf16.gmra.mrb[44].mxu1 %v878_v6  ;;  %v840_v14 = vmax.f32 %v754_v10, 0.0 }
 0x162   : > { %v760_v17 = vadd.f32 %v759_v12, %v2454_v23  ;;  %v841_v37 = vmax.f32 %v756_v13, 0.0 }
 0x163   : > { %v842_v24 = vmax.f32 %v758_v16, 0.0 }
 0x164   : > { %v843_v43 = vmax.f32 %v760_v17, 0.0 }
 0x165   : > { %v880_v52 = vpack.c.bf16 %v842_v24, %v840_v14 }
 0x166   : > { %v881_v7 = vpack.c.bf16 %v843_v43, %v841_v37  ;;  %v763_v18 = vpop.f32.mrb[52].mxu0 }
 0x167   : > { %v764_v19 = vadd.f32 %v763_v18, %v2452_v22  ;;  %v765_v20 = vpop.f32.mrb[53].mxu0 }
 0x168   : > { %v766_v21 = vadd.f32 %v765_v20, %v2454_v23  ;;  %v767_v25 = vpop.f32.mrb[54].mxu0  ;;  %1151 = vmatprep.mubr.bf16.mxu1 %v881_v7 }
 0x169   : > { %v768_v26 = vadd.f32 %v767_v25, %v2452_v22  ;;  %v769_v27 = vpop.f32.mrb[55].mxu0  ;;  %1152 = vmatmul.mubr.bf16.gmra.mrb[48].mxu1 %v880_v52  ;;  %v844_v28 = vmax.f32 %v764_v19, 0.0 }
 0x16a   : > { %v770_v2 = vadd.f32 %v769_v27, %v2454_v23  ;;  %v845_v30 = vmax.f32 %v766_v21, 0.0 }
 0x16b   : > { %v846_v29 = vmax.f32 %v768_v26, 0.0 }
 0x16c   : > { %v847_v31 = vmax.f32 %v770_v2, 0.0 }
 0x16d   : > { %v882_v32 = vpack.c.bf16 %v846_v29, %v844_v28 }
 0x16e   : > { %v883_v33 = vpack.c.bf16 %v847_v31, %v845_v30  ;;  %v773_v34 = vpop.f32.mrb[56].mxu0 }
 0x16f   : > { %v774_v45 = vadd.f32 %v773_v34, %v2452_v22  ;;  %v775_v46 = vpop.f32.mrb[57].mxu0 }
 0x170   : > { %v776_v60 = vadd.f32 %v775_v46, %v2454_v23  ;;  %v777_v1 = vpop.f32.mrb[58].mxu0  ;;  %1159 = vmatprep.mubr.bf16.mxu1 %v883_v33 }
 0x171   : > { %v778_v35 = vadd.f32 %v777_v1, %v2452_v22  ;;  %v779_v36 = vpop.f32.mrb[59].mxu0  ;;  %1160 = vmatmul.mubr.bf16.gmra.mrb[52].mxu1 %v882_v32  ;;  %v848_v39 = vmax.f32 %v774_v45, 0.0 }
 0x172   : > { %v780_v38 = vadd.f32 %v779_v36, %v2454_v23  ;;  %v849_v56 = vmax.f32 %v776_v60, 0.0 }
 0x173   : > { %v850_v40 = vmax.f32 %v778_v35, 0.0 }
 0x174   : > { %v851_v41 = vmax.f32 %v780_v38, 0.0 }
 0x175   : > { %v884_v57 = vpack.c.bf16 %v850_v40, %v848_v39 }
 0x176   : > { %v885_v51 = vpack.c.bf16 %v851_v41, %v849_v56  ;;  %v783_v3 = vpop.f32.mrb[60].mxu0 }
 0x177   : > { %v784_v42 = vadd.f32 %v783_v3, %v2452_v22  ;;  %v785_v44 = vpop.f32.mrb[61].mxu0 }
 0x178   : > { %v786_v47 = vadd.f32 %v785_v44, %v2454_v23  ;;  %v787_v48 = vpop.f32.mrb[62].mxu0  ;;  %1167 = vmatprep.mubr.bf16.mxu1 %v885_v51 }
 0x179   : > { %v788_v49 = vadd.f32 %v787_v48, %v2452_v22  ;;  %v789_v50 = vpop.f32.mrb[63].mxu0  ;;  %1168 = vmatmul.mubr.bf16.gmra.mrb[56].mxu1 %v884_v57  ;;  %v852_v54 = vmax.f32 %v784_v42, 0.0 }
 0x17a   : > { %v790_v53 = vadd.f32 %v789_v50, %v2454_v23  ;;  %v853_v58 = vmax.f32 %v786_v47, 0.0 }
 0x17b   : > { %v854_v55 = vmax.f32 %v788_v49, 0.0 }
 0x17c   : > { %v855_v59 = vmax.f32 %v790_v53, 0.0 }
 0x17d   : > { %v886_v61 = vpack.c.bf16 %v854_v55, %v852_v54 }
 0x17e   : > { %v887_v62 = vpack.c.bf16 %v855_v59, %v853_v58 }
 0x180   : > { %1175 = vmatprep.mubr.bf16.mxu1 %v887_v62 }
 0x181   : > { %1176 = vmatmul.mubr.bf16.gmra.mrb[60].mxu1 %v886_v61 }
 0x1dc   : > { %v1744_v63 = vpop.f32.mrb[0].mxu1 }
 0x1dd   : > { %v1745_v22 = vpop.f32.mrb[1].mxu1 }
 0x1de   : > { %v1746_v4 = vadd.f32 %v1745_v22, %v1744_v63  ;;  %v1747_v5 = vpop.f32.mrb[2].mxu1 }
 0x1df   : > { %v1748_v6 = vpop.f32.mrb[3].mxu1 }
 0x1e0   : > { %v1058_v23 = vadd.f32 %v1746_v4, %v2523_v0  ;;  %v1749_v8 = vadd.f32 %v1748_v6, %v1747_v5 }
 0x1e2   : > { %1969 = vtanh.f32 %v1058_v23  ;;  %v1061_v9 = vadd.f32 %v1749_v8, %v2523_v0 }
 0x1e4   : > { %1971 = vtanh.f32 %v1061_v9  ;;  %v1750_v10 = vpop.f32.mrb[4].mxu1 }
 0x1e5   : > { %v1751_v11 = vpop.f32.mrb[5].mxu1 }
 0x1e6   : > { %v1752_v13 = vadd.f32 %v1751_v11, %v1750_v10  ;;  %v1753_v15 = vpop.f32.mrb[6].mxu1 }
 0x1e7   : > { %v1754_v16 = vpop.f32.mrb[7].mxu1 }
 0x1e8   : > { %v1066_v12 = vadd.f32 %v1752_v13, %v2523_v0  ;;  %v1755_v17 = vadd.f32 %v1754_v16, %v1753_v15 }
 0x1ea   : > { %1973 = vtanh.f32 %v1066_v12  ;;  %v1069_v14 = vadd.f32 %v1755_v17, %v2523_v0 }
 0x1ec   : > { %v1970_v24 = vpop.eup %1969  ;;  %1975 = vtanh.f32 %v1069_v14  ;;  %v1756_v37 = vpop.f32.mrb[8].mxu1 }
 0x1ed   : > { %1216 = vst [vmem:[%s2530_s10] sm:$0xff] %v1970_v24  ;;  %v1757_v43 = vpop.f32.mrb[9].mxu1 }
 0x1ee   : > { %v1972_v52 = vpop.eup %1971  ;;  %v1758_v7 = vadd.f32 %v1757_v43, %v1756_v37  ;;  %v1759_v18 = vpop.f32.mrb[10].mxu1 }
 0x1ef   : > { %1217 = vst [vmem:[%s2530_s10 + $0x8] sm:$0xff] %v1972_v52  ;;  %v1760_v19 = vpop.f32.mrb[11].mxu1 }
 0x1f0   : > { %v1074_v20 = vadd.f32 %v1758_v7, %v2523_v0  ;;  %v1761_v21 = vadd.f32 %v1760_v19, %v1759_v18 }
 0x1f2   : > { %1977 = vtanh.f32 %v1074_v20  ;;  %v1077_v25 = vadd.f32 %v1761_v21, %v2523_v0 }
 0x1f4   : > { %v1974_v26 = vpop.eup %1973  ;;  %1979 = vtanh.f32 %v1077_v25  ;;  %v1762_v27 = vpop.f32.mrb[12].mxu1 }
 0x1f5   : > { %1218 = vst [vmem:[%s2530_s10 + $0x10] sm:$0xff] %v1974_v26  ;;  %v1763_v2 = vpop.f32.mrb[13].mxu1 }
 0x1f6   : > { %v1976_v28 = vpop.eup %1975  ;;  %v1764_v29 = vadd.f32 %v1763_v2, %v1762_v27  ;;  %v1765_v30 = vpop.f32.mrb[14].mxu1 }
 0x1f7   : > { %1219 = vst [vmem:[%s2530_s10 + $0x18] sm:$0xff] %v1976_v28  ;;  %v1766_v31 = vpop.f32.mrb[15].mxu1 }
 0x1f8   : > { %v1082_v32 = vadd.f32 %v1764_v29, %v2523_v0  ;;  %v1767_v33 = vadd.f32 %v1766_v31, %v1765_v30 }
 0x1fa   : > { %1981 = vtanh.f32 %v1082_v32  ;;  %v1085_v34 = vadd.f32 %v1767_v33, %v2523_v0 }
 0x1fc   : > { %v1978_v45 = vpop.eup %1977  ;;  %1983 = vtanh.f32 %v1085_v34  ;;  %v1768_v46 = vpop.f32.mrb[16].mxu1 }
 0x1fd   : > { %1220 = vst [vmem:[%s2530_s10 + $0x20] sm:$0xff] %v1978_v45  ;;  %v1769_v60 = vpop.f32.mrb[17].mxu1 }
 0x1fe   : > { %v1980_v1 = vpop.eup %1979  ;;  %v1770_v35 = vadd.f32 %v1769_v60, %v1768_v46  ;;  %v1771_v36 = vpop.f32.mrb[18].mxu1 }
 0x1ff   : > { %1221 = vst [vmem:[%s2530_s10 + $0x28] sm:$0xff] %v1980_v1  ;;  %v1772_v38 = vpop.f32.mrb[19].mxu1 }
 0x200   : > { %v1090_v39 = vadd.f32 %v1770_v35, %v2523_v0  ;;  %v1773_v40 = vadd.f32 %v1772_v38, %v1771_v36 }
 0x202   : > { %1985 = vtanh.f32 %v1090_v39  ;;  %v1093_v56 = vadd.f32 %v1773_v40, %v2523_v0 }
 0x204   : > { %v1982_v41 = vpop.eup %1981  ;;  %1987 = vtanh.f32 %v1093_v56  ;;  %v1774_v57 = vpop.f32.mrb[20].mxu1 }
 0x205   : > { %1222 = vst [vmem:[%s2530_s10 + $0x30] sm:$0xff] %v1982_v41  ;;  %v1775_v51 = vpop.f32.mrb[21].mxu1 }
 0x206   : > { %v1984_v3 = vpop.eup %1983  ;;  %v1776_v42 = vadd.f32 %v1775_v51, %v1774_v57  ;;  %v1777_v44 = vpop.f32.mrb[22].mxu1 }
 0x207   : > { %1223 = vst [vmem:[%s2530_s10 + $0x38] sm:$0xff] %v1984_v3  ;;  %v1778_v47 = vpop.f32.mrb[23].mxu1 }
 0x208   : > { %v1098_v48 = vadd.f32 %v1776_v42, %v2523_v0  ;;  %v1779_v49 = vadd.f32 %v1778_v47, %v1777_v44 }
 0x20a   : > { %1989 = vtanh.f32 %v1098_v48  ;;  %v1101_v50 = vadd.f32 %v1779_v49, %v2523_v0 }
 0x20c   : > { %v1986_v53 = vpop.eup %1985  ;;  %1991 = vtanh.f32 %v1101_v50  ;;  %v1780_v54 = vpop.f32.mrb[24].mxu1 }
 0x20d   : > { %1224 = vst [vmem:[%s2530_s10 + $0x40] sm:$0xff] %v1986_v53  ;;  %v1781_v55 = vpop.f32.mrb[25].mxu1 }
 0x20e   : > { %v1988_v58 = vpop.eup %1987  ;;  %v1782_v59 = vadd.f32 %v1781_v55, %v1780_v54  ;;  %v1783_v61 = vpop.f32.mrb[26].mxu1 }
 0x20f   : > { %1225 = vst [vmem:[%s2530_s10 + $0x48] sm:$0xff] %v1988_v58  ;;  %v1784_v62 = vpop.f32.mrb[27].mxu1 }
 0x210   : > { %v1106_v63 = vadd.f32 %v1782_v59, %v2523_v0  ;;  %v1785_v22 = vadd.f32 %v1784_v62, %v1783_v61 }
 0x212   : > { %1993 = vtanh.f32 %v1106_v63  ;;  %v1109_v4 = vadd.f32 %v1785_v22, %v2523_v0 }
 0x214   : > { %v1990_v5 = vpop.eup %1989  ;;  %1995 = vtanh.f32 %v1109_v4  ;;  %v1786_v6 = vpop.f32.mrb[28].mxu1 }
 0x215   : > { %1226 = vst [vmem:[%s2530_s10 + $0x50] sm:$0xff] %v1990_v5  ;;  %v1787_v23 = vpop.f32.mrb[29].mxu1 }
 0x216   : > { %v1992_v8 = vpop.eup %1991  ;;  %v1788_v9 = vadd.f32 %v1787_v23, %v1786_v6  ;;  %v1789_v10 = vpop.f32.mrb[30].mxu1 }
 0x217   : > { %1227 = vst [vmem:[%s2530_s10 + $0x58] sm:$0xff] %v1992_v8  ;;  %v1790_v11 = vpop.f32.mrb[31].mxu1 }
 0x218   : > { %v1114_v13 = vadd.f32 %v1788_v9, %v2523_v0  ;;  %v1791_v15 = vadd.f32 %v1790_v11, %v1789_v10 }
 0x21a   : > { %1997 = vtanh.f32 %v1114_v13  ;;  %v1117_v16 = vadd.f32 %v1791_v15, %v2523_v0 }
 0x21c   : > { %v1994_v12 = vpop.eup %1993  ;;  %1999 = vtanh.f32 %v1117_v16  ;;  %v1792_v17 = vpop.f32.mrb[32].mxu1 }
 0x21d   : > { %1228 = vst [vmem:[%s2530_s10 + $0x60] sm:$0xff] %v1994_v12  ;;  %v1793_v14 = vpop.f32.mrb[33].mxu1 }
 0x21e   : > { %v1996_v24 = vpop.eup %1995  ;;  %v1794_v37 = vadd.f32 %v1793_v14, %v1792_v17  ;;  %v1795_v43 = vpop.f32.mrb[34].mxu1 }
 0x21f   : > { %1229 = vst [vmem:[%s2530_s10 + $0x68] sm:$0xff] %v1996_v24  ;;  %v1796_v52 = vpop.f32.mrb[35].mxu1 }
 0x220   : > { %v1122_v7 = vadd.f32 %v1794_v37, %v2523_v0  ;;  %v1797_v18 = vadd.f32 %v1796_v52, %v1795_v43 }
 0x222   : > { %2001 = vtanh.f32 %v1122_v7  ;;  %v1125_v19 = vadd.f32 %v1797_v18, %v2523_v0 }
 0x224   : > { %v1998_v20 = vpop.eup %1997  ;;  %2003 = vtanh.f32 %v1125_v19  ;;  %v1798_v21 = vpop.f32.mrb[36].mxu1 }
 0x225   : > { %1230 = vst [vmem:[%s2530_s10 + $0x70] sm:$0xff] %v1998_v20  ;;  %v1799_v25 = vpop.f32.mrb[37].mxu1 }
 0x226   : > { %v2000_v26 = vpop.eup %1999  ;;  %v1800_v27 = vadd.f32 %v1799_v25, %v1798_v21  ;;  %v1801_v2 = vpop.f32.mrb[38].mxu1 }
 0x227   : > { %1231 = vst [vmem:[%s2530_s10 + $0x78] sm:$0xff] %v2000_v26  ;;  %v1802_v28 = vpop.f32.mrb[39].mxu1 }
 0x228   : > { %v1130_v29 = vadd.f32 %v1800_v27, %v2523_v0  ;;  %v1803_v30 = vadd.f32 %v1802_v28, %v1801_v2 }
 0x22a   : > { %2005 = vtanh.f32 %v1130_v29  ;;  %v1133_v31 = vadd.f32 %v1803_v30, %v2523_v0 }
 0x22c   : > { %v2002_v32 = vpop.eup %2001  ;;  %2007 = vtanh.f32 %v1133_v31  ;;  %v1804_v33 = vpop.f32.mrb[40].mxu1 }
 0x22d   : > { %1232 = vst [vmem:[%s2530_s10 + $0x80] sm:$0xff] %v2002_v32  ;;  %v1805_v34 = vpop.f32.mrb[41].mxu1 }
 0x22e   : > { %v2004_v45 = vpop.eup %2003  ;;  %v1806_v46 = vadd.f32 %v1805_v34, %v1804_v33  ;;  %v1807_v60 = vpop.f32.mrb[42].mxu1 }
 0x22f   : > { %1233 = vst [vmem:[%s2530_s10 + $0x88] sm:$0xff] %v2004_v45  ;;  %v1808_v1 = vpop.f32.mrb[43].mxu1 }
 0x230   : > { %v1138_v35 = vadd.f32 %v1806_v46, %v2523_v0  ;;  %v1809_v36 = vadd.f32 %v1808_v1, %v1807_v60 }
 0x232   : > { %2009 = vtanh.f32 %v1138_v35  ;;  %v1141_v38 = vadd.f32 %v1809_v36, %v2523_v0 }
 0x234   : > { %v2006_v39 = vpop.eup %2005  ;;  %2011 = vtanh.f32 %v1141_v38  ;;  %v1810_v40 = vpop.f32.mrb[44].mxu1 }
 0x235   : > { %1234 = vst [vmem:[%s2530_s10 + $0x90] sm:$0xff] %v2006_v39  ;;  %v1811_v56 = vpop.f32.mrb[45].mxu1 }
 0x236   : > { %v2008_v41 = vpop.eup %2007  ;;  %v1812_v57 = vadd.f32 %v1811_v56, %v1810_v40  ;;  %v1813_v51 = vpop.f32.mrb[46].mxu1 }
 0x237   : > { %1235 = vst [vmem:[%s2530_s10 + $0x98] sm:$0xff] %v2008_v41  ;;  %v1814_v3 = vpop.f32.mrb[47].mxu1 }
 0x238   : > { %v1146_v42 = vadd.f32 %v1812_v57, %v2523_v0  ;;  %v1815_v44 = vadd.f32 %v1814_v3, %v1813_v51 }
 0x23a   : > { %2013 = vtanh.f32 %v1146_v42  ;;  %v1149_v47 = vadd.f32 %v1815_v44, %v2523_v0 }
 0x23c   : > { %v2010_v48 = vpop.eup %2009  ;;  %2015 = vtanh.f32 %v1149_v47  ;;  %v1816_v49 = vpop.f32.mrb[48].mxu1 }
 0x23d   : > { %1236 = vst [vmem:[%s2530_s10 + $0xa0] sm:$0xff] %v2010_v48  ;;  %v1817_v50 = vpop.f32.mrb[49].mxu1 }
 0x23e   : > { %v2012_v53 = vpop.eup %2011  ;;  %v1818_v54 = vadd.f32 %v1817_v50, %v1816_v49  ;;  %v1819_v55 = vpop.f32.mrb[50].mxu1 }
 0x23f   : > { %1237 = vst [vmem:[%s2530_s10 + $0xa8] sm:$0xff] %v2012_v53  ;;  %v1820_v58 = vpop.f32.mrb[51].mxu1 }
 0x240   : > { %v1154_v59 = vadd.f32 %v1818_v54, %v2523_v0  ;;  %v1821_v61 = vadd.f32 %v1820_v58, %v1819_v55 }
 0x242   : > { %2017 = vtanh.f32 %v1154_v59  ;;  %v1157_v62 = vadd.f32 %v1821_v61, %v2523_v0 }
 0x244   : > { %v2014_v63 = vpop.eup %2013  ;;  %2019 = vtanh.f32 %v1157_v62  ;;  %v1822_v22 = vpop.f32.mrb[52].mxu1 }
 0x245   : > { %1238 = vst [vmem:[%s2530_s10 + $0xb0] sm:$0xff] %v2014_v63  ;;  %v1823_v4 = vpop.f32.mrb[53].mxu1 }
 0x246   : > { %v2016_v5 = vpop.eup %2015  ;;  %v1824_v6 = vadd.f32 %v1823_v4, %v1822_v22  ;;  %v1825_v23 = vpop.f32.mrb[54].mxu1 }
 0x247   : > { %1239 = vst [vmem:[%s2530_s10 + $0xb8] sm:$0xff] %v2016_v5  ;;  %v1826_v8 = vpop.f32.mrb[55].mxu1 }
 0x248   : > { %v1162_v9 = vadd.f32 %v1824_v6, %v2523_v0  ;;  %v1827_v10 = vadd.f32 %v1826_v8, %v1825_v23 }
 0x24a   : > { %2021 = vtanh.f32 %v1162_v9  ;;  %v1165_v11 = vadd.f32 %v1827_v10, %v2523_v0 }
 0x24c   : > { %v2018_v13 = vpop.eup %2017  ;;  %2023 = vtanh.f32 %v1165_v11  ;;  %v1828_v15 = vpop.f32.mrb[56].mxu1 }
 0x24d   : > { %1240 = vst [vmem:[%s2530_s10 + $0xc0] sm:$0xff] %v2018_v13  ;;  %v1829_v16 = vpop.f32.mrb[57].mxu1 }
 0x24e   : > { %v2020_v12 = vpop.eup %2019  ;;  %v1830_v17 = vadd.f32 %v1829_v16, %v1828_v15  ;;  %v1831_v14 = vpop.f32.mrb[58].mxu1 }
 0x24f   : > { %1241 = vst [vmem:[%s2530_s10 + $0xc8] sm:$0xff] %v2020_v12  ;;  %v1832_v24 = vpop.f32.mrb[59].mxu1 }
 0x250   : > { %v1170_v37 = vadd.f32 %v1830_v17, %v2523_v0  ;;  %v1833_v43 = vadd.f32 %v1832_v24, %v1831_v14 }
 0x252   : > { %2025 = vtanh.f32 %v1170_v37  ;;  %v1173_v52 = vadd.f32 %v1833_v43, %v2523_v0 }
 0x254   : > { %v2022_v7 = vpop.eup %2021  ;;  %2027 = vtanh.f32 %v1173_v52  ;;  %v1834_v18 = vpop.f32.mrb[60].mxu1 }
 0x255   : > { %1242 = vst [vmem:[%s2530_s10 + $0xd0] sm:$0xff] %v2022_v7  ;;  %v1835_v19 = vpop.f32.mrb[61].mxu1 }
 0x256   : > { %v2024_v20 = vpop.eup %2023  ;;  %v1836_v21 = vadd.f32 %v1835_v19, %v1834_v18  ;;  %v1837_v25 = vpop.f32.mrb[62].mxu1 }
 0x257   : > { %1243 = vst [vmem:[%s2530_s10 + $0xd8] sm:$0xff] %v2024_v20  ;;  %v1838_v26 = vpop.f32.mrb[63].mxu1 }
 0x258   : > { %v1178_v27 = vadd.f32 %v1836_v21, %v2523_v0  ;;  %v1839_v2 = vadd.f32 %v1838_v26, %v1837_v25 }
 0x25a   : > { %2029 = vtanh.f32 %v1178_v27  ;;  %v1181_v28 = vadd.f32 %v1839_v2, %v2523_v0 }
 0x25c   : > { %v2026_v29 = vpop.eup %2025  ;;  %2031 = vtanh.f32 %v1181_v28 }
 0x25d   : > { %1244 = vst [vmem:[%s2530_s10 + $0xe0] sm:$0xff] %v2026_v29 }
 0x25e   : > { %v2028_v30 = vpop.eup %2027 }
 0x25f   : > { %1245 = vst [vmem:[%s2530_s10 + $0xe8] sm:$0xff] %v2028_v30 }
 0x261   : > { %1254 = sbr.rel (!%p2187_p4) target bundleno = 672 (0x2a0), region = 52 }
 0x264   : > { %v2030_v31 = vpop.eup %2029 }
 0x265   : > { %1246 = vst [vmem:[%s2530_s10 + $0xf0] sm:$0xff] %v2030_v31 }
 0x266   : > { %v2032_v32 = vpop.eup %2031 }
 0x267   : > { %1247 = vst [vmem:[%s2530_s10 + $0xf8] sm:$0xff] %v2032_v32 }
 0x268   : > { %s2749_s24 = smov (!%p1257_p8, %s1256_s24), 32 }
 0x269   : > { %s1631_s17 = sshll.u32 %s2749_s24, 7 }
 0x26a   : > { %p1634_p9 = scmp.eq.s32.totalorder %s1631_s17, 0 }
 0x26b   : > { %s2605_s18 = sshrl.u32 (!%p1634_p9), %s2749_s24, 5 }
 0x26c   : > { %1265 = sbr.rel (%p1634_p9) target bundleno = 672 (0x2a0), region = 56  ;;  %p1635_p10 = scmp.le.s32.totalorder (!%p1634_p9), %s2605_s18, 0 }
 0x273   : > { %1543 = sbr.rel (%p1635_p10) target bundleno = 651 (0x28b), region = 132  ;;  %s2740_s27 = smov (!%p1635_p10), %s2599_s16 }
 0x274   : > { %s2741_s9 = smov (!%p1635_p10), %s2530_s10  ;;  %s2614_s12 = smov (!%p1635_p10), 0  }
 0x275   : > { %s2616_s19 = smov (!%p1635_p10), 0  }
 0x27a LB: >> { %v1389_v0 = vld [vmem:[%s2095_s9] sm:$0xff]  ;;  %v1391_v33 = vld [vmem:[%s2095_s9 + $0x8] sm:$0xff]  ;;  %v1393_v34 = vld [vmem:[%s2095_s9 + $0x10] sm:$0xff]  ;;  %s1453_s20 = sadd.s32 1, %s2099_s12  ;;  %s1383_s19 = sadd.s32 1, %s2103_s19   ;;  %s2103_s19 = sphi %s2616_s19, %s1383_s19   ;;  %s2099_s12 = sphi %s2614_s12, %s2744_s12   ;;  %s2095_s9 = sphi %s2741_s9, %s2743_s9   ;;  %s2091_s27 = sphi %s2740_s27, %s2742_s27  }
 0x27b   : >> { %1390 = vst [vmem:[%s2091_s27] sm:$0xff] %v1389_v0  ;;  %1392 = vst [vmem:[%s2091_s27 + $0x8] sm:$0xff] %v1391_v33  ;;  %v1395_v45 = vld [vmem:[%s2095_s9 + $0x18] sm:$0xff]  ;;  %v1397_v46 = vld [vmem:[%s2095_s9 + $0x20] sm:$0xff]  ;;  %p1454_p11 = scmp.ge.s32.totalorder %s1453_s20, %s2605_s18  ;;  %p1382_p12 = scmp.ge.s32.totalorder %s1383_s19, %s2605_s18 }
 0x27c   : >> { %1394 = vst [vmem:[%s2091_s27 + $0x10] sm:$0xff] %v1393_v34  ;;  %v1399_v60 = vld [vmem:[%s2095_s9 + $0x28] sm:$0xff]  ;;  %1396 = vst [vmem:[%s2091_s27 + $0x18] sm:$0xff] %v1395_v45  ;;  %v1401_v1 = vld [vmem:[%s2095_s9 + $0x30] sm:$0xff] }
 0x27d   : >> { %1398 = vst [vmem:[%s2091_s27 + $0x20] sm:$0xff] %v1397_v46  ;;  %1400 = vst [vmem:[%s2091_s27 + $0x28] sm:$0xff] %v1399_v60  ;;  %v1403_v35 = vld [vmem:[%s2095_s9 + $0x38] sm:$0xff]  ;;  %v1405_v36 = vld [vmem:[%s2095_s9 + $0x40] sm:$0xff]  ;;  %s2751_s20 = smov (%p1454_p11, %s1453_s20), 0 }
 0x27e   : >> { %1402 = vst [vmem:[%s2091_s27 + $0x30] sm:$0xff] %v1401_v1  ;;  %1404 = vst [vmem:[%s2091_s27 + $0x38] sm:$0xff] %v1403_v35  ;;  %v1407_v38 = vld [vmem:[%s2095_s9 + $0x48] sm:$0xff]  ;;  %v1409_v39 = vld [vmem:[%s2095_s9 + $0x50] sm:$0xff]  ;;  %s1636_s21 = sshll.u32 %s2751_s20, 8  ;;  %s2744_s12 = smov %s2751_s20 }
 0x27f   : >> { %1406 = vst [vmem:[%s2091_s27 + $0x40] sm:$0xff] %v1405_v36  ;;  %v1411_v40 = vld [vmem:[%s2095_s9 + $0x58] sm:$0xff]  ;;  %1408 = vst [vmem:[%s2091_s27 + $0x48] sm:$0xff] %v1407_v38  ;;  %v1413_v56 = vld [vmem:[%s2095_s9 + $0x60] sm:$0xff]  ;;  %s2672_s22 = scalar_lea.vmem %s2530_s10, %s1636_s21 [#allocation2]   ;;  %s1459_s23 = scalar_lea.vmem %s2599_s16, %s1636_s21  }
 0x280   : >> { %1410 = vst [vmem:[%s2091_s27 + $0x50] sm:$0xff] %v1409_v39  ;;  %1412 = vst [vmem:[%s2091_s27 + $0x58] sm:$0xff] %v1411_v40  ;;  %v1415_v41 = vld [vmem:[%s2095_s9 + $0x68] sm:$0xff]  ;;  %v1417_v57 = vld [vmem:[%s2095_s9 + $0x70] sm:$0xff] }
 0x281   : >> { %1414 = vst [vmem:[%s2091_s27 + $0x60] sm:$0xff] %v1413_v56  ;;  %1416 = vst [vmem:[%s2091_s27 + $0x68] sm:$0xff] %v1415_v41  ;;  %v1419_v51 = vld [vmem:[%s2095_s9 + $0x78] sm:$0xff]  ;;  %v1421_v3 = vld [vmem:[%s2095_s9 + $0x80] sm:$0xff] }
 0x282   : >> { %1418 = vst [vmem:[%s2091_s27 + $0x70] sm:$0xff] %v1417_v57  ;;  %v1423_v42 = vld [vmem:[%s2095_s9 + $0x88] sm:$0xff]  ;;  %1420 = vst [vmem:[%s2091_s27 + $0x78] sm:$0xff] %v1419_v51  ;;  %v1425_v44 = vld [vmem:[%s2095_s9 + $0x90] sm:$0xff] }
 0x283   : >> { %1422 = vst [vmem:[%s2091_s27 + $0x80] sm:$0xff] %v1421_v3  ;;  %1424 = vst [vmem:[%s2091_s27 + $0x88] sm:$0xff] %v1423_v42  ;;  %v1427_v47 = vld [vmem:[%s2095_s9 + $0x98] sm:$0xff]  ;;  %v1429_v48 = vld [vmem:[%s2095_s9 + $0xa0] sm:$0xff] }
 0x284   : >> { %1426 = vst [vmem:[%s2091_s27 + $0x90] sm:$0xff] %v1425_v44  ;;  %1428 = vst [vmem:[%s2091_s27 + $0x98] sm:$0xff] %v1427_v47  ;;  %v1431_v49 = vld [vmem:[%s2095_s9 + $0xa8] sm:$0xff]  ;;  %v1433_v50 = vld [vmem:[%s2095_s9 + $0xb0] sm:$0xff]  ;;  %1385 = sbr.rel (!%p1382_p12) target bundleno = 634 (0x27a), region = 138 }
 0x285   : >> { %1430 = vst [vmem:[%s2091_s27 + $0xa0] sm:$0xff] %v1429_v48  ;;  %v1435_v53 = vld [vmem:[%s2095_s9 + $0xb8] sm:$0xff]  ;;  %1432 = vst [vmem:[%s2091_s27 + $0xa8] sm:$0xff] %v1431_v49  ;;  %v1437_v54 = vld [vmem:[%s2095_s9 + $0xc0] sm:$0xff] }
 0x286   : >> { %1434 = vst [vmem:[%s2091_s27 + $0xb0] sm:$0xff] %v1433_v50  ;;  %1436 = vst [vmem:[%s2091_s27 + $0xb8] sm:$0xff] %v1435_v53  ;;  %v1439_v55 = vld [vmem:[%s2095_s9 + $0xc8] sm:$0xff]  ;;  %v1441_v58 = vld [vmem:[%s2095_s9 + $0xd0] sm:$0xff] }
 0x287   : >> { %1438 = vst [vmem:[%s2091_s27 + $0xc0] sm:$0xff] %v1437_v54  ;;  %1440 = vst [vmem:[%s2091_s27 + $0xc8] sm:$0xff] %v1439_v55  ;;  %v1443_v59 = vld [vmem:[%s2095_s9 + $0xd8] sm:$0xff]  ;;  %v1445_v61 = vld [vmem:[%s2095_s9 + $0xe0] sm:$0xff] }
 0x288   : >> { %1442 = vst [vmem:[%s2091_s27 + $0xd0] sm:$0xff] %v1441_v58  ;;  %v1447_v62 = vld [vmem:[%s2095_s9 + $0xe8] sm:$0xff]  ;;  %1444 = vst [vmem:[%s2091_s27 + $0xd8] sm:$0xff] %v1443_v59  ;;  %v1449_v63 = vld [vmem:[%s2095_s9 + $0xf0] sm:$0xff] }
 0x289   : >> { %1446 = vst [vmem:[%s2091_s27 + $0xe0] sm:$0xff] %v1445_v61  ;;  %1448 = vst [vmem:[%s2091_s27 + $0xe8] sm:$0xff] %v1447_v62  ;;  %v1451_v22 = vld [vmem:[%s2095_s9 + $0xf8] sm:$0xff]  ;;  %s2743_s9 = smov %s2672_s22 }
 0x28a   : >> { %1450 = vst [vmem:[%s2091_s27 + $0xf0] sm:$0xff] %v1449_v63  ;;  %1452 = vst [vmem:[%s2091_s27 + $0xf8] sm:$0xff] %v1451_v22  ;;  %s2742_s27 = smov %s1459_s23 }
 0x28b PF: > { %s2713_s26 = sand.u32 31, %s2749_s24   ;;  %s1647_s29 = sshll.u32 %s2605_s18, 8 }
 0x28c   : > { %s1464_s30 = scalar_lea.vmem %s2530_s10, %s1647_s29 [#allocation2]   ;;  %s1466_s11 = scalar_lea.vmem %s2599_s16, %s1647_s29  }
 0x28d   : > { %p1641_p13 = scmp.le.s32.totalorder %s2713_s26, 0 }
 0x28e   : > { %s2105_s13 = smov (!%p1641_p13), %s1466_s11   ;;  %s2109_s14 = smov (!%p1641_p13), %s1464_s30  }
 0x28f   : > { %1557 = sbr.rel (%p1641_p13) target bundleno = 672 (0x2a0), region = 143  ;;  %s2113_s15 = smov (!%p1641_p13), 0  }
 0x290   : > { %s2117_s17 = smov (!%p1641_p13), 0  }
 0x296 LB: >> { %v1476_v4 = vld [vmem:[%s2111_s14] sm:$0xff]  ;;  %s1478_s24 = sadd.s32 1, %s2115_s15  ;;  %s1470_s17 = sadd.s32 1, %s2119_s17   ;;  %s2119_s17 = sphi %s2117_s17, %s1470_s17   ;;  %s2115_s15 = sphi %s2113_s15, %s2114_s15   ;;  %s2111_s14 = sphi %s2109_s14, %s1483_s14   ;;  %s2107_s13 = sphi %s2105_s13, %s1484_s13  }
 0x297   : >> { %1477 = vst [vmem:[%s2107_s13] sm:$0xff] %v1476_v4  ;;  %p1479_p0 = scmp.ge.s32.totalorder %s1478_s24, %s2713_s26  ;;  %p1469_p1 = scmp.ge.s32.totalorder %s1470_s17, %s2713_s26 }
 0x299   : >> { %s2753_s24 = smov (%p1479_p0, %s1478_s24), 0  ;;  %1472 = sbr.rel (!%p1469_p1) target bundleno = 662 (0x296), region = 149 }
 0x29a   : >> { %s1642_s10 = sshll.u32 %s2753_s24, 3  ;;  %s2114_s15 = smov %s2753_s24  }
 0x29b   : >> { %s1483_s14 = scalar_lea.vmem %s1464_s30, %s1642_s10 [#allocation2]   ;;  %s1484_s13 = scalar_lea.vmem %s1466_s11, %s1642_s10  }
 0x2a0 PF: > { %p14_p2 = scmp.ge.s32.totalorder %s2177_s28, 5   ;;  %s2745_s24 = smov %s2083_s25 }
 0x2a1   : > { %s2746_s25 = smov %s2185_s8  ;;  %s2747_s26 = smov %s2177_s28 }
 0x2a2   :  { %16 = sbr.rel (!%p14_p2) target bundleno = 2 (0x2), region = 160 }

</bundles_post_ra>
